<compile_context>
chip_gen: v6e
topology: v6e:2x2x1
jax: 0.10.0
libtpu: 0.0.40
codegen_flags: <defaults>
</compile_context>

<pallas_src>
import jax
import jax.numpy as jnp
from jax.experimental import pallas as pl
from jax.experimental.pallas import tpu as pltpu


# ----------------------------------------------------------------------------
# Pallas kernel 1: channel-stationary conv GEMM  out = relu(W @ patchesT + b)
# ----------------------------------------------------------------------------
def _conv_gemm_kernel(w_ref, p_ref, b_ref, o_ref):
    acc = jnp.dot(w_ref[...], p_ref[...], preferred_element_type=jnp.float32)
    acc = acc + b_ref[...]                      # (Cout, tm) + (Cout, 1) broadcast
    o_ref[...] = jnp.maximum(acc, 0.0).astype(o_ref.dtype)


def conv_gemm_pallas(w2d, patchesT, bias2d, *, n_blocks=2):
    """out (Cout, M) = relu(w2d (Cout, K) @ patchesT (K, M) + bias (Cout, 1))."""
    Cout, K = w2d.shape
    Kp, M = patchesT.shape
    assert K == Kp
    if n_blocks < 1 or M % (n_blocks * 128) != 0:
        n_blocks = 1                            # explicit fallback: single block
    tm = M // n_blocks
    return pl.pallas_call(
        _conv_gemm_kernel,
        out_shape=jax.ShapeDtypeStruct((Cout, M), jnp.float32),
        grid_spec=pl.GridSpec(
            grid=(n_blocks,),
            in_specs=[
                pl.BlockSpec((Cout, K), lambda i: (0, 0)),
                pl.BlockSpec((K, tm), lambda i: (0, i)),
                pl.BlockSpec((Cout, 1), lambda i: (0, 0)),
            ],
            out_specs=pl.BlockSpec((Cout, tm), lambda i: (0, i)),
        ),
        compiler_params=pltpu.CompilerParams(
            dimension_semantics=("parallel",),
        ),
    )(w2d, patchesT, bias2d)


# ----------------------------------------------------------------------------
# Pallas kernel 2: fused reward head
#   bbox MLP + Linear(8192+32, 128) + ReLU + Linear(128, 1), no HBM concat.
# ----------------------------------------------------------------------------
def _reward_head_kernel(h2_ref, bbox_ref, w1i_ref, w1b_ref, b1_ref,
                        wb_ref, bb_ref, w2_ref, b2_ref, o_ref):
    # bbox MLP: relu(bbox @ Wb + bb)                                   (B, 32)
    bf = jnp.dot(bbox_ref[...], wb_ref[...], preferred_element_type=jnp.float32)
    bf = jnp.maximum(bf + bb_ref[...], 0.0)

    # Linear(8224, 128): bias + bbox slice of the weight ...          (B, 128)
    acc = jnp.dot(bf, w1b_ref[...], preferred_element_type=jnp.float32)
    acc = acc + b1_ref[...]

    # ... + image slice, accumulated per conv channel directly from the
    # (C, B, P) conv-layout features (absorbs the PyTorch NCHW flatten).
    n_ch = h2_ref.shape[0]
    for c in range(n_ch):                       # static unroll (n_ch = 32)
        acc = acc + jnp.dot(h2_ref[c], w1i_ref[c],
                            preferred_element_type=jnp.float32)

    h = jnp.maximum(acc, 0.0)                   # (B, 128)

    # Linear(128, 1) as VPU multiply + lane reduction (no N=1 MXU matmul).
    r = jnp.sum(h * w2_ref[...], axis=-1, keepdims=True) + b2_ref[...]
    o_ref[...] = r.astype(o_ref.dtype)


def _full_block(shape):
    nd = len(shape)
    return pl.BlockSpec(shape, lambda i, _nd=nd: (0,) * _nd)


def reward_head_pallas(h2, bbox, kp):
    B = bbox.shape[0]
    args = (h2, bbox, kp["r1w_img"], kp["r1w_bbox"], kp["r1_b"],
            kp["bbox_w"], kp["bbox_b"], kp["r2_w"], kp["r2_b"])
    return pl.pallas_call(
        _reward_head_kernel,
        out_shape=jax.ShapeDtypeStruct((B, 1), jnp.float32),
        grid_spec=pl.GridSpec(
            grid=(1,),
            in_specs=[_full_block(a.shape) for a in args],
            out_specs=_full_block((B, 1)),
        ),
        compiler_params=pltpu.CompilerParams(
            dimension_semantics=("arbitrary",),
        ),
    )(*args)


# ----------------------------------------------------------------------------
# im2col glue for Conv2d(k=3, s=2, p=1), producing (K, M) directly (no transpose)
# ----------------------------------------------------------------------------
def im2col_T(x_cbhw, ksize=3, stride=2, pad=1):
    """x (C, B, H, W) -> patchesT (ksize*ksize*C, B*Ho*Wo); K order = (kh, kw, c)."""
    C, B, H, W = x_cbhw.shape
    Ho = (H + 2 * pad - ksize) // stride + 1
    Wo = (W + 2 * pad - ksize) // stride + 1
    xp = jnp.pad(x_cbhw, ((0, 0), (0, 0), (pad, pad), (pad, pad)))
    cols = []
    for kh in range(ksize):
        for kw in range(ksize):
            cols.append(xp[:, :, kh:kh + stride * Ho:stride,
                               kw:kw + stride * Wo:stride])    # (C, B, Ho, Wo)
    patches = jnp.stack(cols, axis=0)                          # (k*k, C, B, Ho, Wo)
    return patches.reshape(ksize * ksize * C, B * Ho * Wo), Ho, Wo


# ----------------------------------------------------------------------------
# Parameters
# ----------------------------------------------------------------------------
def init_params(key):
    """PyTorch-style parameters (Linear weights stored as (in, out))."""
    ks = jax.random.split(key, 10)
    s = 0.05
    return {
        "conv1_w": jax.random.normal(ks[0], (16, 3, 3, 3), jnp.float32) * s,
        "conv1_b": jax.random.normal(ks[1], (16,), jnp.float32) * s,
        "conv2_w": jax.random.normal(ks[2], (32, 16, 3, 3), jnp.float32) * s,
        "conv2_b": jax.random.normal(ks[3], (32,), jnp.float32) * s,
        "bbox_w": jax.random.normal(ks[4], (4, 32), jnp.float32) * s,
        "bbox_b": jax.random.normal(ks[5], (32,), jnp.float32) * s,
        "r1_w": jax.random.normal(ks[6], (8192 + 32, 128), jnp.float32) * s,
        "r1_b": jax.random.normal(ks[7], (128,), jnp.float32) * s,
        "r2_w": jax.random.normal(ks[8], (128, 1), jnp.float32) * s,
        "r2_b": jax.random.normal(ks[9], (1,), jnp.float32) * s,
    }


def prepare_params(p):
    """One-time re-layout of the parameters for the kernels (done outside jit)."""
    c1o, c1i = p["conv1_w"].shape[:2]
    c2o, c2i = p["conv2_w"].shape[:2]
    n_bbox = p["bbox_w"].shape[1]                 # 32
    n_img = p["r1_w"].shape[0] - n_bbox           # 8192
    n1 = p["r1_w"].shape[1]                       # 128
    spatial = n_img // c2o                        # 256
    return {
        # conv weights permuted to (Cout, kh, kw, Cin) -> matches im2col_T's
        # (kh, kw, c) patch-row ordering.
        "conv1_w": p["conv1_w"].transpose(0, 2, 3, 1).reshape(c1o, 9 * c1i),
        "conv1_b": p["conv1_b"].reshape(c1o, 1),
        "conv2_w": p["conv2_w"].transpose(0, 2, 3, 1).reshape(c2o, 9 * c2i),
        "conv2_b": p["conv2_b"].reshape(c2o, 1),
        "bbox_w": p["bbox_w"],                                   # (4, 32)
        "bbox_b": p["bbox_b"].reshape(1, n_bbox),                # (1, 32)
        # Linear(8224,128): image rows viewed per conv channel (c, p, n);
        # PyTorch's flatten order (c*256 + p) makes this a pure reshape.
        "r1w_img": p["r1_w"][:n_img].reshape(c2o, spatial, n1),  # (32, 256, 128)
        "r1w_bbox": p["r1_w"][n_img:],                           # (32, 128)
        "r1_b": p["r1_b"].reshape(1, n1),                        # (1, 128)
        "r2_w": p["r2_w"].reshape(1, n1),                        # (1, 128)
        "r2_b": p["r2_b"].reshape(1, 1),                         # (1, 1)
    }


# ----------------------------------------------------------------------------
# Forward
# ----------------------------------------------------------------------------
@jax.jit
def reward_network_forward(kparams, image, bbox):
    """image: (B, 3, 64, 64) NCHW f32; bbox: (B, 4) f32 -> reward (B, 1) f32."""
    B = image.shape[0]

    # Encoder in channel-major (C, B, H, W) layout throughout.
    x = image.transpose(1, 0, 2, 3)                              # (3, B, 64, 64)
    p1, Ho1, Wo1 = im2col_T(x)                                   # (27, B*1024)
    h1 = conv_gemm_pallas(kparams["conv1_w"], p1, kparams["conv1_b"])
    h1 = h1.reshape(-1, B, Ho1, Wo1)                             # (16, B, 32, 32)

    p2, Ho2, Wo2 = im2col_T(h1)                                  # (144, B*256)
    h2 = conv_gemm_pallas(kparams["conv2_w"], p2, kparams["conv2_b"])
    h2 = h2.reshape(-1, B, Ho2 * Wo2)                            # (32, B, 256)

    # Fused reward head (bbox MLP + concat + Linear(8224,128)+ReLU + Linear(128,1)).
    return reward_head_pallas(h2, bbox, kparams)


# ----------------------------------------------------------------------------
# Plain-XLA reference of the PyTorch module (for verification)
# ----------------------------------------------------------------------------
def reward_network_reference(params, image, bbox):
    hi = jax.lax.Precision.HIGHEST

    def conv(x, w, b):
        y = jax.lax.conv_general_dilated(
            x, w, window_strides=(2, 2), padding=((1, 1), (1, 1)),
            dimension_numbers=("NCHW", "OIHW", "NCHW"), precision=hi)
        return jax.nn.relu(y + b.reshape(1, -1, 1, 1))

    h = conv(image, params["conv1_w"], params["conv1_b"])
    h = conv(h, params["conv2_w"], params["conv2_b"])
    img_f = h.reshape(h.shape[0], -1)                            # NCHW flatten
    bbox_f = jax.nn.relu(jnp.dot(bbox, params["bbox_w"], precision=hi)
                         + params["bbox_b"])
    comb = jnp.concatenate([img_f, bbox_f], axis=1)
    r = jax.nn.relu(jnp.dot(comb, params["r1_w"], precision=hi) + params["r1_b"])
    return jnp.dot(r, params["r2_w"], precision=hi) + params["r2_b"]


if __name__ == "__main__":
    key = jax.random.PRNGKey(0)
    kp_key, ki, kb = jax.random.split(key, 3)

    params = init_params(kp_key)
    kparams = prepare_params(params)

    # Flatten output 8192 = 32*16*16 implies a 64x64 input image.
    B = 2
    image = jax.random.normal(ki, (B, 3, 64, 64), jnp.float32)
    bbox = jax.random.uniform(kb, (B, 4), jnp.float32)

    out = reward_network_forward(kparams, image, bbox)
    out = jax.block_until_ready(out)
    assert out.shape == (B, 1), out.shape
    assert out.dtype == jnp.float32

    ref = jax.block_until_ready(reward_network_reference(params, image, bbox))
    assert jnp.allclose(out, ref, atol=5e-3, rtol=5e-3), (
        "max abs diff %g" % float(jnp.max(jnp.abs(out - ref))))

    print("KERNEL_OK")
</pallas_src>

<mosaic_0001>
module attributes {stable_mosaic.version = 11 : i64} {
  func.func @_conv_gemm_kernel(%arg0: i32, %arg1: memref<16x27xf32, #tpu.memory_space<vmem>>, %arg2: memref<27x1024xf32, #tpu.memory_space<vmem>>, %arg3: memref<16x1xf32, #tpu.memory_space<vmem>>, %arg4: memref<16x1024xf32, #tpu.memory_space<vmem>>) attributes {dimension_semantics = [#tpu.dimension_semantics<parallel>], iteration_bounds = array<i64: 2>, scalar_prefetch = 0 : i64, scratch_operands = 0 : i64, tpu.core_type = #tpu.core_type<tc>, window_params = [{pipeline_mode = #tpu.pipeline_mode<synchronous>, transform_indices = @transform_0, window_bounds = array<i64: 16, 27>}, {transform_indices = @transform_1, window_bounds = array<i64: 27, 1024>}, {pipeline_mode = #tpu.pipeline_mode<synchronous>, transform_indices = @transform_2, window_bounds = array<i64: 16, 1>}, {transform_indices = @transform_3, window_bounds = array<i64: 16, 1024>}]} {
    %c0 = arith.constant 0 : index
    %c0_0 = arith.constant 0 : index
    %0 = vector.load %arg1[%c0, %c0_0] : memref<16x27xf32, #tpu.memory_space<vmem>>, vector<16x27xf32>
    %c0_1 = arith.constant 0 : index
    %c0_2 = arith.constant 0 : index
    %1 = vector.load %arg2[%c0_1, %c0_2] : memref<27x1024xf32, #tpu.memory_space<vmem>>, vector<27x1024xf32>
    %cst = arith.constant dense<0.000000e+00> : vector<16x1024xf32>
    %2 = tpu.matmul %0, %1, %cst {dimension_numbers = #tpu.dot_dimension_numbers<[1], [0], [0], [1], [0, 0, 1, 1], [], []>} : vector<16x27xf32>, vector<27x1024xf32>, vector<16x1024xf32> -> vector<16x1024xf32>
    %c0_3 = arith.constant 0 : index
    %c0_4 = arith.constant 0 : index
    %3 = vector.load %arg3[%c0_3, %c0_4] : memref<16x1xf32, #tpu.memory_space<vmem>>, vector<16x1xf32>
    %4 = vector.broadcast %3 : vector<16x1xf32> to vector<16x1024xf32>
    %5 = arith.addf %2, %4 : vector<16x1024xf32>
    %cst_5 = arith.constant 0.000000e+00 : f32
    %6 = vector.broadcast %cst_5 : f32 to vector<16x1024xf32>
    %7 = arith.maximumf %5, %6 : vector<16x1024xf32>
    %c0_6 = arith.constant 0 : index
    %c0_7 = arith.constant 0 : index
    %8 = vector.load %arg4[%c0_6, %c0_7] : memref<16x1024xf32, #tpu.memory_space<vmem>>, vector<16x1024xf32>
    tpu.vector_store %arg4[%c0_6, %c0_7], %7 {strides = array<i32>} : memref<16x1024xf32, #tpu.memory_space<vmem>>, vector<16x1024xf32>,
    return
  }
  func.func @transform_0(%arg0: i32) -> (i32, i32) {
    %c0_i32 = arith.constant 0 : i32
    %c0_i32_0 = arith.constant 0 : i32
    %c0_i32_1 = arith.constant 0 : i32
    return %c0_i32, %c0_i32_0 : i32, i32
  }
  func.func @transform_1(%arg0: i32) -> (i32, i32) {
    %c0_i32 = arith.constant 0 : i32
    %c0_i32_0 = arith.constant 0 : i32
    return %c0_i32, %arg0 : i32, i32
  }
  func.func @transform_2(%arg0: i32) -> (i32, i32) {
    %c0_i32 = arith.constant 0 : i32
    %c0_i32_0 = arith.constant 0 : i32
    %c0_i32_1 = arith.constant 0 : i32
    return %c0_i32, %c0_i32_0 : i32, i32
  }
  func.func @transform_3(%arg0: i32) -> (i32, i32) {
    %c0_i32 = arith.constant 0 : i32
    %c0_i32_0 = arith.constant 0 : i32
    return %c0_i32, %arg0 : i32, i32
  }
}

module attributes {stable_mosaic.version = 11 : i64} {
  func.func @_conv_gemm_kernel(%arg0: i32, %arg1: memref<32x144xf32, #tpu.memory_space<vmem>>, %arg2: memref<144x256xf32, #tpu.memory_space<vmem>>, %arg3: memref<32x1xf32, #tpu.memory_space<vmem>>, %arg4: memref<32x256xf32, #tpu.memory_space<vmem>>) attributes {dimension_semantics = [#tpu.dimension_semantics<parallel>], iteration_bounds = array<i64: 2>, scalar_prefetch = 0 : i64, scratch_operands = 0 : i64, tpu.core_type = #tpu.core_type<tc>, window_params = [{pipeline_mode = #tpu.pipeline_mode<synchronous>, transform_indices = @transform_0, window_bounds = array<i64: 32, 144>}, {transform_indices = @transform_1, window_bounds = array<i64: 144, 256>}, {pipeline_mode = #tpu.pipeline_mode<synchronous>, transform_indices = @transform_2, window_bounds = array<i64: 32, 1>}, {transform_indices = @transform_3, window_bounds = array<i64: 32, 256>}]} {
    %c0 = arith.constant 0 : index
    %c0_0 = arith.constant 0 : index
    %0 = vector.load %arg1[%c0, %c0_0] : memref<32x144xf32, #tpu.memory_space<vmem>>, vector<32x144xf32>
    %c0_1 = arith.constant 0 : index
    %c0_2 = arith.constant 0 : index
    %1 = vector.load %arg2[%c0_1, %c0_2] : memref<144x256xf32, #tpu.memory_space<vmem>>, vector<144x256xf32>
    %cst = arith.constant dense<0.000000e+00> : vector<32x256xf32>
    %2 = tpu.matmul %0, %1, %cst {dimension_numbers = #tpu.dot_dimension_numbers<[1], [0], [0], [1], [0, 0, 1, 1], [], []>} : vector<32x144xf32>, vector<144x256xf32>, vector<32x256xf32> -> vector<32x256xf32>
    %c0_3 = arith.constant 0 : index
    %c0_4 = arith.constant 0 : index
    %3 = vector.load %arg3[%c0_3, %c0_4] : memref<32x1xf32, #tpu.memory_space<vmem>>, vector<32x1xf32>
    %4 = vector.broadcast %3 : vector<32x1xf32> to vector<32x256xf32>
    %5 = arith.addf %2, %4 : vector<32x256xf32>
    %cst_5 = arith.constant 0.000000e+00 : f32
    %6 = vector.broadcast %cst_5 : f32 to vector<32x256xf32>
    %7 = arith.maximumf %5, %6 : vector<32x256xf32>
    %c0_6 = arith.constant 0 : index
    %c0_7 = arith.constant 0 : index
    %8 = vector.load %arg4[%c0_6, %c0_7] : memref<32x256xf32, #tpu.memory_space<vmem>>, vector<32x256xf32>
    tpu.vector_store %arg4[%c0_6, %c0_7], %7 {strides = array<i32>} : memref<32x256xf32, #tpu.memory_space<vmem>>, vector<32x256xf32>,
    return
  }
  func.func @transform_0(%arg0: i32) -> (i32, i32) {
    %c0_i32 = arith.constant 0 : i32
    %c0_i32_0 = arith.constant 0 : i32
    %c0_i32_1 = arith.constant 0 : i32
    return %c0_i32, %c0_i32_0 : i32, i32
  }
  func.func @transform_1(%arg0: i32) -> (i32, i32) {
    %c0_i32 = arith.constant 0 : i32
    %c0_i32_0 = arith.constant 0 : i32
    return %c0_i32, %arg0 : i32, i32
  }
  func.func @transform_2(%arg0: i32) -> (i32, i32) {
    %c0_i32 = arith.constant 0 : i32
    %c0_i32_0 = arith.constant 0 : i32
    %c0_i32_1 = arith.constant 0 : i32
    return %c0_i32, %c0_i32_0 : i32, i32
  }
  func.func @transform_3(%arg0: i32) -> (i32, i32) {
    %c0_i32 = arith.constant 0 : i32
    %c0_i32_0 = arith.constant 0 : i32
    return %c0_i32, %arg0 : i32, i32
  }
}

module attributes {stable_mosaic.version = 11 : i64} {
  func.func @_reward_head_kernel(%arg0: i32, %arg1: memref<32x2x256xf32, #tpu.memory_space<vmem>>, %arg2: memref<2x4xf32, #tpu.memory_space<vmem>>, %arg3: memref<32x256x128xf32, #tpu.memory_space<vmem>>, %arg4: memref<32x128xf32, #tpu.memory_space<vmem>>, %arg5: memref<1x128xf32, #tpu.memory_space<vmem>>, %arg6: memref<4x32xf32, #tpu.memory_space<vmem>>, %arg7: memref<1x32xf32, #tpu.memory_space<vmem>>, %arg8: memref<1x128xf32, #tpu.memory_space<vmem>>, %arg9: memref<1x1xf32, #tpu.memory_space<vmem>>, %arg10: memref<2x1xf32, #tpu.memory_space<vmem>>) attributes {dimension_semantics = [#tpu.dimension_semantics<arbitrary>], iteration_bounds = array<i64: 1>, scalar_prefetch = 0 : i64, scratch_operands = 0 : i64, tpu.core_type = #tpu.core_type<tc>, window_params = [{pipeline_mode = #tpu.pipeline_mode<synchronous>, transform_indices = @transform_0, window_bounds = array<i64: 32, 2, 256>}, {pipeline_mode = #tpu.pipeline_mode<synchronous>, transform_indices = @transform_1, window_bounds = array<i64: 2, 4>}, {pipeline_mode = #tpu.pipeline_mode<synchronous>, transform_indices = @transform_2, window_bounds = array<i64: 32, 256, 128>}, {pipeline_mode = #tpu.pipeline_mode<synchronous>, transform_indices = @transform_3, window_bounds = array<i64: 32, 128>}, {pipeline_mode = #tpu.pipeline_mode<synchronous>, transform_indices = @transform_4, window_bounds = array<i64: 1, 128>}, {pipeline_mode = #tpu.pipeline_mode<synchronous>, transform_indices = @transform_5, window_bounds = array<i64: 4, 32>}, {pipeline_mode = #tpu.pipeline_mode<synchronous>, transform_indices = @transform_6, window_bounds = array<i64: 1, 32>}, {pipeline_mode = #tpu.pipeline_mode<synchronous>, transform_indices = @transform_7, window_bounds = array<i64: 1, 128>}, {pipeline_mode = #tpu.pipeline_mode<synchronous>, transform_indices = @transform_8, window_bounds = array<i64: 1, 1>}, {pipeline_mode = #tpu.pipeline_mode<synchronous>, transform_indices = @transform_9, window_bounds = array<i64: 2, 1>}]} {
    %c0 = arith.constant 0 : index
    %c0_0 = arith.constant 0 : index
    %0 = vector.load %arg2[%c0, %c0_0] : memref<2x4xf32, #tpu.memory_space<vmem>>, vector<2x4xf32>
    %c0_1 = arith.constant 0 : index
    %c0_2 = arith.constant 0 : index
    %1 = vector.load %arg6[%c0_1, %c0_2] : memref<4x32xf32, #tpu.memory_space<vmem>>, vector<4x32xf32>
    %cst = arith.constant dense<0.000000e+00> : vector<2x32xf32>
    %2 = tpu.matmul %0, %1, %cst {dimension_numbers = #tpu.dot_dimension_numbers<[1], [0], [0], [1], [0, 0, 1, 1], [], []>} : vector<2x4xf32>, vector<4x32xf32>, vector<2x32xf32> -> vector<2x32xf32>
    %c0_3 = arith.constant 0 : index
    %c0_4 = arith.constant 0 : index
    %3 = vector.load %arg7[%c0_3, %c0_4] : memref<1x32xf32, #tpu.memory_space<vmem>>, vector<1x32xf32>
    %4 = vector.broadcast %3 : vector<1x32xf32> to vector<2x32xf32>
    %5 = arith.addf %2, %4 : vector<2x32xf32>
    %cst_5 = arith.constant 0.000000e+00 : f32
    %6 = vector.broadcast %cst_5 : f32 to vector<2x32xf32>
    %7 = arith.maximumf %5, %6 : vector<2x32xf32>
    %c0_6 = arith.constant 0 : index
    %c0_7 = arith.constant 0 : index
    %8 = vector.load %arg4[%c0_6, %c0_7] : memref<32x128xf32, #tpu.memory_space<vmem>>, vector<32x128xf32>
    %cst_8 = arith.constant dense<0.000000e+00> : vector<2x128xf32>
    %9 = tpu.matmul %7, %8, %cst_8 {dimension_numbers = #tpu.dot_dimension_numbers<[1], [0], [0], [1], [0, 0, 1, 1], [], []>} : vector<2x32xf32>, vector<32x128xf32>, vector<2x128xf32> -> vector<2x128xf32>
    %c0_9 = arith.constant 0 : index
    %c0_10 = arith.constant 0 : index
    %10 = vector.load %arg5[%c0_9, %c0_10] : memref<1x128xf32, #tpu.memory_space<vmem>>, vector<1x128xf32>
    %11 = vector.broadcast %10 : vector<1x128xf32> to vector<2x128xf32>
    %12 = arith.addf %9, %11 : vector<2x128xf32>
    %c0_11 = arith.constant 0 : index
    %c0_12 = arith.constant 0 : index
    %c0_13 = arith.constant 0 : index
    %13 = vector.load %arg1[%c0_11, %c0_12, %c0_13] : memref<32x2x256xf32, #tpu.memory_space<vmem>>, vector<1x2x256xf32>
    %14 = vector.shape_cast %13 : vector<1x2x256xf32> to vector<2x256xf32>
    %c0_14 = arith.constant 0 : index
    %c0_15 = arith.constant 0 : index
    %c0_16 = arith.constant 0 : index
    %15 = vector.load %arg3[%c0_14, %c0_15, %c0_16] : memref<32x256x128xf32, #tpu.memory_space<vmem>>, vector<1x256x128xf32>
    %16 = vector.shape_cast %15 : vector<1x256x128xf32> to vector<256x128xf32>
    %cst_17 = arith.constant dense<0.000000e+00> : vector<2x128xf32>
    %17 = tpu.matmul %14, %16, %cst_17 {dimension_numbers = #tpu.dot_dimension_numbers<[1], [0], [0], [1], [0, 0, 1, 1], [], []>} : vector<2x256xf32>, vector<256x128xf32>, vector<2x128xf32> -> vector<2x128xf32>
    %18 = arith.addf %12, %17 : vector<2x128xf32>
    %c1 = arith.constant 1 : index
    %c0_18 = arith.constant 0 : index
    %c0_19 = arith.constant 0 : index
    %19 = vector.load %arg1[%c1, %c0_18, %c0_19] : memref<32x2x256xf32, #tpu.memory_space<vmem>>, vector<1x2x256xf32>
    %20 = vector.shape_cast %19 : vector<1x2x256xf32> to vector<2x256xf32>
    %c1_20 = arith.constant 1 : index
    %c0_21 = arith.constant 0 : index
    %c0_22 = arith.constant 0 : index
    %21 = vector.load %arg3[%c1_20, %c0_21, %c0_22] : memref<32x256x128xf32, #tpu.memory_space<vmem>>, vector<1x256x128xf32>
    %22 = vector.shape_cast %21 : vector<1x256x128xf32> to vector<256x128xf32>
    %cst_23 = arith.constant dense<0.000000e+00> : vector<2x128xf32>
    %23 = tpu.matmul %20, %22, %cst_23 {dimension_numbers = #tpu.dot_dimension_numbers<[1], [0], [0], [1], [0, 0, 1, 1], [], []>} : vector<2x256xf32>, vector<256x128xf32>, vector<2x128xf32> -> vector<2x128xf32>
    %24 = arith.addf %18, %23 : vector<2x128xf32>
    %c2 = arith.constant 2 : index
    %c0_24 = arith.constant 0 : index
    %c0_25 = arith.constant 0 : index
    %25 = vector.load %arg1[%c2, %c0_24, %c0_25] : memref<32x2x256xf32, #tpu.memory_space<vmem>>, vector<1x2x256xf32>
    %26 = vector.shape_cast %25 : vector<1x2x256xf32> to vector<2x256xf32>
    %c2_26 = arith.constant 2 : index
    %c0_27 = arith.constant 0 : index
    %c0_28 = arith.constant 0 : index
    %27 = vector.load %arg3[%c2_26, %c0_27, %c0_28] : memref<32x256x128xf32, #tpu.memory_space<vmem>>, vector<1x256x128xf32>
    %28 = vector.shape_cast %27 : vector<1x256x128xf32> to vector<256x128xf32>
    %cst_29 = arith.constant dense<0.000000e+00> : vector<2x128xf32>
    %29 = tpu.matmul %26, %28, %cst_29 {dimension_numbers = #tpu.dot_dimension_numbers<[1], [0], [0], [1], [0, 0, 1, 1], [], []>} : vector<2x256xf32>, vector<256x128xf32>, vector<2x128xf32> -> vector<2x128xf32>
    %30 = arith.addf %24, %29 : vector<2x128xf32>
    %c3 = arith.constant 3 : index
    %c0_30 = arith.constant 0 : index
    %c0_31 = arith.constant 0 : index
    %31 = vector.load %arg1[%c3, %c0_30, %c0_31] : memref<32x2x256xf32, #tpu.memory_space<vmem>>, vector<1x2x256xf32>
    %32 = vector.shape_cast %31 : vector<1x2x256xf32> to vector<2x256xf32>
    %c3_32 = arith.constant 3 : index
    %c0_33 = arith.constant 0 : index
    %c0_34 = arith.constant 0 : index
    %33 = vector.load %arg3[%c3_32, %c0_33, %c0_34] : memref<32x256x128xf32, #tpu.memory_space<vmem>>, vector<1x256x128xf32>
    %34 = vector.shape_cast %33 : vector<1x256x128xf32> to vector<256x128xf32>
    %cst_35 = arith.constant dense<0.000000e+00> : vector<2x128xf32>
    %35 = tpu.matmul %32, %34, %cst_35 {dimension_numbers = #tpu.dot_dimension_numbers<[1], [0], [0], [1], [0, 0, 1, 1], [], []>} : vector<2x256xf32>, vector<256x128xf32>, vector<2x128xf32> -> vector<2x128xf32>
    %36 = arith.addf %30, %35 : vector<2x128xf32>
    %c4 = arith.constant 4 : index
    %c0_36 = arith.constant 0 : index
    %c0_37 = arith.constant 0 : index
    %37 = vector.load %arg1[%c4, %c0_36, %c0_37] : memref<32x2x256xf32, #tpu.memory_space<vmem>>, vector<1x2x256xf32>
    %38 = vector.shape_cast %37 : vector<1x2x256xf32> to vector<2x256xf32>
    %c4_38 = arith.constant 4 : index
    %c0_39 = arith.constant 0 : index
    %c0_40 = arith.constant 0 : index
    %39 = vector.load %arg3[%c4_38, %c0_39, %c0_40] : memref<32x256x128xf32, #tpu.memory_space<vmem>>, vector<1x256x128xf32>
    %40 = vector.shape_cast %39 : vector<1x256x128xf32> to vector<256x128xf32>
    %cst_41 = arith.constant dense<0.000000e+00> : vector<2x128xf32>
    %41 = tpu.matmul %38, %40, %cst_41 {dimension_numbers = #tpu.dot_dimension_numbers<[1], [0], [0], [1], [0, 0, 1, 1], [], []>} : vector<2x256xf32>, vector<256x128xf32>, vector<2x128xf32> -> vector<2x128xf32>
    %42 = arith.addf %36, %41 : vector<2x128xf32>
    %c5 = arith.constant 5 : index
    %c0_42 = arith.constant 0 : index
    %c0_43 = arith.constant 0 : index
    %43 = vector.load %arg1[%c5, %c0_42, %c0_43] : memref<32x2x256xf32, #tpu.memory_space<vmem>>, vector<1x2x256xf32>
    %44 = vector.shape_cast %43 : vector<1x2x256xf32> to vector<2x256xf32>
    %c5_44 = arith.constant 5 : index
    %c0_45 = arith.constant 0 : index
    %c0_46 = arith.constant 0 : index
    %45 = vector.load %arg3[%c5_44, %c0_45, %c0_46] : memref<32x256x128xf32, #tpu.memory_space<vmem>>, vector<1x256x128xf32>
    %46 = vector.shape_cast %45 : vector<1x256x128xf32> to vector<256x128xf32>
    %cst_47 = arith.constant dense<0.000000e+00> : vector<2x128xf32>
    %47 = tpu.matmul %44, %46, %cst_47 {dimension_numbers = #tpu.dot_dimension_numbers<[1], [0], [0], [1], [0, 0, 1, 1], [], []>} : vector<2x256xf32>, vector<256x128xf32>, vector<2x128xf32> -> vector<2x128xf32>
    %48 = arith.addf %42, %47 : vector<2x128xf32>
    %c6 = arith.constant 6 : index
    %c0_48 = arith.constant 0 : index
    %c0_49 = arith.constant 0 : index
    %49 = vector.load %arg1[%c6, %c0_48, %c0_49] : memref<32x2x256xf32, #tpu.memory_space<vmem>>, vector<1x2x256xf32>
    %50 = vector.shape_cast %49 : vector<1x2x256xf32> to vector<2x256xf32>
    %c6_50 = arith.constant 6 : index
    %c0_51 = arith.constant 0 : index
    %c0_52 = arith.constant 0 : index
    %51 = vector.load %arg3[%c6_50, %c0_51, %c0_52] : memref<32x256x128xf32, #tpu.memory_space<vmem>>, vector<1x256x128xf32>
    %52 = vector.shape_cast %51 : vector<1x256x128xf32> to vector<256x128xf32>
    %cst_53 = arith.constant dense<0.000000e+00> : vector<2x128xf32>
    %53 = tpu.matmul %50, %52, %cst_53 {dimension_numbers = #tpu.dot_dimension_numbers<[1], [0], [0], [1], [0, 0, 1, 1], [], []>} : vector<2x256xf32>, vector<256x128xf32>, vector<2x128xf32> -> vector<2x128xf32>
    %54 = arith.addf %48, %53 : vector<2x128xf32>
    %c7 = arith.constant 7 : index
    %c0_54 = arith.constant 0 : index
    %c0_55 = arith.constant 0 : index
    %55 = vector.load %arg1[%c7, %c0_54, %c0_55] : memref<32x2x256xf32, #tpu.memory_space<vmem>>, vector<1x2x256xf32>
    %56 = vector.shape_cast %55 : vector<1x2x256xf32> to vector<2x256xf32>
    %c7_56 = arith.constant 7 : index
    %c0_57 = arith.constant 0 : index
    %c0_58 = arith.constant 0 : index
    %57 = vector.load %arg3[%c7_56, %c0_57, %c0_58] : memref<32x256x128xf32, #tpu.memory_space<vmem>>, vector<1x256x128xf32>
    %58 = vector.shape_cast %57 : vector<1x256x128xf32> to vector<256x128xf32>
    %cst_59 = arith.constant dense<0.000000e+00> : vector<2x128xf32>
    %59 = tpu.matmul %56, %58, %cst_59 {dimension_numbers = #tpu.dot_dimension_numbers<[1], [0], [0], [1], [0, 0, 1, 1], [], []>} : vector<2x256xf32>, vector<256x128xf32>, vector<2x128xf32> -> vector<2x128xf32>
    %60 = arith.addf %54, %59 : vector<2x128xf32>
    %c8 = arith.constant 8 : index
    %c0_60 = arith.constant 0 : index
    %c0_61 = arith.constant 0 : index
    %61 = vector.load %arg1[%c8, %c0_60, %c0_61] : memref<32x2x256xf32, #tpu.memory_space<vmem>>, vector<1x2x256xf32>
    %62 = vector.shape_cast %61 : vector<1x2x256xf32> to vector<2x256xf32>
    %c8_62 = arith.constant 8 : index
    %c0_63 = arith.constant 0 : index
    %c0_64 = arith.constant 0 : index
    %63 = vector.load %arg3[%c8_62, %c0_63, %c0_64] : memref<32x256x128xf32, #tpu.memory_space<vmem>>, vector<1x256x128xf32>
    %64 = vector.shape_cast %63 : vector<1x256x128xf32> to vector<256x128xf32>
    %cst_65 = arith.constant dense<0.000000e+00> : vector<2x128xf32>
    %65 = tpu.matmul %62, %64, %cst_65 {dimension_numbers = #tpu.dot_dimension_numbers<[1], [0], [0], [1], [0, 0, 1, 1], [], []>} : vector<2x256xf32>, vector<256x128xf32>, vector<2x128xf32> -> vector<2x128xf32>
    %66 = arith.addf %60, %65 : vector<2x128xf32>
    %c9 = arith.constant 9 : index
    %c0_66 = arith.constant 0 : index
    %c0_67 = arith.constant 0 : index
    %67 = vector.load %arg1[%c9, %c0_66, %c0_67] : memref<32x2x256xf32, #tpu.memory_space<vmem>>, vector<1x2x256xf32>
    %68 = vector.shape_cast %67 : vector<1x2x256xf32> to vector<2x256xf32>
    %c9_68 = arith.constant 9 : index
    %c0_69 = arith.constant 0 : index
    %c0_70 = arith.constant 0 : index
    %69 = vector.load %arg3[%c9_68, %c0_69, %c0_70] : memref<32x256x128xf32, #tpu.memory_space<vmem>>, vector<1x256x128xf32>
    %70 = vector.shape_cast %69 : vector<1x256x128xf32> to vector<256x128xf32>
    %cst_71 = arith.constant dense<0.000000e+00> : vector<2x128xf32>
    %71 = tpu.matmul %68, %70, %cst_71 {dimension_numbers = #tpu.dot_dimension_numbers<[1], [0], [0], [1], [0, 0, 1, 1], [], []>} : vector<2x256xf32>, vector<256x128xf32>, vector<2x128xf32> -> vector<2x128xf32>
    %72 = arith.addf %66, %71 : vector<2x128xf32>
    %c10 = arith.constant 10 : index
    %c0_72 = arith.constant 0 : index
    %c0_73 = arith.constant 0 : index
    %73 = vector.load %arg1[%c10, %c0_72, %c0_73] : memref<32x2x256xf32, #tpu.memory_space<vmem>>, vector<1x2x256xf32>
    %74 = vector.shape_cast %73 : vector<1x2x256xf32> to vector<2x256xf32>
    %c10_74 = arith.constant 10 : index
    %c0_75 = arith.constant 0 : index
    %c0_76 = arith.constant 0 : index
    %75 = vector.load %arg3[%c10_74, %c0_75, %c0_76] : memref<32x256x128xf32, #tpu.memory_space<vmem>>, vector<1x256x128xf32>
    %76 = vector.shape_cast %75 : vector<1x256x128xf32> to vector<256x128xf32>
    %cst_77 = arith.constant dense<0.000000e+00> : vector<2x128xf32>
    %77 = tpu.matmul %74, %76, %cst_77 {dimension_numbers = #tpu.dot_dimension_numbers<[1], [0], [0], [1], [0, 0, 1, 1], [], []>} : vector<2x256xf32>, vector<256x128xf32>, vector<2x128xf32> -> vector<2x128xf32>
    %78 = arith.addf %72, %77 : vector<2x128xf32>
    %c11 = arith.constant 11 : index
    %c0_78 = arith.constant 0 : index
    %c0_79 = arith.constant 0 : index
    %79 = vector.load %arg1[%c11, %c0_78, %c0_79] : memref<32x2x256xf32, #tpu.memory_space<vmem>>, vector<1x2x256xf32>
    %80 = vector.shape_cast %79 : vector<1x2x256xf32> to vector<2x256xf32>
    %c11_80 = arith.constant 11 : index
    %c0_81 = arith.constant 0 : index
    %c0_82 = arith.constant 0 : index
    %81 = vector.load %arg3[%c11_80, %c0_81, %c0_82] : memref<32x256x128xf32, #tpu.memory_space<vmem>>, vector<1x256x128xf32>
    %82 = vector.shape_cast %81 : vector<1x256x128xf32> to vector<256x128xf32>
    %cst_83 = arith.constant dense<0.000000e+00> : vector<2x128xf32>
    %83 = tpu.matmul %80, %82, %cst_83 {dimension_numbers = #tpu.dot_dimension_numbers<[1], [0], [0], [1], [0, 0, 1, 1], [], []>} : vector<2x256xf32>, vector<256x128xf32>, vector<2x128xf32> -> vector<2x128xf32>
    %84 = arith.addf %78, %83 : vector<2x128xf32>
    %c12 = arith.constant 12 : index
    %c0_84 = arith.constant 0 : index
    %c0_85 = arith.constant 0 : index
    %85 = vector.load %arg1[%c12, %c0_84, %c0_85] : memref<32x2x256xf32, #tpu.memory_space<vmem>>, vector<1x2x256xf32>
    %86 = vector.shape_cast %85 : vector<1x2x256xf32> to vector<2x256xf32>
    %c12_86 = arith.constant 12 : index
    %c0_87 = arith.constant 0 : index
    %c0_88 = arith.constant 0 : index
    %87 = vector.load %arg3[%c12_86, %c0_87, %c0_88] : memref<32x256x128xf32, #tpu.memory_space<vmem>>, vector<1x256x128xf32>
    %88 = vector.shape_cast %87 : vector<1x256x128xf32> to vector<256x128xf32>
    %cst_89 = arith.constant dense<0.000000e+00> : vector<2x128xf32>
    %89 = tpu.matmul %86, %88, %cst_89 {dimension_numbers = #tpu.dot_dimension_numbers<[1], [0], [0], [1], [0, 0, 1, 1], [], []>} : vector<2x256xf32>, vector<256x128xf32>, vector<2x128xf32> -> vector<2x128xf32>
    %90 = arith.addf %84, %89 : vector<2x128xf32>
    %c13 = arith.constant 13 : index
    %c0_90 = arith.constant 0 : index
    %c0_91 = arith.constant 0 : index
    %91 = vector.load %arg1[%c13, %c0_90, %c0_91] : memref<32x2x256xf32, #tpu.memory_space<vmem>>, vector<1x2x256xf32>
    %92 = vector.shape_cast %91 : vector<1x2x256xf32> to vector<2x256xf32>
    %c13_92 = arith.constant 13 : index
    %c0_93 = arith.constant 0 : index
    %c0_94 = arith.constant 0 : index
    %93 = vector.load %arg3[%c13_92, %c0_93, %c0_94] : memref<32x256x128xf32, #tpu.memory_space<vmem>>, vector<1x256x128xf32>
    %94 = vector.shape_cast %93 : vector<1x256x128xf32> to vector<256x128xf32>
    %cst_95 = arith.constant dense<0.000000e+00> : vector<2x128xf32>
    %95 = tpu.matmul %92, %94, %cst_95 {dimension_numbers = #tpu.dot_dimension_numbers<[1], [0], [0], [1], [0, 0, 1, 1], [], []>} : vector<2x256xf32>, vector<256x128xf32>, vector<2x128xf32> -> vector<2x128xf32>
    %96 = arith.addf %90, %95 : vector<2x128xf32>
    %c14 = arith.constant 14 : index
    %c0_96 = arith.constant 0 : index
    %c0_97 = arith.constant 0 : index
    %97 = vector.load %arg1[%c14, %c0_96, %c0_97] : memref<32x2x256xf32, #tpu.memory_space<vmem>>, vector<1x2x256xf32>
    %98 = vector.shape_cast %97 : vector<1x2x256xf32> to vector<2x256xf32>
    %c14_98 = arith.constant 14 : index
    %c0_99 = arith.constant 0 : index
    %c0_100 = arith.constant 0 : index
    %99 = vector.load %arg3[%c14_98, %c0_99, %c0_100] : memref<32x256x128xf32, #tpu.memory_space<vmem>>, vector<1x256x128xf32>
    %100 = vector.shape_cast %99 : vector<1x256x128xf32> to vector<256x128xf32>
    %cst_101 = arith.constant dense<0.000000e+00> : vector<2x128xf32>
    %101 = tpu.matmul %98, %100, %cst_101 {dimension_numbers = #tpu.dot_dimension_numbers<[1], [0], [0], [1], [0, 0, 1, 1], [], []>} : vector<2x256xf32>, vector<256x128xf32>, vector<2x128xf32> -> vector<2x128xf32>
    %102 = arith.addf %96, %101 : vector<2x128xf32>
    %c15 = arith.constant 15 : index
    %c0_102 = arith.constant 0 : index
    %c0_103 = arith.constant 0 : index
    %103 = vector.load %arg1[%c15, %c0_102, %c0_103] : memref<32x2x256xf32, #tpu.memory_space<vmem>>, vector<1x2x256xf32>
    %104 = vector.shape_cast %103 : vector<1x2x256xf32> to vector<2x256xf32>
    %c15_104 = arith.constant 15 : index
    %c0_105 = arith.constant 0 : index
    %c0_106 = arith.constant 0 : index
    %105 = vector.load %arg3[%c15_104, %c0_105, %c0_106] : memref<32x256x128xf32, #tpu.memory_space<vmem>>, vector<1x256x128xf32>
    %106 = vector.shape_cast %105 : vector<1x256x128xf32> to vector<256x128xf32>
    %cst_107 = arith.constant dense<0.000000e+00> : vector<2x128xf32>
    %107 = tpu.matmul %104, %106, %cst_107 {dimension_numbers = #tpu.dot_dimension_numbers<[1], [0], [0], [1], [0, 0, 1, 1], [], []>} : vector<2x256xf32>, vector<256x128xf32>, vector<2x128xf32> -> vector<2x128xf32>
    %108 = arith.addf %102, %107 : vector<2x128xf32>
    %c16 = arith.constant 16 : index
    %c0_108 = arith.constant 0 : index
    %c0_109 = arith.constant 0 : index
    %109 = vector.load %arg1[%c16, %c0_108, %c0_109] : memref<32x2x256xf32, #tpu.memory_space<vmem>>, vector<1x2x256xf32>
    %110 = vector.shape_cast %109 : vector<1x2x256xf32> to vector<2x256xf32>
    %c16_110 = arith.constant 16 : index
    %c0_111 = arith.constant 0 : index
    %c0_112 = arith.constant 0 : index
    %111 = vector.load %arg3[%c16_110, %c0_111, %c0_112] : memref<32x256x128xf32, #tpu.memory_space<vmem>>, vector<1x256x128xf32>
    %112 = vector.shape_cast %111 : vector<1x256x128xf32> to vector<256x128xf32>
    %cst_113 = arith.constant dense<0.000000e+00> : vector<2x128xf32>
    %113 = tpu.matmul %110, %112, %cst_113 {dimension_numbers = #tpu.dot_dimension_numbers<[1], [0], [0], [1], [0, 0, 1, 1], [], []>} : vector<2x256xf32>, vector<256x128xf32>, vector<2x128xf32> -> vector<2x128xf32>
    %114 = arith.addf %108, %113 : vector<2x128xf32>
    %c17 = arith.constant 17 : index
    %c0_114 = arith.constant 0 : index
    %c0_115 = arith.constant 0 : index
    %115 = vector.load %arg1[%c17, %c0_114, %c0_115] : memref<32x2x256xf32, #tpu.memory_space<vmem>>, vector<1x2x256xf32>
    %116 = vector.shape_cast %115 : vector<1x2x256xf32> to vector<2x256xf32>
    %c17_116 = arith.constant 17 : index
    %c0_117 = arith.constant 0 : index
    %c0_118 = arith.constant 0 : index
    %117 = vector.load %arg3[%c17_116, %c0_117, %c0_118] : memref<32x256x128xf32, #tpu.memory_space<vmem>>, vector<1x256x128xf32>
    %118 = vector.shape_cast %117 : vector<1x256x128xf32> to vector<256x128xf32>
    %cst_119 = arith.constant dense<0.000000e+00> : vector<2x128xf32>
    %119 = tpu.matmul %116, %118, %cst_119 {dimension_numbers = #tpu.dot_dimension_numbers<[1], [0], [0], [1], [0, 0, 1, 1], [], []>} : vector<2x256xf32>, vector<256x128xf32>, vector<2x128xf32> -> vector<2x128xf32>
    %120 = arith.addf %114, %119 : vector<2x128xf32>
    %c18 = arith.constant 18 : index
    %c0_120 = arith.constant 0 : index
    %c0_121 = arith.constant 0 : index
    %121 = vector.load %arg1[%c18, %c0_120, %c0_121] : memref<32x2x256xf32, #tpu.memory_space<vmem>>, vector<1x2x256xf32>
    %122 = vector.shape_cast %121 : vector<1x2x256xf32> to vector<2x256xf32>
    %c18_122 = arith.constant 18 : index
    %c0_123 = arith.constant 0 : index
    %c0_124 = arith.constant 0 : index
    %123 = vector.load %arg3[%c18_122, %c0_123, %c0_124] : memref<32x256x128xf32, #tpu.memory_space<vmem>>, vector<1x256x128xf32>
    %124 = vector.shape_cast %123 : vector<1x256x128xf32> to vector<256x128xf32>
    %cst_125 = arith.constant dense<0.000000e+00> : vector<2x128xf32>
    %125 = tpu.matmul %122, %124, %cst_125 {dimension_numbers = #tpu.dot_dimension_numbers<[1], [0], [0], [1], [0, 0, 1, 1], [], []>} : vector<2x256xf32>, vector<256x128xf32>, vector<2x128xf32> -> vector<2x128xf32>
    %126 = arith.addf %120, %125 : vector<2x128xf32>
    %c19 = arith.constant 19 : index
    %c0_126 = arith.constant 0 : index
    %c0_127 = arith.constant 0 : index
    %127 = vector.load %arg1[%c19, %c0_126, %c0_127] : memref<32x2x256xf32, #tpu.memory_space<vmem>>, vector<1x2x256xf32>
    %128 = vector.shape_cast %127 : vector<1x2x256xf32> to vector<2x256xf32>
    %c19_128 = arith.constant 19 : index
    %c0_129 = arith.constant 0 : index
    %c0_130 = arith.constant 0 : index
    %129 = vector.load %arg3[%c19_128, %c0_129, %c0_130] : memref<32x256x128xf32, #tpu.memory_space<vmem>>, vector<1x256x128xf32>
    %130 = vector.shape_cast %129 : vector<1x256x128xf32> to vector<256x128xf32>
    %cst_131 = arith.constant dense<0.000000e+00> : vector<2x128xf32>
    %131 = tpu.matmul %128, %130, %cst_131 {dimension_numbers = #tpu.dot_dimension_numbers<[1], [0], [0], [1], [0, 0, 1, 1], [], []>} : vector<2x256xf32>, vector<256x128xf32>, vector<2x128xf32> -> vector<2x128xf32>
    %132 = arith.addf %126, %131 : vector<2x128xf32>
    %c20 = arith.constant 20 : index
    %c0_132 = arith.constant 0 : index
    %c0_133 = arith.constant 0 : index
    %133 = vector.load %arg1[%c20, %c0_132, %c0_133] : memref<32x2x256xf32, #tpu.memory_space<vmem>>, vector<1x2x256xf32>
    %134 = vector.shape_cast %133 : vector<1x2x256xf32> to vector<2x256xf32>
    %c20_134 = arith.constant 20 : index
    %c0_135 = arith.constant 0 : index
    %c0_136 = arith.constant 0 : index
    %135 = vector.load %arg3[%c20_134, %c0_135, %c0_136] : memref<32x256x128xf32, #tpu.memory_space<vmem>>, vector<1x256x128xf32>
    %136 = vector.shape_cast %135 : vector<1x256x128xf32> to vector<256x128xf32>
    %cst_137 = arith.constant dense<0.000000e+00> : vector<2x128xf32>
    %137 = tpu.matmul %134, %136, %cst_137 {dimension_numbers = #tpu.dot_dimension_numbers<[1], [0], [0], [1], [0, 0, 1, 1], [], []>} : vector<2x256xf32>, vector<256x128xf32>, vector<2x128xf32> -> vector<2x128xf32>
    %138 = arith.addf %132, %137 : vector<2x128xf32>
    %c21 = arith.constant 21 : index
    %c0_138 = arith.constant 0 : index
    %c0_139 = arith.constant 0 : index
    %139 = vector.load %arg1[%c21, %c0_138, %c0_139] : memref<32x2x256xf32, #tpu.memory_space<vmem>>, vector<1x2x256xf32>
    %140 = vector.shape_cast %139 : vector<1x2x256xf32> to vector<2x256xf32>
    %c21_140 = arith.constant 21 : index
    %c0_141 = arith.constant 0 : index
    %c0_142 = arith.constant 0 : index
    %141 = vector.load %arg3[%c21_140, %c0_141, %c0_142] : memref<32x256x128xf32, #tpu.memory_space<vmem>>, vector<1x256x128xf32>
    %142 = vector.shape_cast %141 : vector<1x256x128xf32> to vector<256x128xf32>
    %cst_143 = arith.constant dense<0.000000e+00> : vector<2x128xf32>
    %143 = tpu.matmul %140, %142, %cst_143 {dimension_numbers = #tpu.dot_dimension_numbers<[1], [0], [0], [1], [0, 0, 1, 1], [], []>} : vector<2x256xf32>, vector<256x128xf32>, vector<2x128xf32> -> vector<2x128xf32>
    %144 = arith.addf %138, %143 : vector<2x128xf32>
    %c22 = arith.constant 22 : index
    %c0_144 = arith.constant 0 : index
    %c0_145 = arith.constant 0 : index
    %145 = vector.load %arg1[%c22, %c0_144, %c0_145] : memref<32x2x256xf32, #tpu.memory_space<vmem>>, vector<1x2x256xf32>
    %146 = vector.shape_cast %145 : vector<1x2x256xf32> to vector<2x256xf32>
    %c22_146 = arith.constant 22 : index
    %c0_147 = arith.constant 0 : index
    %c0_148 = arith.constant 0 : index
    %147 = vector.load %arg3[%c22_146, %c0_147, %c0_148] : memref<32x256x128xf32, #tpu.memory_space<vmem>>, vector<1x256x128xf32>
    %148 = vector.shape_cast %147 : vector<1x256x128xf32> to vector<256x128xf32>
    %cst_149 = arith.constant dense<0.000000e+00> : vector<2x128xf32>
    %149 = tpu.matmul %146, %148, %cst_149 {dimension_numbers = #tpu.dot_dimension_numbers<[1], [0], [0], [1], [0, 0, 1, 1], [], []>} : vector<2x256xf32>, vector<256x128xf32>, vector<2x128xf32> -> vector<2x128xf32>
    %150 = arith.addf %144, %149 : vector<2x128xf32>
    %c23 = arith.constant 23 : index
    %c0_150 = arith.constant 0 : index
    %c0_151 = arith.constant 0 : index
    %151 = vector.load %arg1[%c23, %c0_150, %c0_151] : memref<32x2x256xf32, #tpu.memory_space<vmem>>, vector<1x2x256xf32>
    %152 = vector.shape_cast %151 : vector<1x2x256xf32> to vector<2x256xf32>
    %c23_152 = arith.constant 23 : index
    %c0_153 = arith.constant 0 : index
    %c0_154 = arith.constant 0 : index
    %153 = vector.load %arg3[%c23_152, %c0_153, %c0_154] : memref<32x256x128xf32, #tpu.memory_space<vmem>>, vector<1x256x128xf32>
    %154 = vector.shape_cast %153 : vector<1x256x128xf32> to vector<256x128xf32>
    %cst_155 = arith.constant dense<0.000000e+00> : vector<2x128xf32>
    %155 = tpu.matmul %152, %154, %cst_155 {dimension_numbers = #tpu.dot_dimension_numbers<[1], [0], [0], [1], [0, 0, 1, 1], [], []>} : vector<2x256xf32>, vector<256x128xf32>, vector<2x128xf32> -> vector<2x128xf32>
    %156 = arith.addf %150, %155 : vector<2x128xf32>
    %c24 = arith.constant 24 : index
    %c0_156 = arith.constant 0 : index
    %c0_157 = arith.constant 0 : index
    %157 = vector.load %arg1[%c24, %c0_156, %c0_157] : memref<32x2x256xf32, #tpu.memory_space<vmem>>, vector<1x2x256xf32>
    %158 = vector.shape_cast %157 : vector<1x2x256xf32> to vector<2x256xf32>
    %c24_158 = arith.constant 24 : index
    %c0_159 = arith.constant 0 : index
    %c0_160 = arith.constant 0 : index
    %159 = vector.load %arg3[%c24_158, %c0_159, %c0_160] : memref<32x256x128xf32, #tpu.memory_space<vmem>>, vector<1x256x128xf32>
    %160 = vector.shape_cast %159 : vector<1x256x128xf32> to vector<256x128xf32>
    %cst_161 = arith.constant dense<0.000000e+00> : vector<2x128xf32>
    %161 = tpu.matmul %158, %160, %cst_161 {dimension_numbers = #tpu.dot_dimension_numbers<[1], [0], [0], [1], [0, 0, 1, 1], [], []>} : vector<2x256xf32>, vector<256x128xf32>, vector<2x128xf32> -> vector<2x128xf32>
    %162 = arith.addf %156, %161 : vector<2x128xf32>
    %c25 = arith.constant 25 : index
    %c0_162 = arith.constant 0 : index
    %c0_163 = arith.constant 0 : index
    %163 = vector.load %arg1[%c25, %c0_162, %c0_163] : memref<32x2x256xf32, #tpu.memory_space<vmem>>, vector<1x2x256xf32>
    %164 = vector.shape_cast %163 : vector<1x2x256xf32> to vector<2x256xf32>
    %c25_164 = arith.constant 25 : index
    %c0_165 = arith.constant 0 : index
    %c0_166 = arith.constant 0 : index
    %165 = vector.load %arg3[%c25_164, %c0_165, %c0_166] : memref<32x256x128xf32, #tpu.memory_space<vmem>>, vector<1x256x128xf32>
    %166 = vector.shape_cast %165 : vector<1x256x128xf32> to vector<256x128xf32>
    %cst_167 = arith.constant dense<0.000000e+00> : vector<2x128xf32>
    %167 = tpu.matmul %164, %166, %cst_167 {dimension_numbers = #tpu.dot_dimension_numbers<[1], [0], [0], [1], [0, 0, 1, 1], [], []>} : vector<2x256xf32>, vector<256x128xf32>, vector<2x128xf32> -> vector<2x128xf32>
    %168 = arith.addf %162, %167 : vector<2x128xf32>
    %c26 = arith.constant 26 : index
    %c0_168 = arith.constant 0 : index
    %c0_169 = arith.constant 0 : index
    %169 = vector.load %arg1[%c26, %c0_168, %c0_169] : memref<32x2x256xf32, #tpu.memory_space<vmem>>, vector<1x2x256xf32>
    %170 = vector.shape_cast %169 : vector<1x2x256xf32> to vector<2x256xf32>
    %c26_170 = arith.constant 26 : index
    %c0_171 = arith.constant 0 : index
    %c0_172 = arith.constant 0 : index
    %171 = vector.load %arg3[%c26_170, %c0_171, %c0_172] : memref<32x256x128xf32, #tpu.memory_space<vmem>>, vector<1x256x128xf32>
    %172 = vector.shape_cast %171 : vector<1x256x128xf32> to vector<256x128xf32>
    %cst_173 = arith.constant dense<0.000000e+00> : vector<2x128xf32>
    %173 = tpu.matmul %170, %172, %cst_173 {dimension_numbers = #tpu.dot_dimension_numbers<[1], [0], [0], [1], [0, 0, 1, 1], [], []>} : vector<2x256xf32>, vector<256x128xf32>, vector<2x128xf32> -> vector<2x128xf32>
    %174 = arith.addf %168, %173 : vector<2x128xf32>
    %c27 = arith.constant 27 : index
    %c0_174 = arith.constant 0 : index
    %c0_175 = arith.constant 0 : index
    %175 = vector.load %arg1[%c27, %c0_174, %c0_175] : memref<32x2x256xf32, #tpu.memory_space<vmem>>, vector<1x2x256xf32>
    %176 = vector.shape_cast %175 : vector<1x2x256xf32> to vector<2x256xf32>
    %c27_176 = arith.constant 27 : index
    %c0_177 = arith.constant 0 : index
    %c0_178 = arith.constant 0 : index
    %177 = vector.load %arg3[%c27_176, %c0_177, %c0_178] : memref<32x256x128xf32, #tpu.memory_space<vmem>>, vector<1x256x128xf32>
    %178 = vector.shape_cast %177 : vector<1x256x128xf32> to vector<256x128xf32>
    %cst_179 = arith.constant dense<0.000000e+00> : vector<2x128xf32>
    %179 = tpu.matmul %176, %178, %cst_179 {dimension_numbers = #tpu.dot_dimension_numbers<[1], [0], [0], [1], [0, 0, 1, 1], [], []>} : vector<2x256xf32>, vector<256x128xf32>, vector<2x128xf32> -> vector<2x128xf32>
    %180 = arith.addf %174, %179 : vector<2x128xf32>
    %c28 = arith.constant 28 : index
    %c0_180 = arith.constant 0 : index
    %c0_181 = arith.constant 0 : index
    %181 = vector.load %arg1[%c28, %c0_180, %c0_181] : memref<32x2x256xf32, #tpu.memory_space<vmem>>, vector<1x2x256xf32>
    %182 = vector.shape_cast %181 : vector<1x2x256xf32> to vector<2x256xf32>
    %c28_182 = arith.constant 28 : index
    %c0_183 = arith.constant 0 : index
    %c0_184 = arith.constant 0 : index
    %183 = vector.load %arg3[%c28_182, %c0_183, %c0_184] : memref<32x256x128xf32, #tpu.memory_space<vmem>>, vector<1x256x128xf32>
    %184 = vector.shape_cast %183 : vector<1x256x128xf32> to vector<256x128xf32>
    %cst_185 = arith.constant dense<0.000000e+00> : vector<2x128xf32>
    %185 = tpu.matmul %182, %184, %cst_185 {dimension_numbers = #tpu.dot_dimension_numbers<[1], [0], [0], [1], [0, 0, 1, 1], [], []>} : vector<2x256xf32>, vector<256x128xf32>, vector<2x128xf32> -> vector<2x128xf32>
    %186 = arith.addf %180, %185 : vector<2x128xf32>
    %c29 = arith.constant 29 : index
    %c0_186 = arith.constant 0 : index
    %c0_187 = arith.constant 0 : index
    %187 = vector.load %arg1[%c29, %c0_186, %c0_187] : memref<32x2x256xf32, #tpu.memory_space<vmem>>, vector<1x2x256xf32>
    %188 = vector.shape_cast %187 : vector<1x2x256xf32> to vector<2x256xf32>
    %c29_188 = arith.constant 29 : index
    %c0_189 = arith.constant 0 : index
    %c0_190 = arith.constant 0 : index
    %189 = vector.load %arg3[%c29_188, %c0_189, %c0_190] : memref<32x256x128xf32, #tpu.memory_space<vmem>>, vector<1x256x128xf32>
    %190 = vector.shape_cast %189 : vector<1x256x128xf32> to vector<256x128xf32>
    %cst_191 = arith.constant dense<0.000000e+00> : vector<2x128xf32>
    %191 = tpu.matmul %188, %190, %cst_191 {dimension_numbers = #tpu.dot_dimension_numbers<[1], [0], [0], [1], [0, 0, 1, 1], [], []>} : vector<2x256xf32>, vector<256x128xf32>, vector<2x128xf32> -> vector<2x128xf32>
    %192 = arith.addf %186, %191 : vector<2x128xf32>
    %c30 = arith.constant 30 : index
    %c0_192 = arith.constant 0 : index
    %c0_193 = arith.constant 0 : index
    %193 = vector.load %arg1[%c30, %c0_192, %c0_193] : memref<32x2x256xf32, #tpu.memory_space<vmem>>, vector<1x2x256xf32>
    %194 = vector.shape_cast %193 : vector<1x2x256xf32> to vector<2x256xf32>
    %c30_194 = arith.constant 30 : index
    %c0_195 = arith.constant 0 : index
    %c0_196 = arith.constant 0 : index
    %195 = vector.load %arg3[%c30_194, %c0_195, %c0_196] : memref<32x256x128xf32, #tpu.memory_space<vmem>>, vector<1x256x128xf32>
    %196 = vector.shape_cast %195 : vector<1x256x128xf32> to vector<256x128xf32>
    %cst_197 = arith.constant dense<0.000000e+00> : vector<2x128xf32>
    %197 = tpu.matmul %194, %196, %cst_197 {dimension_numbers = #tpu.dot_dimension_numbers<[1], [0], [0], [1], [0, 0, 1, 1], [], []>} : vector<2x256xf32>, vector<256x128xf32>, vector<2x128xf32> -> vector<2x128xf32>
    %198 = arith.addf %192, %197 : vector<2x128xf32>
    %c31 = arith.constant 31 : index
    %c0_198 = arith.constant 0 : index
    %c0_199 = arith.constant 0 : index
    %199 = vector.load %arg1[%c31, %c0_198, %c0_199] : memref<32x2x256xf32, #tpu.memory_space<vmem>>, vector<1x2x256xf32>
    %200 = vector.shape_cast %199 : vector<1x2x256xf32> to vector<2x256xf32>
    %c31_200 = arith.constant 31 : index
    %c0_201 = arith.constant 0 : index
    %c0_202 = arith.constant 0 : index
    %201 = vector.load %arg3[%c31_200, %c0_201, %c0_202] : memref<32x256x128xf32, #tpu.memory_space<vmem>>, vector<1x256x128xf32>
    %202 = vector.shape_cast %201 : vector<1x256x128xf32> to vector<256x128xf32>
    %cst_203 = arith.constant dense<0.000000e+00> : vector<2x128xf32>
    %203 = tpu.matmul %200, %202, %cst_203 {dimension_numbers = #tpu.dot_dimension_numbers<[1], [0], [0], [1], [0, 0, 1, 1], [], []>} : vector<2x256xf32>, vector<256x128xf32>, vector<2x128xf32> -> vector<2x128xf32>
    %204 = arith.addf %198, %203 : vector<2x128xf32>
    %cst_204 = arith.constant 0.000000e+00 : f32
    %205 = vector.broadcast %cst_204 : f32 to vector<2x128xf32>
    %206 = arith.maximumf %204, %205 : vector<2x128xf32>
    %c0_205 = arith.constant 0 : index
    %c0_206 = arith.constant 0 : index
    %207 = vector.load %arg8[%c0_205, %c0_206] : memref<1x128xf32, #tpu.memory_space<vmem>>, vector<1x128xf32>
    %208 = vector.broadcast %207 : vector<1x128xf32> to vector<2x128xf32>
    %209 = arith.mulf %206, %208 : vector<2x128xf32>
    %cst_207 = arith.constant dense<0.000000e+00> : vector<2xf32>
    %210 = vector.multi_reduction <add>, %209, %cst_207 [1] : vector<2x128xf32> to vector<2xf32>
    %211 = vector.shape_cast %210 : vector<2xf32> to vector<2x1xf32>
    %c0_208 = arith.constant 0 : index
    %c0_209 = arith.constant 0 : index
    %212 = vector.load %arg9[%c0_208, %c0_209] : memref<1x1xf32, #tpu.memory_space<vmem>>, vector<1x1xf32>
    %213 = vector.broadcast %212 : vector<1x1xf32> to vector<2x1xf32>
    %214 = arith.addf %211, %213 : vector<2x1xf32>
    %c0_210 = arith.constant 0 : index
    %c0_211 = arith.constant 0 : index
    %215 = vector.load %arg10[%c0_210, %c0_211] : memref<2x1xf32, #tpu.memory_space<vmem>>, vector<2x1xf32>
    tpu.vector_store %arg10[%c0_210, %c0_211], %214 {strides = array<i32>} : memref<2x1xf32, #tpu.memory_space<vmem>>, vector<2x1xf32>,
    return
  }
  func.func @transform_0(%arg0: i32) -> (i32, i32, i32) {
    %c0_i32 = arith.constant 0 : i32
    %c0_i32_0 = arith.constant 0 : i32
    %c0_i32_1 = arith.constant 0 : i32
    %c0_i32_2 = arith.constant 0 : i32
    return %c0_i32, %c0_i32_0, %c0_i32_1 : i32, i32, i32
  }
  func.func @transform_1(%arg0: i32) -> (i32, i32) {
    %c0_i32 = arith.constant 0 : i32
    %c0_i32_0 = arith.constant 0 : i32
    %c0_i32_1 = arith.constant 0 : i32
    return %c0_i32, %c0_i32_0 : i32, i32
  }
  func.func @transform_2(%arg0: i32) -> (i32, i32, i32) {
    %c0_i32 = arith.constant 0 : i32
    %c0_i32_0 = arith.constant 0 : i32
    %c0_i32_1 = arith.constant 0 : i32
    %c0_i32_2 = arith.constant 0 : i32
    return %c0_i32, %c0_i32_0, %c0_i32_1 : i32, i32, i32
  }
  func.func @transform_3(%arg0: i32) -> (i32, i32) {
    %c0_i32 = arith.constant 0 : i32
    %c0_i32_0 = arith.constant 0 : i32
    %c0_i32_1 = arith.constant 0 : i32
    return %c0_i32, %c0_i32_0 : i32, i32
  }
  func.func @transform_4(%arg0: i32) -> (i32, i32) {
    %c0_i32 = arith.constant 0 : i32
    %c0_i32_0 = arith.constant 0 : i32
    %c0_i32_1 = arith.constant 0 : i32
    return %c0_i32, %c0_i32_0 : i32, i32
  }
  func.func @transform_5(%arg0: i32) -> (i32, i32) {
    %c0_i32 = arith.constant 0 : i32
    %c0_i32_0 = arith.constant 0 : i32
    %c0_i32_1 = arith.constant 0 : i32
    return %c0_i32, %c0_i32_0 : i32, i32
  }
  func.func @transform_6(%arg0: i32) -> (i32, i32) {
    %c0_i32 = arith.constant 0 : i32
    %c0_i32_0 = arith.constant 0 : i32
    %c0_i32_1 = arith.constant 0 : i32
    return %c0_i32, %c0_i32_0 : i32, i32
  }
  func.func @transform_7(%arg0: i32) -> (i32, i32) {
    %c0_i32 = arith.constant 0 : i32
    %c0_i32_0 = arith.constant 0 : i32
    %c0_i32_1 = arith.constant 0 : i32
    return %c0_i32, %c0_i32_0 : i32, i32
  }
  func.func @transform_8(%arg0: i32) -> (i32, i32) {
    %c0_i32 = arith.constant 0 : i32
    %c0_i32_0 = arith.constant 0 : i32
    %c0_i32_1 = arith.constant 0 : i32
    return %c0_i32, %c0_i32_0 : i32, i32
  }
  func.func @transform_9(%arg0: i32) -> (i32, i32) {
    %c0_i32 = arith.constant 0 : i32
    %c0_i32_0 = arith.constant 0 : i32
    %c0_i32_1 = arith.constant 0 : i32
    return %c0_i32, %c0_i32_0 : i32, i32
  }
}

</mosaic_0001>

<bundles_post_ra>
// kernel: reward_network_forward.3
= control target key start
LH: loop header
LB: loop body
LE: loop exit
PB: predicated region body
PF: predicated region fallthrough
CT: control target
= control target key end

     0   :  { %s886_s12 = smov 0   ;;  %s888_s13 = smov 0   ;;  %s1122_s0 = inlined_call_operand.vmem [shape: f32[16,27], index: 0, kind: input, shape index: {}]   ;;  %s1123_s1 = inlined_call_operand.vmem [shape: f32[27,2048], index: 1, kind: input, shape index: {}]   ;;  %s1124_s2 = inlined_call_operand.vmem [shape: f32[16,1], index: 2, kind: input, shape index: {}]   ;;  %s1125_s3 = inlined_call_operand.vmem [shape: f32[16,2048], index: 3, kind: output, shape index: {}]  }
   0x1   :  { %s890_s14 = smov 0  }
   0x2 LB: > { %s780_s15 = sadd.s32 4294967295, %s862_s14   ;;  %s903_s16 = sadd.s32 1, %s862_s14   ;;  %s862_s14 = sphi %s890_s14, %s1129_s14   ;;  %s858_s13 = sphi %s888_s13, %s1128_s13   ;;  %s854_s12 = sphi %s886_s12, %s1127_s12  }
   0x3   : > { %s38_s17 = ssub.s32 %s862_s14, %s903_s16  ;;  %s41_s18 = sadd.s32 1, %s858_s13 }
   0x4   : > { %p39_p0 = scmp.eq.s32.totalorder %s38_s17, 0  ;;  %p48_p1 = scmp.ne.s32.totalorder %s858_s13, %s854_s12 }
   0x5   : > { %p49_p2 = scmp.eq.s32.totalorder %s862_s14, 0  ;;  %p99_p3 = scmp.eq.s32.totalorder %s780_s15, 1 }
   0x6   : > { %s914_s19 = scalar_select %p39_p0, %s858_s13, %s41_s18  }
   0x7   : > { %p50_p4 = por %p49_p2, %p48_p1  ;;  %p916_p5 = por %p99_p3, %p48_p1 }
   0x8   : > { %p783_p6 = scmp.ge.s32.totalorder %s862_s14, 2 }
   0xa   : > { %127 = sbr.rel (%p783_p6) target bundleno = 35 (0x23), region = 24 }
   0xf   : > { %130 = sbr.rel (!%p50_p4) target bundleno = 35 (0x23), region = 28  ;;  %s132_s21 = sand.u32 (%p50_p4), 1, %s858_s13  }
  0x10   : > { %s811_s22 = sshll.u32 (%p50_p4), %s862_s14, 6  ;;  %s784_s23 = sshll.u32 (%p50_p4), %s132_s21, 8 }
  0x11   : > { %s926_s26 = scalar_lea.vmem (%p50_p4), %s1123_s1, %s811_s22  ;;  %s931_s27 = scalar_lea.vmem (%p50_p4), [#allocation2], %s784_s23 }
  0x12   : > { %v150_v0 = vld [vmem:[%s926_s26] sm:$0xff] (%p50_p4)  ;;  %v152_v1 = vld [vmem:[%s926_s26 + $0x8] sm:$0xff] (%p50_p4)  ;;  %v154_v2 = vld [vmem:[%s926_s26 + $0x10] sm:$0xff] (%p50_p4) }
  0x13   : > { %151 = vst [vmem:[%s931_s27] sm:$0xff] (%p50_p4), %v150_v0  ;;  %153 = vst [vmem:[%s931_s27 + $0x8] sm:$0xff] (%p50_p4), %v152_v1  ;;  %v156_v3 = vld [vmem:[%s926_s26 + $0x18] sm:$0xff] (%p50_p4)  ;;  %v158_v4 = vld [vmem:[%s926_s26 + $0x20] sm:$0xff] (%p50_p4) }
  0x14   : > { %155 = vst [vmem:[%s931_s27 + $0x10] sm:$0xff] %v154_v2  ;;  %v160_v5 = vld [vmem:[%s926_s26 + $0x28] sm:$0xff]  ;;  %157 = vst [vmem:[%s931_s27 + $0x18] sm:$0xff] %v156_v3  ;;  %v162_v6 = vld [vmem:[%s926_s26 + $0x30] sm:$0xff] }
  0x15   : > { %159 = vst [vmem:[%s931_s27 + $0x20] sm:$0xff] %v158_v4  ;;  %161 = vst [vmem:[%s931_s27 + $0x28] sm:$0xff] %v160_v5  ;;  %v164_v7 = vld [vmem:[%s926_s26 + $0x38] sm:$0xff]  ;;  %v166_v8 = vld [vmem:[%s926_s26 + $0x80] sm:$0xff] }
  0x16   : > { %163 = vst [vmem:[%s931_s27 + $0x30] sm:$0xff] %v162_v6  ;;  %165 = vst [vmem:[%s931_s27 + $0x38] sm:$0xff] %v164_v7  ;;  %v168_v9 = vld [vmem:[%s926_s26 + $0x88] sm:$0xff]  ;;  %v170_v10 = vld [vmem:[%s926_s26 + $0x90] sm:$0xff] }
  0x17   : > { %167 = vst [vmem:[%s931_s27 + $0x40] sm:$0xff] %v166_v8  ;;  %v172_v11 = vld [vmem:[%s926_s26 + $0x98] sm:$0xff]  ;;  %169 = vst [vmem:[%s931_s27 + $0x48] sm:$0xff] %v168_v9  ;;  %v174_v12 = vld [vmem:[%s926_s26 + $0xa0] sm:$0xff] }
  0x18   : > { %171 = vst [vmem:[%s931_s27 + $0x50] sm:$0xff] %v170_v10  ;;  %173 = vst [vmem:[%s931_s27 + $0x58] sm:$0xff] %v172_v11  ;;  %v176_v13 = vld [vmem:[%s926_s26 + $0xa8] sm:$0xff]  ;;  %v178_v14 = vld [vmem:[%s926_s26 + $0xb0] sm:$0xff] }
  0x19   : > { %175 = vst [vmem:[%s931_s27 + $0x60] sm:$0xff] %v174_v12  ;;  %177 = vst [vmem:[%s931_s27 + $0x68] sm:$0xff] %v176_v13  ;;  %v180_v15 = vld [vmem:[%s926_s26 + $0xb8] sm:$0xff]  ;;  %v182_v16 = vld [vmem:[%s926_s26 + $0x100] sm:$0xff] }
  0x1a   : > { %179 = vst [vmem:[%s931_s27 + $0x70] sm:$0xff] %v178_v14  ;;  %v184_v17 = vld [vmem:[%s926_s26 + $0x108] sm:$0xff]  ;;  %181 = vst [vmem:[%s931_s27 + $0x78] sm:$0xff] %v180_v15  ;;  %v186_v18 = vld [vmem:[%s926_s26 + $0x110] sm:$0xff] }
  0x1b   : > { %183 = vst [vmem:[%s931_s27 + $0x80] sm:$0xff] %v182_v16  ;;  %185 = vst [vmem:[%s931_s27 + $0x88] sm:$0xff] %v184_v17  ;;  %v188_v19 = vld [vmem:[%s926_s26 + $0x118] sm:$0xff]  ;;  %v190_v20 = vld [vmem:[%s926_s26 + $0x120] sm:$0xff] }
  0x1c   : > { %187 = vst [vmem:[%s931_s27 + $0x90] sm:$0xff] %v186_v18  ;;  %189 = vst [vmem:[%s931_s27 + $0x98] sm:$0xff] %v188_v19  ;;  %v192_v21 = vld [vmem:[%s926_s26 + $0x128] sm:$0xff]  ;;  %v194_v22 = vld [vmem:[%s926_s26 + $0x130] sm:$0xff] }
  0x1d   : > { %191 = vst [vmem:[%s931_s27 + $0xa0] sm:$0xff] %v190_v20  ;;  %v196_v23 = vld [vmem:[%s926_s26 + $0x138] sm:$0xff]  ;;  %193 = vst [vmem:[%s931_s27 + $0xa8] sm:$0xff] %v192_v21  ;;  %v198_v24 = vld [vmem:[%s926_s26 + $0x180] sm:$0xff] }
  0x1e   : > { %195 = vst [vmem:[%s931_s27 + $0xb0] sm:$0xff] %v194_v22  ;;  %197 = vst [vmem:[%s931_s27 + $0xb8] sm:$0xff] %v196_v23  ;;  %v200_v25 = vld [vmem:[%s926_s26 + $0x188] sm:$0xff]  ;;  %v202_v26 = vld [vmem:[%s926_s26 + $0x190] sm:$0xff] }
  0x1f   : > { %199 = vst [vmem:[%s931_s27 + $0xc0] sm:$0xff] %v198_v24  ;;  %201 = vst [vmem:[%s931_s27 + $0xc8] sm:$0xff] %v200_v25  ;;  %v204_v27 = vld [vmem:[%s926_s26 + $0x198] sm:$0xff]  ;;  %v206_v28 = vld [vmem:[%s926_s26 + $0x1a0] sm:$0xff] }
  0x20   : > { %203 = vst [vmem:[%s931_s27 + $0xd0] sm:$0xff] %v202_v26  ;;  %v208_v29 = vld [vmem:[%s926_s26 + $0x1a8] sm:$0xff]  ;;  %205 = vst [vmem:[%s931_s27 + $0xd8] sm:$0xff] %v204_v27  ;;  %v210_v30 = vld [vmem:[%s926_s26 + $0x1b0] sm:$0xff] }
  0x21   : > { %207 = vst [vmem:[%s931_s27 + $0xe0] sm:$0xff] %v206_v28  ;;  %209 = vst [vmem:[%s931_s27 + $0xe8] sm:$0xff] %v208_v29  ;;  %v212_v31 = vld [vmem:[%s926_s26 + $0x1b8] sm:$0xff] }
  0x22   : > { %211 = vst [vmem:[%s931_s27 + $0xf0] sm:$0xff] %v210_v30  ;;  %213 = vst [vmem:[%s931_s27 + $0xf8] sm:$0xff] %v212_v31 }
  0x23 PF: > { %p787_p7 = scmp.ge.s32.totalorder %s862_s14, 1  ;;  %p218_p8 = scmp.lt.s32.totalorder %s862_s14, 3 }
  0x25   : > { %p219_p9 = pnand %p787_p7, %p218_p8 }
  0x26   : > { %s225_s28 = sand.u32 (!%p219_p9), 1, %s854_s12  }
  0x27   : > { %222 = sbr.rel (%p219_p9) target bundleno = 279 (0x117), region = 51  ;;  %s788_s29 = sshll.u32 (!%p219_p9), %s225_s28, 8 }
  0x28   : > { %s1004_s5 = scalar_lea.vmem (!%p219_p9), [#allocation2], %s788_s29  ;;  %s789_s17 = sshll.u32 (!%p219_p9), %s225_s28, 7 }
  0x29   : > { %s1071_s18 = scalar_lea.vmem (!%p219_p9), [#allocation3], %s789_s17 }
  0x2c   : > { %vm302_vm0 = vcmask 1042432   ;;  %v864_v32 = vmov 0.0   ;;  %v283_v33 = vld [vmem:[%s1124_s2] sm:$0xff]  ;;  %v865_v34 = vmov 0   ;;  %v276_v35 = vld [vmem:[%s1004_s5 + $0xc8] sm:$0x7] }
  0x2d   : > { %391 = vmatprep.mubr.f32.mxu0 %v864_v32  ;;  %468 = vmatprep.mubr.f32.mxu1 %v864_v32  ;;  %v278_v36 = vld [vmem:[%s1004_s5 + $0xd8] sm:$0x7]  ;;  %v275_v37 = vld [vmem:[%s1004_s5 + $0xc0] sm:$0x7]  ;;  %v277_v38 = vld [vmem:[%s1004_s5 + $0xd0] sm:$0x7] }
  0x2e   : > { %839 = vset.pattern.permute.xlu0 %v865_v34  ;;  %790 = vmatprep.subr.msk.mxu0 %vm302_vm0, %v276_v35  ;;  %v268_v39 = vld [vmem:[%s1004_s5 + $0x88] sm:$0xff]  ;;  %v270_v40 = vld [vmem:[%s1004_s5 + $0x98] sm:$0xff]  ;;  %v267_v41 = vld [vmem:[%s1004_s5 + $0x80] sm:$0xff]  ;;  %vm295_vm1 = vcmask 220160   ;;  %s812_s12 = sshll.u32 (%p916_p5), %s780_s15, 6 }
  0x2f   : > { %287 = vperm.xlu0 %839, %v283_v33   ;;  %794 = vmatprep.subr.msk.mxu1 %vm302_vm0, %v278_v36  ;;  %v269_v42 = vld [vmem:[%s1004_s5 + $0x90] sm:$0xff]  ;;  %v260_v43 = vld [vmem:[%s1004_s5 + $0x48] sm:$0xff]  ;;  %v262_v44 = vld [vmem:[%s1004_s5 + $0x58] sm:$0xff]  ;;  %s676_s20 = scalar_lea.vmem (%p916_p5), %s1125_s3, %s812_s12 }
  0x30   : > { %791 = vmatpush1.msk.msra.mxu0 %vm302_vm0, %v275_v37  ;;  %795 = vmatpush1.msk.msra.mxu1 %vm302_vm0, %v277_v38  ;;  %v259_v45 = vld [vmem:[%s1004_s5 + $0x40] sm:$0xff]  ;;  %v261_v46 = vld [vmem:[%s1004_s5 + $0x50] sm:$0xff]  ;;  %v252_v47 = vld [vmem:[%s1004_s5 + $0x8] sm:$0xff] }
  0x31   : > { %353 = vmatprep.subr.mxu0 %v268_v39  ;;  %430 = vmatprep.subr.mxu1 %v270_v40  ;;  %v254_v48 = vld [vmem:[%s1004_s5 + $0x18] sm:$0xff]  ;;  %v251_v49 = vld [vmem:[%s1004_s5] sm:$0xff]  ;;  %v253_v50 = vld [vmem:[%s1004_s5 + $0x10] sm:$0xff] }
  0x32   : > { %354 = vmatpush1.msra.mxu0 %v267_v41  ;;  %431 = vmatpush1.msra.mxu1 %v269_v42  ;;  %v249_v51 = vld [vmem:[%s1122_s0] sm:$0xff]  ;;  %v280_v52 = vld [vmem:[%s1004_s5 + $0xe8] sm:$0x7]  ;;  %v282_v53 = vld [vmem:[%s1004_s5 + $0xf8] sm:$0x7] }
  0x33   : > { %355 = vmatprep.subr.mxu0 %v260_v43  ;;  %432 = vmatprep.subr.mxu1 %v262_v44  ;;  %v279_v54 = vld [vmem:[%s1004_s5 + $0xe0] sm:$0x7]  ;;  %v281_v55 = vld [vmem:[%s1004_s5 + $0xf0] sm:$0x7]  ;;  %v272_v56 = vld [vmem:[%s1004_s5 + $0xa8] sm:$0xff] }
  0x34   : > { %356 = vmatpush1.msra.mxu0 %v259_v45  ;;  %433 = vmatpush1.msra.mxu1 %v261_v46  ;;  %v274_v57 = vld [vmem:[%s1004_s5 + $0xb8] sm:$0xff]  ;;  %v271_v58 = vld [vmem:[%s1004_s5 + $0xa0] sm:$0xff]  ;;  %v273_v59 = vld [vmem:[%s1004_s5 + $0xb0] sm:$0xff] }
  0x35   : > { %357 = vmatprep.subr.mxu0 %v252_v47  ;;  %434 = vmatprep.subr.mxu1 %v254_v48  ;;  %v250_v60 = vld [vmem:[%s1122_s0 + $0x8] sm:$0xff]  ;;  %v266_v62 = vld [vmem:[%s1004_s5 + $0x78] sm:$0xff]  ;;  %v263_v63 = vld [vmem:[%s1004_s5 + $0x60] sm:$0xff] }
  0x36   : > { %358 = vmatpush1.msra.mxu0 %v251_v49  ;;  %435 = vmatpush1.msra.mxu1 %v253_v50  ;;  %v264_v61 = vld [vmem:[%s1004_s5 + $0x68] sm:$0xff]  ;;  %v265_v0 = vld [vmem:[%s1004_s5 + $0x70] sm:$0xff]  ;;  %v258_v2 = vld [vmem:[%s1004_s5 + $0x38] sm:$0xff] }
  0x37   : > { %792 = vmatmul.mubr.msk.f32.vlgmr.msra.gmra.mxu0 %vm295_vm1, %v249_v51  ;;  %796 = vmatmul.mubr.msk.f32.vlgmr.msra.gmra.mxu1 %vm295_vm1, %v249_v51  ;;  %v256_v1 = vld [vmem:[%s1004_s5 + $0x28] sm:$0xff]  ;;  %v255_v3 = vld [vmem:[%s1004_s5 + $0x20] sm:$0xff]  ;;  %v257_v4 = vld [vmem:[%s1004_s5 + $0x30] sm:$0xff] }
  0x38   : > { %798 = vmatprep.subr.msk.mxu0 %vm302_vm0, %v280_v52  ;;  %802 = vmatprep.subr.msk.mxu1 %vm302_vm0, %v282_v53  ;;  %v284_v5 = vld [vmem:[%s1124_s2 + $0x8] sm:$0xff] }
  0x39   : > { %799 = vmatpush1.msk.msra.mxu0 %vm302_vm0, %v279_v54  ;;  %803 = vmatpush1.msk.msra.mxu1 %vm302_vm0, %v281_v55 }
  0x3a   : > { %507 = vmatprep.subr.mxu0 %v272_v56  ;;  %584 = vmatprep.subr.mxu1 %v274_v57 }
  0x3b   : > { %397 = vmatprep.mubr.f32.mxu0 %v864_v32  ;;  %474 = vmatprep.mubr.f32.mxu1 %v864_v32 }
  0x3c   : > { %508 = vmatpush1.msra.mxu0 %v271_v58  ;;  %585 = vmatpush1.msra.mxu1 %v273_v59 }
  0x3d   : > { %793 = vmatmul.mubr.msk.f32.gmra.mxu0 %vm295_vm1, %v250_v60  ;;  %797 = vmatmul.mubr.msk.f32.gmra.mxu1 %vm295_vm1, %v250_v60 }
  0x3e   : > { %509 = vmatprep.subr.mxu0 %v264_v61  ;;  %586 = vmatprep.subr.mxu1 %v266_v62 }
  0x3f   : > { %510 = vmatpush1.msra.mxu0 %v263_v63  ;;  %587 = vmatpush1.msra.mxu1 %v265_v0 }
  0x40   : > { %511 = vmatprep.subr.mxu0 %v256_v1  ;;  %588 = vmatprep.subr.mxu1 %v258_v2 }
  0x41   : > { %512 = vmatpush1.msra.mxu0 %v255_v3  ;;  %545 = vmatprep.mubr.f32.mxu0 %v864_v32 }
  0x42   : > { %589 = vmatpush1.msra.mxu1 %v257_v4  ;;  %622 = vmatprep.mubr.f32.mxu1 %v864_v32 }
  0x43   : > { %800 = vmatmul.mubr.msk.f32.vlgmr.msra.gmra.mxu0 %vm295_vm1, %v249_v51  ;;  %804 = vmatmul.mubr.msk.f32.vlgmr.msra.gmra.mxu1 %vm295_vm1, %v249_v51 }
  0x44   : > { %551 = vmatprep.mubr.f32.mxu0 %v864_v32  ;;  %628 = vmatprep.mubr.f32.mxu1 %v864_v32 }
  0x45   : > { %292 = vperm.xlu0 %839, %v284_v5  }
  0x47   : > { %801 = vmatmul.mubr.msk.f32.gmra.mxu0 %vm295_vm1, %v250_v60  ;;  %805 = vmatmul.mubr.msk.f32.gmra.mxu1 %vm295_vm1, %v250_v60 }
  0xaa   : > { %v288_v6 = vpop.permute.xlu0 %287 }
  0xc0   : > { %v293_v17 = vpop.permute.xlu0 %292 }
  0xf7   : > { %v393_v7 = vpop.f32.mrf.mxu0  ;;  %v470_v8 = vpop.f32.mrf.mxu1 }
  0xf8   : > { %v394_v9 = vadd.f32 %v393_v7, %v288_v6  ;;  %v471_v10 = vadd.f32 %v470_v8, %v288_v6 }
  0xf9   : > { %v395_v11 = vpop.f32.mrf.mxu0  ;;  %v472_v12 = vpop.f32.mrf.mxu1 }
  0xfa   : > { %v635_v13 = vmax.f32 %v394_v9, 0.0  ;;  %v637_v14 = vmax.f32 %v471_v10, 0.0  ;;  %v396_v15 = vadd.f32 %v395_v11, %v288_v6  ;;  %v473_v16 = vadd.f32 %v472_v12, %v288_v6 }
  0xfc   : > { %651 = vst [vmem:[%s1071_s18] sm:$0xff] %v635_v13  ;;  %653 = vst [vmem:[%s1071_s18 + $0x10] sm:$0xff] %v637_v14  ;;  %v636_v18 = vmax.f32 %v396_v15, 0.0  ;;  %v638_v19 = vmax.f32 %v473_v16, 0.0 }
  0xfd   : > { %v399_v20 = vpop.f32.mrf.mxu0  ;;  %v476_v21 = vpop.f32.mrf.mxu1 }
  0xfe   : > { %652 = vst [vmem:[%s1071_s18 + $0x8] sm:$0xff] %v636_v18  ;;  %654 = vst [vmem:[%s1071_s18 + $0x18] sm:$0xff] %v638_v19  ;;  %v400_v22 = vadd.f32 %v399_v20, %v293_v17  ;;  %v477_v23 = vadd.f32 %v476_v21, %v293_v17 }
  0xff   : > { %v401_v24 = vpop.f32.mrf.mxu0  ;;  %v478_v25 = vpop.f32.mrf.mxu1 }
 0x100   : > { %v643_v26 = vmax.f32 %v400_v22, 0.0  ;;  %v645_v27 = vmax.f32 %v477_v23, 0.0  ;;  %v402_v28 = vadd.f32 %v401_v24, %v293_v17  ;;  %v479_v29 = vadd.f32 %v478_v25, %v293_v17 }
 0x102   : > { %659 = vst [vmem:[%s1071_s18 + $0x40] sm:$0xff] %v643_v26  ;;  %661 = vst [vmem:[%s1071_s18 + $0x50] sm:$0xff] %v645_v27  ;;  %v644_v30 = vmax.f32 %v402_v28, 0.0  ;;  %v646_v31 = vmax.f32 %v479_v29, 0.0 }
 0x103   : > { %v547_v32 = vpop.f32.mrf.mxu0  ;;  %v624_v33 = vpop.f32.mrf.mxu1  ;;  %v689_v56 = vld [vmem:[%s1071_s18] sm:$0xff] (%p916_p5)  ;;  %v693_v58 = vld [vmem:[%s1071_s18 + $0x10] sm:$0xff] (%p916_p5) }
 0x104   : > { %660 = vst [vmem:[%s1071_s18 + $0x48] sm:$0xff] %v644_v30  ;;  %662 = vst [vmem:[%s1071_s18 + $0x58] sm:$0xff] %v646_v31  ;;  %v548_v34 = vadd.f32 %v547_v32, %v288_v6  ;;  %v625_v35 = vadd.f32 %v624_v33, %v288_v6 }
 0x105   : > { %v549_v36 = vpop.f32.mrf.mxu0  ;;  %v626_v37 = vpop.f32.mrf.mxu1  ;;  %v691_v57 = vld [vmem:[%s1071_s18 + $0x8] sm:$0xff] (%p916_p5)  ;;  %v695_v59 = vld [vmem:[%s1071_s18 + $0x18] sm:$0xff] (%p916_p5)  ;;  %690 = vst [vmem:[%s676_s20] sm:$0xff] (%p916_p5), %v689_v56  ;;  %694 = vst [vmem:[%s676_s20 + $0x10] sm:$0xff] (%p916_p5), %v693_v58 }
 0x106   : > { %v639_v38 = vmax.f32 %v548_v34, 0.0  ;;  %v641_v39 = vmax.f32 %v625_v35, 0.0  ;;  %v550_v40 = vadd.f32 %v549_v36, %v288_v6  ;;  %v627_v41 = vadd.f32 %v626_v37, %v288_v6  ;;  %692 = vst [vmem:[%s676_s20 + $0x8] sm:$0xff] (%p916_p5), %v691_v57  ;;  %696 = vst [vmem:[%s676_s20 + $0x18] sm:$0xff] (%p916_p5), %v695_v59 }
 0x107   : > { %v553_v42 = vpop.f32.mrf.mxu0  ;;  %v630_v43 = vpop.f32.mrf.mxu1 }
 0x108   : > { %655 = vst [vmem:[%s1071_s18 + $0x20] sm:$0xff] %v639_v38  ;;  %657 = vst [vmem:[%s1071_s18 + $0x30] sm:$0xff] %v641_v39  ;;  %v640_v44 = vmax.f32 %v550_v40, 0.0  ;;  %v642_v45 = vmax.f32 %v627_v41, 0.0  ;;  %v554_v46 = vadd.f32 %v553_v42, %v293_v17  ;;  %v631_v47 = vadd.f32 %v630_v43, %v293_v17 }
 0x109   : > { %v555_v48 = vpop.f32.mrf.mxu0  ;;  %v632_v49 = vpop.f32.mrf.mxu1  ;;  %v705_v0 = vld [vmem:[%s1071_s18 + $0x40] sm:$0xff] (%p916_p5)  ;;  %v709_v2 = vld [vmem:[%s1071_s18 + $0x50] sm:$0xff] (%p916_p5) }
 0x10a   : > { %656 = vst [vmem:[%s1071_s18 + $0x28] sm:$0xff] %v640_v44  ;;  %658 = vst [vmem:[%s1071_s18 + $0x38] sm:$0xff] %v642_v45  ;;  %v647_v50 = vmax.f32 %v554_v46, 0.0  ;;  %v649_v51 = vmax.f32 %v631_v47, 0.0  ;;  %v556_v52 = vadd.f32 %v555_v48, %v293_v17  ;;  %v633_v53 = vadd.f32 %v632_v49, %v293_v17  ;;  %673 = sbr.rel (!%p916_p5) target bundleno = 279 (0x117), region = 59 }
 0x10b   : > { %706 = vst [vmem:[%s676_s20 + $0x80] sm:$0xff] (%p916_p5), %v705_v0  ;;  %v707_v1 = vld [vmem:[%s1071_s18 + $0x48] sm:$0xff] (%p916_p5)  ;;  %v711_v3 = vld [vmem:[%s1071_s18 + $0x58] sm:$0xff] (%p916_p5)  ;;  %710 = vst [vmem:[%s676_s20 + $0x90] sm:$0xff] (%p916_p5), %v709_v2 }
 0x10c   : > { %663 = vst [vmem:[%s1071_s18 + $0x60] sm:$0xff] %v647_v50  ;;  %665 = vst [vmem:[%s1071_s18 + $0x70] sm:$0xff] %v649_v51  ;;  %v648_v54 = vmax.f32 %v556_v52, 0.0  ;;  %v650_v55 = vmax.f32 %v633_v53, 0.0 }
 0x10d   : > { %708 = vst [vmem:[%s676_s20 + $0x88] sm:$0xff] (%p916_p5), %v707_v1  ;;  %712 = vst [vmem:[%s676_s20 + $0x98] sm:$0xff] (%p916_p5), %v711_v3 }
 0x10e   : > { %664 = vst [vmem:[%s1071_s18 + $0x68] sm:$0xff] %v648_v54  ;;  %666 = vst [vmem:[%s1071_s18 + $0x78] sm:$0xff] %v650_v55 }
 0x10f   : > { %v697_v60 = vld [vmem:[%s1071_s18 + $0x20] sm:$0xff]  ;;  %v701_v62 = vld [vmem:[%s1071_s18 + $0x30] sm:$0xff] }
 0x110   : > { %698 = vst [vmem:[%s676_s20 + $0x20] sm:$0xff] %v697_v60  ;;  %702 = vst [vmem:[%s676_s20 + $0x30] sm:$0xff] %v701_v62 }
 0x111   : > { %v699_v61 = vld [vmem:[%s1071_s18 + $0x28] sm:$0xff]  ;;  %v703_v63 = vld [vmem:[%s1071_s18 + $0x38] sm:$0xff] }
 0x112   : > { %700 = vst [vmem:[%s676_s20 + $0x28] sm:$0xff] %v699_v61  ;;  %704 = vst [vmem:[%s676_s20 + $0x38] sm:$0xff] %v703_v63 }
 0x113   : > { %v713_v4 = vld [vmem:[%s1071_s18 + $0x60] sm:$0xff]  ;;  %v717_v6 = vld [vmem:[%s1071_s18 + $0x70] sm:$0xff] }
 0x114   : > { %714 = vst [vmem:[%s676_s20 + $0xa0] sm:$0xff] %v713_v4  ;;  %718 = vst [vmem:[%s676_s20 + $0xb0] sm:$0xff] %v717_v6 }
 0x115   : > { %v715_v5 = vld [vmem:[%s1071_s18 + $0x68] sm:$0xff]  ;;  %v719_v7 = vld [vmem:[%s1071_s18 + $0x78] sm:$0xff] }
 0x116   : > { %716 = vst [vmem:[%s676_s20 + $0xa8] sm:$0xff] %v715_v5  ;;  %720 = vst [vmem:[%s676_s20 + $0xb8] sm:$0xff] %v719_v7 }
 0x117 PF: > { %p10_p10 = scmp.ge.s32.totalorder %s903_s16, 4   ;;  %s1127_s12 = smov %s858_s13 }
 0x118   : > { %s1128_s13 = smov %s914_s19  ;;  %s1129_s14 = smov %s903_s16 }
 0x119   :  { %12 = sbr.rel (!%p10_p10) target bundleno = 2 (0x2), region = 113 }

// kernel: reward_network_forward.4
= control target key start
LH: loop header
LB: loop body
LE: loop exit
PB: predicated region body
PF: predicated region fallthrough
CT: control target
= control target key end

     0   :  { %s669_s12 = smov 0   ;;  %s671_s13 = smov 0   ;;  %s905_s0 = inlined_call_operand.vmem [shape: f32[32,144], index: 0, kind: input, shape index: {}]   ;;  %s906_s1 = inlined_call_operand.vmem [shape: f32[144,512], index: 1, kind: input, shape index: {}]   ;;  %s907_s2 = inlined_call_operand.vmem [shape: f32[32,1], index: 2, kind: input, shape index: {}]   ;;  %s908_s3 = inlined_call_operand.vmem [shape: f32[32,512], index: 3, kind: output, shape index: {}]  }
   0x1   :  { %s673_s14 = smov 0  }
   0x2 LB: > { %s540_s15 = sadd.s32 4294967295, %s646_s14   ;;  %s686_s16 = sadd.s32 1, %s646_s14   ;;  %s646_s14 = sphi %s673_s14, %s912_s14   ;;  %s642_s13 = sphi %s671_s13, %s911_s13   ;;  %s638_s12 = sphi %s669_s12, %s910_s12  }
   0x3   : > { %s38_s17 = ssub.s32 %s646_s14, %s686_s16  ;;  %s41_s18 = sadd.s32 1, %s642_s13 }
   0x4   : > { %p39_p0 = scmp.eq.s32.totalorder %s38_s17, 0  ;;  %p48_p1 = scmp.ne.s32.totalorder %s642_s13, %s638_s12 }
   0x5   : > { %p49_p2 = scmp.eq.s32.totalorder %s646_s14, 0  ;;  %p99_p3 = scmp.eq.s32.totalorder %s540_s15, 1 }
   0x6   : > { %s697_s19 = scalar_select %p39_p0, %s642_s13, %s41_s18  }
   0x7   : > { %p50_p4 = por %p49_p2, %p48_p1  ;;  %p699_p5 = por %p99_p3, %p48_p1 }
   0x8   : > { %p543_p6 = scmp.ge.s32.totalorder %s646_s14, 2 }
   0xa   : > { %127 = sbr.rel (%p543_p6) target bundleno = 37 (0x25), region = 24 }
   0xf   : > { %130 = sbr.rel (!%p50_p4) target bundleno = 37 (0x25), region = 28  ;;  %s132_s21 = sand.u32 (%p50_p4), 1, %s642_s13  }
  0x10   : > { %s557_s22 = sshll.u32 (%p50_p4), %s646_s14, 4  ;;  %s595_s23 = smul.u32 (%p50_p4), 288, %s132_s21 }
  0x11   : > { %s709_s26 = scalar_lea.vmem (%p50_p4), %s906_s1, %s557_s22 }
  0x12   : > { %v150_v0 = vld [vmem:[%s709_s26] sm:$0xff] (%p50_p4)  ;;  %v152_v1 = vld [vmem:[%s709_s26 + $0x8] sm:$0xff] (%p50_p4)  ;;  %s717_s27 = scalar_lea.vmem (%p50_p4), [#allocation2], %s595_s23 }
  0x13   : > { %v154_v2 = vld [vmem:[%s709_s26 + $0x20] sm:$0xff] (%p50_p4)  ;;  %v156_v3 = vld [vmem:[%s709_s26 + $0x28] sm:$0xff] (%p50_p4)  ;;  %151 = vst [vmem:[%s717_s27] sm:$0xff] (%p50_p4), %v150_v0  ;;  %153 = vst [vmem:[%s717_s27 + $0x8] sm:$0xff] (%p50_p4), %v152_v1 }
  0x14   : > { %v158_v4 = vld [vmem:[%s709_s26 + $0x40] sm:$0xff]  ;;  %v160_v5 = vld [vmem:[%s709_s26 + $0x48] sm:$0xff]  ;;  %155 = vst [vmem:[%s717_s27 + $0x10] sm:$0xff] %v154_v2  ;;  %157 = vst [vmem:[%s717_s27 + $0x18] sm:$0xff] %v156_v3 }
  0x15   : > { %159 = vst [vmem:[%s717_s27 + $0x20] sm:$0xff] %v158_v4  ;;  %161 = vst [vmem:[%s717_s27 + $0x28] sm:$0xff] %v160_v5  ;;  %v162_v6 = vld [vmem:[%s709_s26 + $0x60] sm:$0xff]  ;;  %v164_v7 = vld [vmem:[%s709_s26 + $0x68] sm:$0xff] }
  0x16   : > { %v166_v8 = vld [vmem:[%s709_s26 + $0x80] sm:$0xff]  ;;  %163 = vst [vmem:[%s717_s27 + $0x30] sm:$0xff] %v162_v6  ;;  %165 = vst [vmem:[%s717_s27 + $0x38] sm:$0xff] %v164_v7  ;;  %v168_v9 = vld [vmem:[%s709_s26 + $0x88] sm:$0xff] }
  0x17   : > { %167 = vst [vmem:[%s717_s27 + $0x40] sm:$0xff] %v166_v8  ;;  %v170_v10 = vld [vmem:[%s709_s26 + $0xa0] sm:$0xff]  ;;  %v172_v11 = vld [vmem:[%s709_s26 + $0xa8] sm:$0xff]  ;;  %169 = vst [vmem:[%s717_s27 + $0x48] sm:$0xff] %v168_v9 }
  0x18   : > { %171 = vst [vmem:[%s717_s27 + $0x50] sm:$0xff] %v170_v10  ;;  %173 = vst [vmem:[%s717_s27 + $0x58] sm:$0xff] %v172_v11  ;;  %v174_v12 = vld [vmem:[%s709_s26 + $0xc0] sm:$0xff]  ;;  %v176_v13 = vld [vmem:[%s709_s26 + $0xc8] sm:$0xff] }
  0x19   : > { %v178_v14 = vld [vmem:[%s709_s26 + $0xe0] sm:$0xff]  ;;  %175 = vst [vmem:[%s717_s27 + $0x60] sm:$0xff] %v174_v12  ;;  %177 = vst [vmem:[%s717_s27 + $0x68] sm:$0xff] %v176_v13  ;;  %v180_v15 = vld [vmem:[%s709_s26 + $0xe8] sm:$0xff] }
  0x1a   : > { %179 = vst [vmem:[%s717_s27 + $0x70] sm:$0xff] %v178_v14  ;;  %v182_v16 = vld [vmem:[%s709_s26 + $0x100] sm:$0xff]  ;;  %v184_v17 = vld [vmem:[%s709_s26 + $0x108] sm:$0xff]  ;;  %181 = vst [vmem:[%s717_s27 + $0x78] sm:$0xff] %v180_v15 }
  0x1b   : > { %183 = vst [vmem:[%s717_s27 + $0x80] sm:$0xff] %v182_v16  ;;  %185 = vst [vmem:[%s717_s27 + $0x88] sm:$0xff] %v184_v17  ;;  %v186_v18 = vld [vmem:[%s709_s26 + $0x120] sm:$0xff]  ;;  %v188_v19 = vld [vmem:[%s709_s26 + $0x128] sm:$0xff] }
  0x1c   : > { %v190_v20 = vld [vmem:[%s709_s26 + $0x140] sm:$0xff]  ;;  %187 = vst [vmem:[%s717_s27 + $0x90] sm:$0xff] %v186_v18  ;;  %189 = vst [vmem:[%s717_s27 + $0x98] sm:$0xff] %v188_v19  ;;  %v192_v21 = vld [vmem:[%s709_s26 + $0x148] sm:$0xff] }
  0x1d   : > { %191 = vst [vmem:[%s717_s27 + $0xa0] sm:$0xff] %v190_v20  ;;  %v194_v22 = vld [vmem:[%s709_s26 + $0x160] sm:$0xff]  ;;  %v196_v23 = vld [vmem:[%s709_s26 + $0x168] sm:$0xff]  ;;  %193 = vst [vmem:[%s717_s27 + $0xa8] sm:$0xff] %v192_v21 }
  0x1e   : > { %195 = vst [vmem:[%s717_s27 + $0xb0] sm:$0xff] %v194_v22  ;;  %197 = vst [vmem:[%s717_s27 + $0xb8] sm:$0xff] %v196_v23  ;;  %v198_v24 = vld [vmem:[%s709_s26 + $0x180] sm:$0xff]  ;;  %v200_v25 = vld [vmem:[%s709_s26 + $0x188] sm:$0xff] }
  0x1f   : > { %v202_v26 = vld [vmem:[%s709_s26 + $0x1a0] sm:$0xff]  ;;  %199 = vst [vmem:[%s717_s27 + $0xc0] sm:$0xff] %v198_v24  ;;  %201 = vst [vmem:[%s717_s27 + $0xc8] sm:$0xff] %v200_v25  ;;  %v204_v27 = vld [vmem:[%s709_s26 + $0x1a8] sm:$0xff] }
  0x20   : > { %203 = vst [vmem:[%s717_s27 + $0xd0] sm:$0xff] %v202_v26  ;;  %v206_v28 = vld [vmem:[%s709_s26 + $0x1c0] sm:$0xff]  ;;  %v208_v29 = vld [vmem:[%s709_s26 + $0x1c8] sm:$0xff]  ;;  %205 = vst [vmem:[%s717_s27 + $0xd8] sm:$0xff] %v204_v27 }
  0x21   : > { %207 = vst [vmem:[%s717_s27 + $0xe0] sm:$0xff] %v206_v28  ;;  %209 = vst [vmem:[%s717_s27 + $0xe8] sm:$0xff] %v208_v29  ;;  %v210_v30 = vld [vmem:[%s709_s26 + $0x1e0] sm:$0xff]  ;;  %v212_v31 = vld [vmem:[%s709_s26 + $0x1e8] sm:$0xff] }
  0x22   : > { %v214_v32 = vld [vmem:[%s709_s26 + $0x200] sm:$0xff]  ;;  %211 = vst [vmem:[%s717_s27 + $0xf0] sm:$0xff] %v210_v30  ;;  %213 = vst [vmem:[%s717_s27 + $0xf8] sm:$0xff] %v212_v31  ;;  %v216_v33 = vld [vmem:[%s709_s26 + $0x208] sm:$0xff] }
  0x23   : > { %215 = vst [vmem:[%s717_s27 + $0x100] sm:$0xff] %v214_v32  ;;  %v218_v34 = vld [vmem:[%s709_s26 + $0x220] sm:$0xff]  ;;  %v220_v35 = vld [vmem:[%s709_s26 + $0x228] sm:$0xff]  ;;  %217 = vst [vmem:[%s717_s27 + $0x108] sm:$0xff] %v216_v33 }
  0x24   : > { %219 = vst [vmem:[%s717_s27 + $0x110] sm:$0xff] %v218_v34  ;;  %221 = vst [vmem:[%s717_s27 + $0x118] sm:$0xff] %v220_v35 }
  0x25 PF: > { %p546_p7 = scmp.ge.s32.totalorder %s646_s14, 1  ;;  %p226_p8 = scmp.lt.s32.totalorder %s646_s14, 3 }
  0x27   : > { %p227_p9 = pnand %p546_p7, %p226_p8 }
  0x28   : > { %s233_s28 = sand.u32 (!%p227_p9), 1, %s638_s12  }
  0x29   : > { %230 = sbr.rel (%p227_p9) target bundleno = 299 (0x12b), region = 51  ;;  %s547_s9 = sshll.u32 (!%p227_p9), %s233_s28, 6 }
  0x2a   : > { %s596_s6 = smul.u32 (!%p227_p9), 288, %s233_s28  ;;  %s870_s10 = scalar_lea.vmem (!%p227_p9), [#allocation3], %s547_s9 }
  0x2c   : > { %s804_s11 = scalar_lea.vmem (!%p227_p9), [#allocation2], %s596_s6 }
  0x2e   : > { %v258_v36 = vld [vmem:[%s905_s0 + $0x8] sm:$0xff]  ;;  %vm325_vm0 = vcmask 130048   ;;  %v648_v38 = vmov 0   ;;  %v303_v39 = vld [vmem:[%s907_s2 + $0x10] sm:$0xff]  ;;  %v301_v40 = vld [vmem:[%s907_s2] sm:$0xff]  ;;  %s558_s12 = sshll.u32 (%p699_p5), %s540_s15, 4 }
  0x2f   : > { %v262_v37 = vld [vmem:[%s905_s0 + $0x28] sm:$0xff]  ;;  %548 = vmatprep.mubr.msk.f32.mxu0 %vm325_vm0, %v258_v36  ;;  %623 = vset.pattern.permute.xlu1 %v648_v38  ;;  %v296_v41 = vld [vmem:[%s804_s11 + $0xf8] sm:$0xff]  ;;  %v295_v42 = vld [vmem:[%s804_s11 + $0xf0] sm:$0xff]  ;;  %s452_s17 = scalar_lea.vmem (%p699_p5), %s908_s3, %s558_s12 }
  0x30   : > { %550 = vmatprep.mubr.msk.f32.mxu1 %vm325_vm0, %v262_v37  ;;  %622 = vset.pattern.permute.xlu0 %v648_v38  ;;  %v294_v43 = vld [vmem:[%s804_s11 + $0xe8] sm:$0xff]  ;;  %v293_v44 = vld [vmem:[%s804_s11 + $0xe0] sm:$0xff]  ;;  %v292_v45 = vld [vmem:[%s804_s11 + $0xd8] sm:$0xff] }
  0x31   : > { %317 = vperm.xlu1 %623, %v303_v39   ;;  %307 = vperm.xlu0 %622, %v301_v40   ;;  %v291_v46 = vld [vmem:[%s804_s11 + $0xd0] sm:$0xff]  ;;  %v290_v47 = vld [vmem:[%s804_s11 + $0xc8] sm:$0xff]  ;;  %v289_v48 = vld [vmem:[%s804_s11 + $0xc0] sm:$0xff] }
  0x32   : > { %338 = vmatprep.subr.mxu0 %v296_v41  ;;  %559 = vmatprep.subr.mxu1 %v296_v41  ;;  %v288_v49 = vld [vmem:[%s804_s11 + $0xb8] sm:$0xff]  ;;  %v287_v50 = vld [vmem:[%s804_s11 + $0xb0] sm:$0xff]  ;;  %v286_v51 = vld [vmem:[%s804_s11 + $0xa8] sm:$0xff] }
  0x33   : > { %339 = vmatpush1.msra.mxu0 %v295_v42  ;;  %577 = vmatpush1.msra.mxu1 %v295_v42  ;;  %v285_v52 = vld [vmem:[%s804_s11 + $0xa0] sm:$0xff]  ;;  %v284_v53 = vld [vmem:[%s804_s11 + $0x98] sm:$0xff]  ;;  %v283_v54 = vld [vmem:[%s804_s11 + $0x90] sm:$0xff] }
  0x34   : > { %340 = vmatprep.subr.mxu0 %v294_v43  ;;  %560 = vmatprep.subr.mxu1 %v294_v43  ;;  %v282_v55 = vld [vmem:[%s804_s11 + $0x88] sm:$0xff]  ;;  %v281_v56 = vld [vmem:[%s804_s11 + $0x80] sm:$0xff]  ;;  %v280_v57 = vld [vmem:[%s804_s11 + $0x78] sm:$0xff] }
  0x35   : > { %341 = vmatpush1.msra.mxu0 %v293_v44  ;;  %578 = vmatpush1.msra.mxu1 %v293_v44  ;;  %v279_v58 = vld [vmem:[%s804_s11 + $0x70] sm:$0xff]  ;;  %v278_v59 = vld [vmem:[%s804_s11 + $0x68] sm:$0xff]  ;;  %v277_v60 = vld [vmem:[%s804_s11 + $0x60] sm:$0xff] }
  0x36   : > { %342 = vmatprep.subr.mxu0 %v292_v45  ;;  %561 = vmatprep.subr.mxu1 %v292_v45  ;;  %v276_v61 = vld [vmem:[%s804_s11 + $0x58] sm:$0xff]  ;;  %v275_v62 = vld [vmem:[%s804_s11 + $0x50] sm:$0xff]  ;;  %v274_v63 = vld [vmem:[%s804_s11 + $0x48] sm:$0xff] }
  0x37   : > { %343 = vmatpush1.msra.mxu0 %v291_v46  ;;  %579 = vmatpush1.msra.mxu1 %v291_v46  ;;  %v273_v0 = vld [vmem:[%s804_s11 + $0x40] sm:$0xff]  ;;  %v272_v1 = vld [vmem:[%s804_s11 + $0x38] sm:$0xff]  ;;  %v271_v2 = vld [vmem:[%s804_s11 + $0x30] sm:$0xff] }
  0x38   : > { %344 = vmatprep.subr.mxu0 %v290_v47  ;;  %562 = vmatprep.subr.mxu1 %v290_v47  ;;  %v270_v3 = vld [vmem:[%s804_s11 + $0x28] sm:$0xff]  ;;  %v269_v4 = vld [vmem:[%s804_s11 + $0x20] sm:$0xff]  ;;  %v268_v5 = vld [vmem:[%s804_s11 + $0x18] sm:$0xff] }
  0x39   : > { %345 = vmatpush1.msra.mxu0 %v289_v48  ;;  %580 = vmatpush1.msra.mxu1 %v289_v48  ;;  %v267_v6 = vld [vmem:[%s804_s11 + $0x10] sm:$0xff]  ;;  %v266_v7 = vld [vmem:[%s804_s11 + $0x8] sm:$0xff]  ;;  %v265_v8 = vld [vmem:[%s804_s11] sm:$0xff] }
  0x3a   : > { %346 = vmatprep.subr.mxu0 %v288_v49  ;;  %563 = vmatprep.subr.mxu1 %v288_v49  ;;  %v300_v9 = vld [vmem:[%s804_s11 + $0x118] sm:$0xff]  ;;  %v299_v10 = vld [vmem:[%s804_s11 + $0x110] sm:$0xff]  ;;  %v298_v11 = vld [vmem:[%s804_s11 + $0x108] sm:$0xff] }
  0x3b   : > { %347 = vmatpush1.msra.mxu0 %v287_v50  ;;  %581 = vmatpush1.msra.mxu1 %v287_v50  ;;  %v297_v12 = vld [vmem:[%s804_s11 + $0x100] sm:$0xff]  ;;  %v260_v15 = vld [vmem:[%s905_s0 + $0x18] sm:$0xff]  ;;  %v302_v18 = vld [vmem:[%s907_s2 + $0x8] sm:$0xff] }
  0x3c   : > { %348 = vmatprep.subr.mxu0 %v286_v51  ;;  %564 = vmatprep.subr.mxu1 %v286_v51  ;;  %v257_v13 = vld [vmem:[%s905_s0] sm:$0xff]  ;;  %v264_v16 = vld [vmem:[%s905_s0 + $0x38] sm:$0xff]  ;;  %v259_v19 = vld [vmem:[%s905_s0 + $0x10] sm:$0xff] }
  0x3d   : > { %349 = vmatpush1.msra.mxu0 %v285_v52  ;;  %582 = vmatpush1.msra.mxu1 %v285_v52  ;;  %v261_v14 = vld [vmem:[%s905_s0 + $0x20] sm:$0xff]  ;;  %v304_v17 = vld [vmem:[%s907_s2 + $0x18] sm:$0xff]  ;;  %v263_v20 = vld [vmem:[%s905_s0 + $0x30] sm:$0xff] }
  0x3e   : > { %350 = vmatprep.subr.mxu0 %v284_v53  ;;  %565 = vmatprep.subr.mxu1 %v284_v53 }
  0x3f   : > { %351 = vmatpush1.msra.mxu0 %v283_v54  ;;  %583 = vmatpush1.msra.mxu1 %v283_v54 }
  0x40   : > { %352 = vmatprep.subr.mxu0 %v282_v55  ;;  %566 = vmatprep.subr.mxu1 %v282_v55 }
  0x41   : > { %353 = vmatpush1.msra.mxu0 %v281_v56  ;;  %584 = vmatpush1.msra.mxu1 %v281_v56 }
  0x42   : > { %354 = vmatprep.subr.mxu0 %v280_v57  ;;  %567 = vmatprep.subr.mxu1 %v280_v57 }
  0x43   : > { %355 = vmatpush1.msra.mxu0 %v279_v58  ;;  %585 = vmatpush1.msra.mxu1 %v279_v58 }
  0x44   : > { %356 = vmatprep.subr.mxu0 %v278_v59  ;;  %568 = vmatprep.subr.mxu1 %v278_v59 }
  0x45   : > { %357 = vmatpush1.msra.mxu0 %v277_v60  ;;  %586 = vmatpush1.msra.mxu1 %v277_v60 }
  0x46   : > { %358 = vmatprep.subr.mxu0 %v276_v61  ;;  %569 = vmatprep.subr.mxu1 %v276_v61 }
  0x47   : > { %359 = vmatpush1.msra.mxu0 %v275_v62  ;;  %587 = vmatpush1.msra.mxu1 %v275_v62 }
  0x48   : > { %360 = vmatprep.subr.mxu0 %v274_v63  ;;  %570 = vmatprep.subr.mxu1 %v274_v63 }
  0x49   : > { %361 = vmatpush1.msra.mxu0 %v273_v0  ;;  %588 = vmatpush1.msra.mxu1 %v273_v0 }
  0x4a   : > { %362 = vmatprep.subr.mxu0 %v272_v1  ;;  %571 = vmatprep.subr.mxu1 %v272_v1 }
  0x4b   : > { %363 = vmatpush1.msra.mxu0 %v271_v2  ;;  %589 = vmatpush1.msra.mxu1 %v271_v2 }
  0x4c   : > { %364 = vmatprep.subr.mxu0 %v270_v3  ;;  %572 = vmatprep.subr.mxu1 %v270_v3 }
  0x4d   : > { %365 = vmatpush1.msra.mxu0 %v269_v4  ;;  %590 = vmatpush1.msra.mxu1 %v269_v4 }
  0x4e   : > { %366 = vmatprep.subr.mxu0 %v268_v5  ;;  %573 = vmatprep.subr.mxu1 %v268_v5 }
  0x4f   : > { %367 = vmatpush1.msra.mxu0 %v267_v6  ;;  %591 = vmatpush1.msra.mxu1 %v267_v6 }
  0x50   : > { %368 = vmatprep.subr.mxu0 %v266_v7  ;;  %574 = vmatprep.subr.mxu1 %v266_v7 }
  0x51   : > { %369 = vmatpush1.msra.mxu0 %v265_v8  ;;  %592 = vmatpush1.msra.mxu1 %v265_v8 }
  0x52   : > { %398 = vmatprep.subr.mxu0 %v300_v9  ;;  %575 = vmatprep.subr.mxu1 %v300_v9 }
  0x53   : > { %399 = vmatpush2.msra.mxu0 %v299_v10  ;;  %593 = vmatpush2.msra.mxu1 %v299_v10 }
  0x54   : > { %400 = vmatprep.subr.mxu0 %v298_v11  ;;  %576 = vmatprep.subr.mxu1 %v298_v11 }
  0x55   : > { %401 = vmatpush2.msra.mxu0 %v297_v12  ;;  %594 = vmatpush2.msra.mxu1 %v297_v12 }
  0x56   : > { %403 = vmatmul.mubr.f32.vlgmr.msra.gmra.mxu0 %v257_v13  ;;  %415 = vmatmul.mubr.f32.vlgmr.msra.gmra.mxu1 %v261_v14 }
  0x57   : > { %549 = vmatprep.mubr.msk.f32.mxu0 %vm325_vm0, %v260_v15  ;;  %551 = vmatprep.mubr.msk.f32.mxu1 %vm325_vm0, %v264_v16 }
  0x58   : > { %322 = vperm.xlu1 %623, %v304_v17   ;;  %312 = vperm.xlu0 %622, %v302_v18  }
  0x5a   : > { %409 = vmatmul.mubr.f32.gmra.mxu0 %v259_v19  ;;  %421 = vmatmul.mubr.f32.gmra.mxu1 %v263_v20 }
  0xac   : > { %v318_v21 = vpop.permute.xlu1 %317  ;;  %v308_v22 = vpop.permute.xlu0 %307 }
  0xd3   : > { %v323_v31 = vpop.permute.xlu1 %322  ;;  %v313_v32 = vpop.permute.xlu0 %312 }
 0x116   : > { %v404_v23 = vpop.f32.mrf.mxu0  ;;  %v416_v24 = vpop.f32.mrf.mxu1 }
 0x117   : > { %v405_v25 = vadd.f32 %v404_v23, %v308_v22  ;;  %v417_v26 = vadd.f32 %v416_v24, %v318_v21 }
 0x118   : > { %v406_v27 = vpop.f32.mrf.mxu0  ;;  %v418_v28 = vpop.f32.mrf.mxu1 }
 0x119   : > { %v427_v29 = vmax.f32 %v405_v25, 0.0  ;;  %v431_v30 = vmax.f32 %v417_v26, 0.0  ;;  %v407_v33 = vadd.f32 %v406_v27, %v308_v22  ;;  %v419_v34 = vadd.f32 %v418_v28, %v318_v21 }
 0x11a   : > { %v410_v35 = vpop.f32.mrf.mxu0  ;;  %v422_v36 = vpop.f32.mrf.mxu1 }
 0x11b   : > { %435 = vst [vmem:[%s870_s10] sm:$0xff] %v427_v29  ;;  %439 = vst [vmem:[%s870_s10 + $0x20] sm:$0xff] %v431_v30  ;;  %v428_v37 = vmax.f32 %v407_v33, 0.0  ;;  %v432_v38 = vmax.f32 %v419_v34, 0.0  ;;  %v411_v39 = vadd.f32 %v410_v35, %v313_v32  ;;  %v423_v40 = vadd.f32 %v422_v36, %v323_v31 }
 0x11c   : > { %v412_v41 = vpop.f32.mrf.mxu0  ;;  %v424_v42 = vpop.f32.mrf.mxu1 }
 0x11d   : > { %436 = vst [vmem:[%s870_s10 + $0x8] sm:$0xff] %v428_v37  ;;  %440 = vst [vmem:[%s870_s10 + $0x28] sm:$0xff] %v432_v38  ;;  %v429_v43 = vmax.f32 %v411_v39, 0.0  ;;  %v433_v44 = vmax.f32 %v423_v40, 0.0  ;;  %v413_v45 = vadd.f32 %v412_v41, %v313_v32  ;;  %v425_v46 = vadd.f32 %v424_v42, %v323_v31  ;;  %449 = sbr.rel (!%p699_p5) target bundleno = 299 (0x12b), region = 59 }
 0x11f   : > { %437 = vst [vmem:[%s870_s10 + $0x10] sm:$0xff] %v429_v43  ;;  %441 = vst [vmem:[%s870_s10 + $0x30] sm:$0xff] %v433_v44  ;;  %v430_v47 = vmax.f32 %v413_v45, 0.0  ;;  %v434_v48 = vmax.f32 %v425_v46, 0.0 }
 0x121   : > { %438 = vst [vmem:[%s870_s10 + $0x18] sm:$0xff] %v430_v47  ;;  %442 = vst [vmem:[%s870_s10 + $0x38] sm:$0xff] %v434_v48 }
 0x122   : > { %v465_v49 = vld [vmem:[%s870_s10] sm:$0xff] }
 0x123   : > { %v473_v53 = vld [vmem:[%s870_s10 + $0x20] sm:$0xff]  ;;  %466 = vst [vmem:[%s452_s17] sm:$0xff] %v465_v49 }
 0x124   : > { %v467_v50 = vld [vmem:[%s870_s10 + $0x8] sm:$0xff]  ;;  %474 = vst [vmem:[%s452_s17 + $0x40] sm:$0xff] %v473_v53 }
 0x125   : > { %v475_v54 = vld [vmem:[%s870_s10 + $0x28] sm:$0xff]  ;;  %468 = vst [vmem:[%s452_s17 + $0x8] sm:$0xff] %v467_v50 }
 0x126   : > { %v469_v51 = vld [vmem:[%s870_s10 + $0x10] sm:$0xff]  ;;  %476 = vst [vmem:[%s452_s17 + $0x48] sm:$0xff] %v475_v54 }
 0x127   : > { %470 = vst [vmem:[%s452_s17 + $0x20] sm:$0xff] %v469_v51  ;;  %v477_v55 = vld [vmem:[%s870_s10 + $0x30] sm:$0xff] }
 0x128   : > { %v471_v52 = vld [vmem:[%s870_s10 + $0x18] sm:$0xff]  ;;  %478 = vst [vmem:[%s452_s17 + $0x60] sm:$0xff] %v477_v55 }
 0x129   : > { %472 = vst [vmem:[%s452_s17 + $0x28] sm:$0xff] %v471_v52  ;;  %v479_v56 = vld [vmem:[%s870_s10 + $0x38] sm:$0xff] }
 0x12a   : > { %480 = vst [vmem:[%s452_s17 + $0x68] sm:$0xff] %v479_v56 }
 0x12b PF: > { %p10_p10 = scmp.ge.s32.totalorder %s686_s16, 4   ;;  %s910_s12 = smov %s642_s13 }
 0x12c   : > { %s911_s13 = smov %s697_s19  ;;  %s912_s14 = smov %s686_s16 }
 0x12d   :  { %12 = sbr.rel (!%p10_p10) target bundleno = 2 (0x2), region = 113 }

// kernel: reward_network_forward.5
= control target key start
LH: loop header
LB: loop body
LE: loop exit
PB: predicated region body
PF: predicated region fallthrough
CT: control target
= control target key end

     0   :  { %vm47_vm0 = vcmask 1043456   ;;  %vm43_vm1 = vcmask 31744   ;;  %v6183_v0 = vmov 0.0   ;;  %vm6184_vm2 = vmmov 0   ;;  %s9526_s5 = inlined_call_operand.vmem [shape: f32[4,32], index: 5, kind: input, shape index: {}]   ;;  %s9527_s1 = inlined_call_operand.vmem [shape: f32[2,4], index: 1, kind: input, shape index: {}]   ;;  %s9528_s2 = inlined_call_operand.vmem [shape: f32[32,256,128], index: 2, kind: input, shape index: {}]   ;;  %s9529_s3 = inlined_call_operand.vmem [shape: f32[32,128], index: 3, kind: input, shape index: {}]   ;;  %s9530_s0 = inlined_call_operand.vmem [shape: f32[32,2,256], index: 0, kind: input, shape index: {}]   ;;  %s9531_s6 = inlined_call_operand.vmem [shape: f32[1,32], index: 6, kind: input, shape index: {}]   ;;  %s9532_s8 = inlined_call_operand.<no memory space> [shape: f32[1,1], index: 8, kind: input, shape index: {}]   ;;  %s9533_s4 = inlined_call_operand.vmem [shape: f32[1,128], index: 4, kind: input, shape index: {}]   ;;  %s9534_s7 = inlined_call_operand.vmem [shape: f32[1,128], index: 7, kind: input, shape index: {}]   ;;  %s9535_s9 = inlined_call_operand.vmem [shape: f32[2,1], index: 9, kind: output, shape index: {}]  }
   0x1   :  { %6165 = vmatprep.subr.mxu0 %v6183_v0  ;;  %v35_v1 = vld [vmem:[%s9526_s5] sm:$0xf]  ;;  %6167 = vmatprep.mubr.msk.f32.mxu0 %vm6184_vm2, %v6183_v0  ;;  %v239_v3 = vld [vmem:[%s9528_s2 + $0xf8] sm:$0xff]  ;;  %v238_v5 = vld [vmem:[%s9528_s2 + $0xf0] sm:$0xff]  ;;  %vm133_vm3 = vcmask 261120   ;;  %vm3958_vm4 = vcmask 1041408  }
   0x2   :  { %v34_v2 = vld [vmem:[%s9527_s1] sm:$0x3]  ;;  %6166 = vmatpush3.msk.msra.mxu0 %vm47_vm0, %v35_v1  ;;  %v223_v4 = vld [vmem:[%s9528_s2 + $0x78] sm:$0xff]  ;;  %6170 = vmatprep.subr.mxu1 %v6183_v0  ;;  %v222_v6 = vld [vmem:[%s9528_s2 + $0x70] sm:$0xff]  ;;  %vm3970_vm5 = vcmask 1024  }
   0x3   :  { %6168 = vmatmul.mubr.msk.f32.vlgmr.msra.gmra.mxu0 %vm43_vm1, %v34_v2  ;;  %5045 = vmatprep.subr.mxu0 %v239_v3  ;;  %v237_v7 = vld [vmem:[%s9528_s2 + $0xe8] sm:$0xff]  ;;  %v236_v9 = vld [vmem:[%s9528_s2 + $0xe0] sm:$0xff]  ;;  %v235_v11 = vld [vmem:[%s9528_s2 + $0xd8] sm:$0xff] }
   0x4   :  { %5046 = vmatpush3.msra.mxu0 %v223_v4  ;;  %6178 = vmatprep.mubr.msk.f32.mxu1 %vm6184_vm2, %v6183_v0  ;;  %v221_v8 = vld [vmem:[%s9528_s2 + $0x68] sm:$0xff]  ;;  %v220_v10 = vld [vmem:[%s9528_s2 + $0x60] sm:$0xff]  ;;  %v219_v12 = vld [vmem:[%s9528_s2 + $0x58] sm:$0xff] }
   0x5   :  { %5047 = vmatprep.subr.mxu0 %v238_v5  ;;  %v234_v13 = vld [vmem:[%s9528_s2 + $0xd0] sm:$0xff]  ;;  %v125_v14 = vld [vmem:[%s9529_s3 + $0x18] sm:$0xff]  ;;  %v233_v17 = vld [vmem:[%s9528_s2 + $0xc8] sm:$0xff] }
   0x6   :  { %5048 = vmatpush3.msra.mxu0 %v222_v6  ;;  %v218_v15 = vld [vmem:[%s9528_s2 + $0x50] sm:$0xff]  ;;  %6171 = vmatpush3.msra.mxu1 %v125_v14  ;;  %v217_v18 = vld [vmem:[%s9528_s2 + $0x48] sm:$0xff]  ;;  %v232_v19 = vld [vmem:[%s9528_s2 + $0xc0] sm:$0xff] }
   0x7   :  { %5049 = vmatprep.subr.mxu0 %v237_v7  ;;  %v124_v16 = vld [vmem:[%s9529_s3 + $0x10] sm:$0xff]  ;;  %6172 = vmatprep.subr.mxu1 %v6183_v0  ;;  %v216_v20 = vld [vmem:[%s9528_s2 + $0x40] sm:$0xff]  ;;  %v231_v21 = vld [vmem:[%s9528_s2 + $0xb8] sm:$0xff] }
   0x8   :  { %5050 = vmatpush3.msra.mxu0 %v221_v8  ;;  %6173 = vmatpush3.msra.mxu1 %v124_v16  ;;  %v215_v22 = vld [vmem:[%s9528_s2 + $0x38] sm:$0xff]  ;;  %v230_v23 = vld [vmem:[%s9528_s2 + $0xb0] sm:$0xff]  ;;  %v229_v25 = vld [vmem:[%s9528_s2 + $0xa8] sm:$0xff] }
   0x9   :  { %5051 = vmatprep.subr.mxu0 %v236_v9  ;;  %6174 = vmatprep.subr.mxu1 %v6183_v0  ;;  %v214_v24 = vld [vmem:[%s9528_s2 + $0x30] sm:$0xff]  ;;  %v213_v26 = vld [vmem:[%s9528_s2 + $0x28] sm:$0xff]  ;;  %v228_v27 = vld [vmem:[%s9528_s2 + $0xa0] sm:$0xff] }
   0xa   :  { %5052 = vmatpush3.msra.mxu0 %v220_v10  ;;  %v212_v28 = vld [vmem:[%s9528_s2 + $0x20] sm:$0xff]  ;;  %v227_v29 = vld [vmem:[%s9528_s2 + $0x98] sm:$0xff]  ;;  %v226_v31 = vld [vmem:[%s9528_s2 + $0x90] sm:$0xff] }
   0xb   :  { %5053 = vmatprep.subr.mxu0 %v235_v11  ;;  %v211_v30 = vld [vmem:[%s9528_s2 + $0x18] sm:$0xff]  ;;  %v210_v32 = vld [vmem:[%s9528_s2 + $0x10] sm:$0xff]  ;;  %v225_v33 = vld [vmem:[%s9528_s2 + $0x88] sm:$0xff] }
   0xc   :  { %5054 = vmatpush3.msra.mxu0 %v219_v12  ;;  %v209_v34 = vld [vmem:[%s9528_s2 + $0x8] sm:$0xff]  ;;  %v3981_v35 = vld.sshfl [vmem:[%s9530_s0] sm:$0x33 pattern:$0x76325410]  ;;  %v4014_v41 = vld [vmem:[%s9528_s2 + $0x1f8] sm:$0xff] }
   0xd   :  { %5055 = vmatprep.subr.mxu0 %v234_v13  ;;  %v123_v36 = vld [vmem:[%s9529_s3 + $0x8] sm:$0xff]  ;;  %v224_v37 = vld [vmem:[%s9528_s2 + $0x80] sm:$0xff]  ;;  %v248_v38 = vcombine.high %v3981_v35, %v3981_v35  ;;  %v4048_v42 = vld [vmem:[%s9528_s2 + $0x2f8] sm:$0xff] }
   0xe   :  { %5056 = vmatpush3.msra.mxu0 %v218_v15  ;;  %6175 = vmatpush3.msra.mxu1 %v123_v36  ;;  %v208_v39 = vld [vmem:[%s9528_s2] sm:$0xff]  ;;  %v4032_v43 = vld [vmem:[%s9528_s2 + $0x278] sm:$0xff]  ;;  %v4047_v44 = vld [vmem:[%s9528_s2 + $0x2f0] sm:$0xff] }
   0xf   :  { %5057 = vmatprep.subr.mxu0 %v233_v17  ;;  %6176 = vmatprep.subr.mxu1 %v6183_v0  ;;  %v122_v40 = vld [vmem:[%s9529_s3] sm:$0xff]  ;;  %v4031_v45 = vld [vmem:[%s9528_s2 + $0x270] sm:$0xff]  ;;  %v4046_v46 = vld [vmem:[%s9528_s2 + $0x2e8] sm:$0xff] }
  0x10   :  { %5058 = vmatpush3.msra.mxu0 %v217_v18  ;;  %315 = vmatprep.mubr.f32.mxu0 %v248_v38  ;;  %v4030_v47 = vld [vmem:[%s9528_s2 + $0x268] sm:$0xff]  ;;  %v4045_v48 = vld [vmem:[%s9528_s2 + $0x2e0] sm:$0xff]  ;;  %v4044_v50 = vld [vmem:[%s9528_s2 + $0x2d8] sm:$0xff] }
  0x11   :  { %5059 = vmatprep.subr.mxu0 %v232_v19  ;;  %6177 = vmatpush3.msra.mxu1 %v122_v40  ;;  %v4029_v49 = vld [vmem:[%s9528_s2 + $0x260] sm:$0xff]  ;;  %v4028_v51 = vld [vmem:[%s9528_s2 + $0x258] sm:$0xff]  ;;  %v4043_v52 = vld [vmem:[%s9528_s2 + $0x2d0] sm:$0xff] }
  0x12   :  { %5060 = vmatpush3.msra.mxu0 %v216_v20  ;;  %5080 = vmatprep.subr.mxu1 %v4014_v41  ;;  %v4027_v53 = vld [vmem:[%s9528_s2 + $0x250] sm:$0xff]  ;;  %v4042_v54 = vld [vmem:[%s9528_s2 + $0x2c8] sm:$0xff]  ;;  %v4041_v56 = vld [vmem:[%s9528_s2 + $0x2c0] sm:$0xff] }
  0x13   :  { %5061 = vmatprep.subr.mxu0 %v231_v21  ;;  %v4026_v55 = vld [vmem:[%s9528_s2 + $0x248] sm:$0xff]  ;;  %v4025_v57 = vld [vmem:[%s9528_s2 + $0x240] sm:$0xff]  ;;  %v4040_v58 = vld [vmem:[%s9528_s2 + $0x2b8] sm:$0xff] }
  0x14   :  { %5062 = vmatpush3.msra.mxu0 %v215_v22  ;;  %v4024_v59 = vld [vmem:[%s9528_s2 + $0x238] sm:$0xff]  ;;  %v4039_v60 = vld [vmem:[%s9528_s2 + $0x2b0] sm:$0xff]  ;;  %v4038_v62 = vld [vmem:[%s9528_s2 + $0x2a8] sm:$0xff] }
  0x15   :  { %5063 = vmatprep.subr.mxu0 %v230_v23  ;;  %v4023_v61 = vld [vmem:[%s9528_s2 + $0x230] sm:$0xff]  ;;  %v4022_v63 = vld [vmem:[%s9528_s2 + $0x228] sm:$0xff]  ;;  %v4037_v0 = vld [vmem:[%s9528_s2 + $0x2a0] sm:$0xff] }
  0x16   :  { %5064 = vmatpush3.msra.mxu0 %v214_v24  ;;  %v4021_v1 = vld [vmem:[%s9528_s2 + $0x220] sm:$0xff]  ;;  %v4036_v2 = vld [vmem:[%s9528_s2 + $0x298] sm:$0xff]  ;;  %v4035_v4 = vld [vmem:[%s9528_s2 + $0x290] sm:$0xff] }
  0x17   :  { %5065 = vmatprep.subr.mxu0 %v229_v25  ;;  %v4020_v3 = vld [vmem:[%s9528_s2 + $0x218] sm:$0xff]  ;;  %v4019_v5 = vld [vmem:[%s9528_s2 + $0x210] sm:$0xff]  ;;  %v4034_v6 = vld [vmem:[%s9528_s2 + $0x288] sm:$0xff] }
  0x18   :  { %5066 = vmatpush3.msra.mxu0 %v213_v26  ;;  %v4018_v7 = vld [vmem:[%s9528_s2 + $0x208] sm:$0xff]  ;;  %v4033_v9 = vld [vmem:[%s9528_s2 + $0x280] sm:$0xff]  ;;  %v4116_v12 = vld [vmem:[%s9528_s2 + $0x4f8] sm:$0xff] }
  0x19   :  { %5067 = vmatprep.subr.mxu0 %v228_v27  ;;  %v4049_v8 = vld.sshfl [vmem:[%s9530_s0 + $0x8] sm:$0x33 pattern:$0x76325410]  ;;  %v4017_v11 = vld [vmem:[%s9528_s2 + $0x200] sm:$0xff]  ;;  %v4100_v13 = vld [vmem:[%s9528_s2 + $0x478] sm:$0xff] }
  0x1a   :  { %5068 = vmatpush3.msra.mxu0 %v212_v28  ;;  %v482_v10 = vcombine.high %v4049_v8, %v4049_v8  ;;  %v4115_v14 = vld [vmem:[%s9528_s2 + $0x4f0] sm:$0xff]  ;;  %v4114_v16 = vld [vmem:[%s9528_s2 + $0x4e8] sm:$0xff]  ;;  %v4113_v18 = vld [vmem:[%s9528_s2 + $0x4e0] sm:$0xff] }
  0x1b   :  { %5069 = vmatprep.subr.mxu0 %v227_v29  ;;  %v4099_v15 = vld [vmem:[%s9528_s2 + $0x470] sm:$0xff]  ;;  %v4098_v17 = vld [vmem:[%s9528_s2 + $0x468] sm:$0xff]  ;;  %v4097_v19 = vld [vmem:[%s9528_s2 + $0x460] sm:$0xff] }
  0x1c   :  { %5070 = vmatpush3.msra.mxu0 %v211_v30  ;;  %v4112_v20 = vld [vmem:[%s9528_s2 + $0x4d8] sm:$0xff]  ;;  %v4111_v22 = vld [vmem:[%s9528_s2 + $0x4d0] sm:$0xff]  ;;  %v4110_v24 = vld [vmem:[%s9528_s2 + $0x4c8] sm:$0xff] }
  0x1d   :  { %5071 = vmatprep.subr.mxu0 %v226_v31  ;;  %v4096_v21 = vld [vmem:[%s9528_s2 + $0x458] sm:$0xff]  ;;  %v4095_v23 = vld [vmem:[%s9528_s2 + $0x450] sm:$0xff]  ;;  %v4094_v25 = vld [vmem:[%s9528_s2 + $0x448] sm:$0xff] }
  0x1e   :  { %5072 = vmatpush3.msra.mxu0 %v210_v32  ;;  %v4109_v26 = vld [vmem:[%s9528_s2 + $0x4c0] sm:$0xff]  ;;  %v4108_v28 = vld [vmem:[%s9528_s2 + $0x4b8] sm:$0xff]  ;;  %v4107_v30 = vld [vmem:[%s9528_s2 + $0x4b0] sm:$0xff] }
  0x1f   :  { %5073 = vmatprep.subr.mxu0 %v225_v33  ;;  %v4093_v27 = vld [vmem:[%s9528_s2 + $0x440] sm:$0xff]  ;;  %v4092_v29 = vld [vmem:[%s9528_s2 + $0x438] sm:$0xff]  ;;  %v4091_v31 = vld [vmem:[%s9528_s2 + $0x430] sm:$0xff] }
  0x20   :  { %5074 = vmatpush3.msra.mxu0 %v209_v34  ;;  %v4106_v32 = vld [vmem:[%s9528_s2 + $0x4a8] sm:$0xff]  ;;  %v4105_v34 = vld [vmem:[%s9528_s2 + $0x4a0] sm:$0xff]  ;;  %v4104_v36 = vld [vmem:[%s9528_s2 + $0x498] sm:$0xff] }
  0x21   :  { %5075 = vmatprep.subr.mxu0 %v224_v37  ;;  %v4090_v33 = vld [vmem:[%s9528_s2 + $0x428] sm:$0xff]  ;;  %v4088_v37 = vld [vmem:[%s9528_s2 + $0x418] sm:$0xff]  ;;  %v4103_v38 = vld [vmem:[%s9528_s2 + $0x490] sm:$0xff] }
  0x22   :  { %5076 = vmatpush3.msra.mxu0 %v208_v39  ;;  %v4087_v39 = vld [vmem:[%s9528_s2 + $0x410] sm:$0xff]  ;;  %v4102_v40 = vld [vmem:[%s9528_s2 + $0x488] sm:$0xff] }
  0x23   :  { %316 = vmatmul.mubr.f32.vlgmr.msra.gmra.mxu0 %v3981_v35  ;;  %5115 = vmatprep.subr.mxu0 %v4048_v42  ;;  %v4089_v35 = vld [vmem:[%s9528_s2 + $0x420] sm:$0xff]  ;;  %v4086_v41 = vld [vmem:[%s9528_s2 + $0x408] sm:$0xff]  ;;  %v4117_v42 = vld.sshfl [vmem:[%s9530_s0 + $0x10] sm:$0x33 pattern:$0x76325410] }
  0x24   :  { %5116 = vmatpush3.msra.mxu0 %v4032_v43  ;;  %549 = vmatprep.mubr.f32.mxu0 %v482_v10  ;;  %v4101_v43 = vld [vmem:[%s9528_s2 + $0x480] sm:$0xff]  ;;  %v4170_v10 = vld [vmem:[%s9528_s2 + $0x688] sm:$0xff] }
  0x25   :  { %5117 = vmatprep.subr.mxu0 %v4047_v44  ;;  %v716_v44 = vcombine.high %v4117_v42, %v4117_v42 }
  0x26   :  { %5118 = vmatpush3.msra.mxu0 %v4031_v45  ;;  %v4085_v45 = vld [vmem:[%s9528_s2 + $0x400] sm:$0xff] }
  0x27   :  { %5119 = vmatprep.subr.mxu0 %v4046_v46  ;;  %v4184_v46 = vld [vmem:[%s9528_s2 + $0x6f8] sm:$0xff] }
  0x28   :  { %5120 = vmatpush3.msra.mxu0 %v4030_v47  ;;  %v4168_v47 = vld [vmem:[%s9528_s2 + $0x678] sm:$0xff] }
  0x29   :  { %5121 = vmatprep.subr.mxu0 %v4045_v48  ;;  %v4183_v48 = vld [vmem:[%s9528_s2 + $0x6f0] sm:$0xff] }
  0x2a   :  { %5122 = vmatpush3.msra.mxu0 %v4029_v49  ;;  %v4167_v49 = vld [vmem:[%s9528_s2 + $0x670] sm:$0xff] }
  0x2b   :  { %5123 = vmatprep.subr.mxu0 %v4044_v50  ;;  %v4182_v50 = vld [vmem:[%s9528_s2 + $0x6e8] sm:$0xff] }
  0x2c   :  { %5124 = vmatpush3.msra.mxu0 %v4028_v51  ;;  %v4166_v51 = vld [vmem:[%s9528_s2 + $0x668] sm:$0xff] }
  0x2d   :  { %5125 = vmatprep.subr.mxu0 %v4043_v52  ;;  %v4181_v52 = vld [vmem:[%s9528_s2 + $0x6e0] sm:$0xff] }
  0x2e   :  { %5126 = vmatpush3.msra.mxu0 %v4027_v53  ;;  %v4165_v53 = vld [vmem:[%s9528_s2 + $0x660] sm:$0xff] }
  0x2f   :  { %5127 = vmatprep.subr.mxu0 %v4042_v54  ;;  %v4180_v54 = vld [vmem:[%s9528_s2 + $0x6d8] sm:$0xff] }
  0x30   :  { %5128 = vmatpush3.msra.mxu0 %v4026_v55  ;;  %v4164_v55 = vld [vmem:[%s9528_s2 + $0x658] sm:$0xff] }
  0x31   :  { %5129 = vmatprep.subr.mxu0 %v4041_v56  ;;  %v4179_v56 = vld [vmem:[%s9528_s2 + $0x6d0] sm:$0xff] }
  0x32   :  { %5130 = vmatpush3.msra.mxu0 %v4025_v57  ;;  %v4163_v57 = vld [vmem:[%s9528_s2 + $0x650] sm:$0xff] }
  0x33   :  { %5131 = vmatprep.subr.mxu0 %v4040_v58  ;;  %v4178_v58 = vld [vmem:[%s9528_s2 + $0x6c8] sm:$0xff] }
  0x34   :  { %5132 = vmatpush3.msra.mxu0 %v4024_v59  ;;  %v4162_v59 = vld [vmem:[%s9528_s2 + $0x648] sm:$0xff] }
  0x35   :  { %5133 = vmatprep.subr.mxu0 %v4039_v60  ;;  %v4177_v60 = vld [vmem:[%s9528_s2 + $0x6c0] sm:$0xff] }
  0x36   :  { %5134 = vmatpush3.msra.mxu0 %v4023_v61  ;;  %v4161_v61 = vld [vmem:[%s9528_s2 + $0x640] sm:$0xff] }
  0x37   :  { %5135 = vmatprep.subr.mxu0 %v4038_v62  ;;  %v4176_v62 = vld [vmem:[%s9528_s2 + $0x6b8] sm:$0xff] }
  0x38   :  { %5136 = vmatpush3.msra.mxu0 %v4022_v63  ;;  %v4160_v63 = vld [vmem:[%s9528_s2 + $0x638] sm:$0xff] }
  0x39   :  { %5137 = vmatprep.subr.mxu0 %v4037_v0  ;;  %v4175_v0 = vld [vmem:[%s9528_s2 + $0x6b0] sm:$0xff] }
  0x3a   :  { %5138 = vmatpush3.msra.mxu0 %v4021_v1  ;;  %v4159_v1 = vld [vmem:[%s9528_s2 + $0x630] sm:$0xff] }
  0x3b   :  { %5139 = vmatprep.subr.mxu0 %v4036_v2  ;;  %v4174_v2 = vld [vmem:[%s9528_s2 + $0x6a8] sm:$0xff] }
  0x3c   :  { %5140 = vmatpush3.msra.mxu0 %v4020_v3  ;;  %v4158_v3 = vld [vmem:[%s9528_s2 + $0x628] sm:$0xff] }
  0x3d   :  { %5141 = vmatprep.subr.mxu0 %v4035_v4  ;;  %v4173_v4 = vld [vmem:[%s9528_s2 + $0x6a0] sm:$0xff] }
  0x3e   :  { %5142 = vmatpush3.msra.mxu0 %v4019_v5  ;;  %v4157_v5 = vld [vmem:[%s9528_s2 + $0x620] sm:$0xff] }
  0x3f   :  { %5143 = vmatprep.subr.mxu0 %v4034_v6  ;;  %v4172_v6 = vld [vmem:[%s9528_s2 + $0x698] sm:$0xff] }
  0x40   :  { %5144 = vmatpush3.msra.mxu0 %v4018_v7  ;;  %v4156_v7 = vld [vmem:[%s9528_s2 + $0x618] sm:$0xff] }
  0x41   :  { %5145 = vmatprep.subr.mxu0 %v4033_v9  ;;  %v4155_v9 = vld [vmem:[%s9528_s2 + $0x610] sm:$0xff] }
  0x42   :  { %5146 = vmatpush3.msra.mxu0 %v4017_v11  ;;  %v4154_v11 = vld [vmem:[%s9528_s2 + $0x608] sm:$0xff] }
  0x43   :  { %550 = vmatmul.mubr.f32.vlgmr.msra.gmra.mxu0 %v4049_v8  ;;  %5185 = vmatprep.subr.mxu0 %v4116_v12  ;;  %v4171_v8 = vld [vmem:[%s9528_s2 + $0x690] sm:$0xff]  ;;  %v4185_v12 = vld.sshfl [vmem:[%s9530_s0 + $0x18] sm:$0x33 pattern:$0x76325410] }
  0x44   :  { %5186 = vmatpush3.msra.mxu0 %v4100_v13  ;;  %783 = vmatprep.mubr.f32.mxu0 %v716_v44  ;;  %v4169_v13 = vld [vmem:[%s9528_s2 + $0x680] sm:$0xff] }
  0x45   :  { %5187 = vmatprep.subr.mxu0 %v4115_v14  ;;  %v950_v14 = vcombine.high %v4185_v12, %v4185_v12 }
  0x46   :  { %5188 = vmatpush3.msra.mxu0 %v4099_v15  ;;  %v4153_v15 = vld [vmem:[%s9528_s2 + $0x600] sm:$0xff] }
  0x47   :  { %5189 = vmatprep.subr.mxu0 %v4114_v16  ;;  %v4252_v16 = vld [vmem:[%s9528_s2 + $0x8f8] sm:$0xff] }
  0x48   :  { %5190 = vmatpush3.msra.mxu0 %v4098_v17  ;;  %v4236_v17 = vld [vmem:[%s9528_s2 + $0x878] sm:$0xff] }
  0x49   :  { %5191 = vmatprep.subr.mxu0 %v4113_v18  ;;  %v4251_v18 = vld [vmem:[%s9528_s2 + $0x8f0] sm:$0xff] }
  0x4a   :  { %5192 = vmatpush3.msra.mxu0 %v4097_v19  ;;  %v4235_v19 = vld [vmem:[%s9528_s2 + $0x870] sm:$0xff] }
  0x4b   :  { %5193 = vmatprep.subr.mxu0 %v4112_v20  ;;  %v4250_v20 = vld [vmem:[%s9528_s2 + $0x8e8] sm:$0xff] }
  0x4c   :  { %5194 = vmatpush3.msra.mxu0 %v4096_v21  ;;  %v4234_v21 = vld [vmem:[%s9528_s2 + $0x868] sm:$0xff] }
  0x4d   :  { %5195 = vmatprep.subr.mxu0 %v4111_v22  ;;  %v4249_v22 = vld [vmem:[%s9528_s2 + $0x8e0] sm:$0xff] }
  0x4e   :  { %5196 = vmatpush3.msra.mxu0 %v4095_v23  ;;  %v4233_v23 = vld [vmem:[%s9528_s2 + $0x860] sm:$0xff] }
  0x4f   :  { %5197 = vmatprep.subr.mxu0 %v4110_v24  ;;  %v4248_v24 = vld [vmem:[%s9528_s2 + $0x8d8] sm:$0xff] }
  0x50   :  { %5198 = vmatpush3.msra.mxu0 %v4094_v25  ;;  %v4232_v25 = vld [vmem:[%s9528_s2 + $0x858] sm:$0xff] }
  0x51   :  { %5199 = vmatprep.subr.mxu0 %v4109_v26  ;;  %v4247_v26 = vld [vmem:[%s9528_s2 + $0x8d0] sm:$0xff] }
  0x52   :  { %5200 = vmatpush3.msra.mxu0 %v4093_v27  ;;  %v4231_v27 = vld [vmem:[%s9528_s2 + $0x850] sm:$0xff] }
  0x53   :  { %5201 = vmatprep.subr.mxu0 %v4108_v28  ;;  %v4246_v28 = vld [vmem:[%s9528_s2 + $0x8c8] sm:$0xff] }
  0x54   :  { %5202 = vmatpush3.msra.mxu0 %v4092_v29  ;;  %v4230_v29 = vld [vmem:[%s9528_s2 + $0x848] sm:$0xff] }
  0x55   :  { %5203 = vmatprep.subr.mxu0 %v4107_v30  ;;  %v4245_v30 = vld [vmem:[%s9528_s2 + $0x8c0] sm:$0xff] }
  0x56   :  { %5204 = vmatpush3.msra.mxu0 %v4091_v31  ;;  %v4229_v31 = vld [vmem:[%s9528_s2 + $0x840] sm:$0xff] }
  0x57   :  { %5205 = vmatprep.subr.mxu0 %v4106_v32  ;;  %v4244_v32 = vld [vmem:[%s9528_s2 + $0x8b8] sm:$0xff] }
  0x58   :  { %5206 = vmatpush3.msra.mxu0 %v4090_v33  ;;  %v4228_v33 = vld [vmem:[%s9528_s2 + $0x838] sm:$0xff] }
  0x59   :  { %5207 = vmatprep.subr.mxu0 %v4105_v34  ;;  %v4243_v34 = vld [vmem:[%s9528_s2 + $0x8b0] sm:$0xff] }
  0x5a   :  { %5208 = vmatpush3.msra.mxu0 %v4089_v35  ;;  %v4227_v35 = vld [vmem:[%s9528_s2 + $0x830] sm:$0xff] }
  0x5b   :  { %5209 = vmatprep.subr.mxu0 %v4104_v36  ;;  %v4242_v36 = vld [vmem:[%s9528_s2 + $0x8a8] sm:$0xff] }
  0x5c   :  { %5210 = vmatpush3.msra.mxu0 %v4088_v37  ;;  %v4226_v37 = vld [vmem:[%s9528_s2 + $0x828] sm:$0xff] }
  0x5d   :  { %5211 = vmatprep.subr.mxu0 %v4103_v38  ;;  %v4241_v38 = vld [vmem:[%s9528_s2 + $0x8a0] sm:$0xff] }
  0x5e   :  { %5212 = vmatpush3.msra.mxu0 %v4087_v39  ;;  %v4225_v39 = vld [vmem:[%s9528_s2 + $0x820] sm:$0xff] }
  0x5f   :  { %5213 = vmatprep.subr.mxu0 %v4102_v40  ;;  %v3976_v40 = vld [vmem:[%s9531_s6] ss:$0 sm:$0xff] }
  0x60   :  { %5214 = vmatpush3.msra.mxu0 %v4086_v41  ;;  %v4240_v41 = vld [vmem:[%s9528_s2 + $0x898] sm:$0xff] }
  0x61   :  { %5215 = vmatprep.subr.mxu0 %v4101_v43  ;;  %v4224_v43 = vld [vmem:[%s9528_s2 + $0x818] sm:$0xff] }
  0x62   :  { %5216 = vmatpush3.msra.mxu0 %v4085_v45  ;;  %v4239_v45 = vld [vmem:[%s9528_s2 + $0x890] sm:$0xff] }
  0x63   :  { %784 = vmatmul.mubr.f32.vlgmr.msra.gmra.mxu0 %v4117_v42  ;;  %5255 = vmatprep.subr.mxu0 %v4184_v46  ;;  %v6740_v42 = vld.sshfl [vmem:[%s9530_s0 + $0x4] sm:$0x33 pattern:$0x76325410] }
  0x64   :  { %5256 = vmatpush3.msra.mxu0 %v4168_v47  ;;  %1017 = vmatprep.mubr.f32.mxu0 %v950_v14  ;;  %v4223_v47 = vld [vmem:[%s9528_s2 + $0x810] sm:$0xff]  ;;  %v4316_v14 = vld [vmem:[%s9528_s2 + $0xad8] sm:$0xff] }
  0x65   :  { %5257 = vmatprep.subr.mxu0 %v4183_v48 }
  0x66   :  { %5258 = vmatpush3.msra.mxu0 %v4167_v49  ;;  %v365_v49 = vcombine.high %v6740_v42, %v6740_v42 }
  0x67   :  { %5259 = vmatprep.subr.mxu0 %v4182_v50  ;;  %v4238_v50 = vld [vmem:[%s9528_s2 + $0x888] sm:$0xff] }
  0x68   :  { %5260 = vmatpush3.msra.mxu0 %v4166_v51 }
  0x69   :  { %5261 = vmatprep.subr.mxu0 %v4181_v52  ;;  %v3998_v52 = vld [vmem:[%s9528_s2 + $0x178] sm:$0xff] }
  0x6a   :  { %5262 = vmatpush3.msra.mxu0 %v4165_v53  ;;  %v4222_v53 = vld [vmem:[%s9528_s2 + $0x808] sm:$0xff] }
  0x6b   :  { %5263 = vmatprep.subr.mxu0 %v4180_v54  ;;  %v4013_v54 = vld [vmem:[%s9528_s2 + $0x1f0] sm:$0xff] }
  0x6c   :  { %5264 = vmatpush3.msra.mxu0 %v4164_v55  ;;  %v4237_v55 = vld [vmem:[%s9528_s2 + $0x880] sm:$0xff] }
  0x6d   :  { %5265 = vmatprep.subr.mxu0 %v4179_v56  ;;  %v4253_v56 = vld.sshfl [vmem:[%s9530_s0 + $0x20] sm:$0x33 pattern:$0x76325410] }
  0x6e   :  { %5266 = vmatpush3.msra.mxu0 %v4163_v57  ;;  %v3997_v57 = vld [vmem:[%s9528_s2 + $0x170] sm:$0xff] }
  0x6f   :  { %5267 = vmatprep.subr.mxu0 %v4178_v58  ;;  %v4221_v58 = vld [vmem:[%s9528_s2 + $0x800] sm:$0xff] }
  0x70   :  { %5268 = vmatpush3.msra.mxu0 %v4162_v59  ;;  %v1184_v59 = vcombine.high %v4253_v56, %v4253_v56 }
  0x71   :  { %5269 = vmatprep.subr.mxu0 %v4177_v60  ;;  %v4012_v60 = vld [vmem:[%s9528_s2 + $0x1e8] sm:$0xff] }
  0x72   :  { %5270 = vmatpush3.msra.mxu0 %v4161_v61  ;;  %v3996_v61 = vld [vmem:[%s9528_s2 + $0x168] sm:$0xff] }
  0x73   :  { %5271 = vmatprep.subr.mxu0 %v4176_v62  ;;  %v4320_v62 = vld [vmem:[%s9528_s2 + $0xaf8] sm:$0xff] }
  0x74   :  { %5272 = vmatpush3.msra.mxu0 %v4160_v63  ;;  %v4011_v63 = vld [vmem:[%s9528_s2 + $0x1e0] sm:$0xff] }
  0x75   :  { %5273 = vmatprep.subr.mxu0 %v4175_v0  ;;  %v4304_v0 = vld [vmem:[%s9528_s2 + $0xa78] sm:$0xff] }
  0x76   :  { %5274 = vmatpush3.msra.mxu0 %v4159_v1  ;;  %v3995_v1 = vld [vmem:[%s9528_s2 + $0x160] sm:$0xff] }
  0x77   :  { %5275 = vmatprep.subr.mxu0 %v4174_v2  ;;  %v4319_v2 = vld [vmem:[%s9528_s2 + $0xaf0] sm:$0xff] }
  0x78   :  { %5276 = vmatpush3.msra.mxu0 %v4158_v3  ;;  %v4010_v3 = vld [vmem:[%s9528_s2 + $0x1d8] sm:$0xff] }
  0x79   :  { %5277 = vmatprep.subr.mxu0 %v4173_v4  ;;  %v4303_v4 = vld [vmem:[%s9528_s2 + $0xa70] sm:$0xff] }
  0x7a   :  { %5278 = vmatpush3.msra.mxu0 %v4157_v5  ;;  %v3994_v5 = vld [vmem:[%s9528_s2 + $0x158] sm:$0xff] }
  0x7b   :  { %5279 = vmatprep.subr.mxu0 %v4172_v6  ;;  %v4318_v6 = vld [vmem:[%s9528_s2 + $0xae8] sm:$0xff] }
  0x7c   :  { %5280 = vmatpush3.msra.mxu0 %v4156_v7  ;;  %v4009_v7 = vld [vmem:[%s9528_s2 + $0x1d0] sm:$0xff] }
  0x7d   :  { %5281 = vmatprep.subr.mxu0 %v4171_v8  ;;  %v4302_v8 = vld [vmem:[%s9528_s2 + $0xa68] sm:$0xff] }
  0x7e   :  { %5282 = vmatpush3.msra.mxu0 %v4155_v9  ;;  %v3993_v9 = vld [vmem:[%s9528_s2 + $0x150] sm:$0xff] }
  0x7f   :  { %5283 = vmatprep.subr.mxu0 %v4170_v10  ;;  %v4317_v10 = vld [vmem:[%s9528_s2 + $0xae0] sm:$0xff] }
  0x80   :  { %5284 = vmatpush3.msra.mxu0 %v4154_v11  ;;  %v4008_v11 = vld [vmem:[%s9528_s2 + $0x1c8] sm:$0xff] }
  0x81   :  { %5285 = vmatprep.subr.mxu0 %v4169_v13  ;;  %v3992_v13 = vld [vmem:[%s9528_s2 + $0x148] sm:$0xff] }
  0x82   :  { %5286 = vmatpush3.msra.mxu0 %v4153_v15  ;;  %v4007_v15 = vld [vmem:[%s9528_s2 + $0x1c0] sm:$0xff] }
  0x83   :  { %1018 = vmatmul.mubr.f32.vlgmr.msra.gmra.mxu0 %v4185_v12  ;;  %5325 = vmatprep.subr.mxu0 %v4252_v16  ;;  %v4301_v12 = vld [vmem:[%s9528_s2 + $0xa60] sm:$0xff]  ;;  %v4300_v16 = vld [vmem:[%s9528_s2 + $0xa58] sm:$0xff] }
  0x84   :  { %5326 = vmatpush3.msra.mxu0 %v4236_v17  ;;  %1251 = vmatprep.mubr.f32.mxu0 %v1184_v59  ;;  %v3991_v17 = vld [vmem:[%s9528_s2 + $0x140] sm:$0xff]  ;;  %v4306_v59 = vld [vmem:[%s9528_s2 + $0xa88] sm:$0xff] }
  0x85   :  { %5327 = vmatprep.subr.mxu0 %v4251_v18  ;;  %v4315_v18 = vld [vmem:[%s9528_s2 + $0xad0] sm:$0xff] }
  0x86   :  { %5328 = vmatpush3.msra.mxu0 %v4235_v19  ;;  %v4006_v19 = vld [vmem:[%s9528_s2 + $0x1b8] sm:$0xff] }
  0x87   :  { %5329 = vmatprep.subr.mxu0 %v4250_v20  ;;  %v4299_v20 = vld [vmem:[%s9528_s2 + $0xa50] sm:$0xff] }
  0x88   :  { %5330 = vmatpush3.msra.mxu0 %v4234_v21  ;;  %v3990_v21 = vld [vmem:[%s9528_s2 + $0x138] sm:$0xff] }
  0x89   :  { %5331 = vmatprep.subr.mxu0 %v4249_v22  ;;  %v4314_v22 = vld [vmem:[%s9528_s2 + $0xac8] sm:$0xff] }
  0x8a   :  { %5332 = vmatpush3.msra.mxu0 %v4233_v23  ;;  %v4005_v23 = vld [vmem:[%s9528_s2 + $0x1b0] sm:$0xff] }
  0x8b   :  { %5333 = vmatprep.subr.mxu0 %v4248_v24  ;;  %v4298_v24 = vld [vmem:[%s9528_s2 + $0xa48] sm:$0xff] }
  0x8c   :  { %5334 = vmatpush3.msra.mxu0 %v4232_v25  ;;  %v3989_v25 = vld [vmem:[%s9528_s2 + $0x130] sm:$0xff] }
  0x8d   :  { %5335 = vmatprep.subr.mxu0 %v4247_v26  ;;  %v4313_v26 = vld [vmem:[%s9528_s2 + $0xac0] sm:$0xff] }
  0x8e   :  { %5336 = vmatpush3.msra.mxu0 %v4231_v27  ;;  %v4004_v27 = vld [vmem:[%s9528_s2 + $0x1a8] sm:$0xff] }
  0x8f   :  { %5337 = vmatprep.subr.mxu0 %v4246_v28  ;;  %v4297_v28 = vld [vmem:[%s9528_s2 + $0xa40] sm:$0xff] }
  0x90   :  { %5338 = vmatpush3.msra.mxu0 %v4230_v29  ;;  %v3988_v29 = vld [vmem:[%s9528_s2 + $0x128] sm:$0xff] }
  0x91   :  { %5339 = vmatprep.subr.mxu0 %v4245_v30  ;;  %v4312_v30 = vld [vmem:[%s9528_s2 + $0xab8] sm:$0xff] }
  0x92   :  { %5340 = vmatpush3.msra.mxu0 %v4229_v31  ;;  %v4003_v31 = vld [vmem:[%s9528_s2 + $0x1a0] sm:$0xff] }
  0x93   :  { %5341 = vmatprep.subr.mxu0 %v4244_v32  ;;  %v4296_v32 = vld [vmem:[%s9528_s2 + $0xa38] sm:$0xff] }
  0x94   :  { %5342 = vmatpush3.msra.mxu0 %v4228_v33  ;;  %v3987_v33 = vld [vmem:[%s9528_s2 + $0x120] sm:$0xff] }
  0x95   :  { %5343 = vmatprep.subr.mxu0 %v4243_v34  ;;  %v4311_v34 = vld [vmem:[%s9528_s2 + $0xab0] sm:$0xff] }
  0x96   :  { %5344 = vmatpush3.msra.mxu0 %v4227_v35  ;;  %v4002_v35 = vld [vmem:[%s9528_s2 + $0x198] sm:$0xff] }
  0x97   :  { %5345 = vmatprep.subr.mxu0 %v4242_v36  ;;  %v4295_v36 = vld [vmem:[%s9528_s2 + $0xa30] sm:$0xff] }
  0x98   :  { %5346 = vmatpush3.msra.mxu0 %v4226_v37  ;;  %v3986_v37 = vld [vmem:[%s9528_s2 + $0x118] sm:$0xff] }
  0x99   :  { %5347 = vmatprep.subr.mxu0 %v4241_v38  ;;  %v4310_v38 = vld [vmem:[%s9528_s2 + $0xaa8] sm:$0xff] }
  0x9a   :  { %5348 = vmatpush3.msra.mxu0 %v4225_v39  ;;  %v4001_v39 = vld [vmem:[%s9528_s2 + $0x190] sm:$0xff] }
  0x9b   :  { %5349 = vmatprep.subr.mxu0 %v4240_v41  ;;  %v3985_v41 = vld [vmem:[%s9528_s2 + $0x110] sm:$0xff] }
  0x9c   :  { %5350 = vmatpush3.msra.mxu0 %v4224_v43  ;;  %v4309_v43 = vld [vmem:[%s9528_s2 + $0xaa0] sm:$0xff] }
  0x9d   :  { %5351 = vmatprep.subr.mxu0 %v4239_v45  ;;  %v4293_v45 = vld [vmem:[%s9528_s2 + $0xa20] sm:$0xff] }
  0x9e   :  { %5352 = vmatpush3.msra.mxu0 %v4223_v47  ;;  %v6930_v47 = vld.sshfl [vmem:[%s9530_s0 + $0xc] sm:$0x33 pattern:$0x76325410] }
  0x9f   :  { %5353 = vmatprep.subr.mxu0 %v4238_v50  ;;  %v4292_v50 = vld [vmem:[%s9528_s2 + $0xa18] sm:$0xff] }
  0xa0   :  { %5354 = vmatpush3.msra.mxu0 %v4222_v53  ;;  %v4082_v53 = vld [vmem:[%s9528_s2 + $0x3f8] sm:$0xff] }
  0xa1   :  { %5355 = vmatprep.subr.mxu0 %v4237_v55  ;;  %v4066_v55 = vld [vmem:[%s9528_s2 + $0x378] sm:$0xff] }
  0xa2   :  { %5356 = vmatpush3.msra.mxu0 %v4221_v58  ;;  %v4065_v58 = vld [vmem:[%s9528_s2 + $0x370] sm:$0xff] }
  0xa3   :  { %1252 = vmatmul.mubr.f32.vlgmr.msra.gmra.mxu0 %v4253_v56  ;;  %5395 = vmatprep.subr.mxu0 %v4320_v62  ;;  %v4081_v56 = vld [vmem:[%s9528_s2 + $0x3f0] sm:$0xff]  ;;  %v4064_v62 = vld [vmem:[%s9528_s2 + $0x368] sm:$0xff] }
  0xa4   :  { %5396 = vmatpush3.msra.mxu0 %v4304_v0  ;;  %v4079_v0 = vld [vmem:[%s9528_s2 + $0x3e0] sm:$0xff] }
  0xa5   :  { %5397 = vmatprep.subr.mxu0 %v4319_v2 }
  0xa6   :  { %5398 = vmatpush3.msra.mxu0 %v4303_v4  ;;  %v4078_v4 = vld [vmem:[%s9528_s2 + $0x3d8] sm:$0xff] }
  0xa7   :  { %5399 = vmatprep.subr.mxu0 %v4318_v6  ;;  %v4388_v6 = vld [vmem:[%s9528_s2 + $0xcf8] sm:$0xff] }
  0xa8   :  { %5400 = vmatpush3.msra.mxu0 %v4302_v8  ;;  %v4372_v8 = vld [vmem:[%s9528_s2 + $0xc78] sm:$0xff] }
  0xa9   :  { %5401 = vmatprep.subr.mxu0 %v4317_v10  ;;  %v4387_v10 = vld [vmem:[%s9528_s2 + $0xcf0] sm:$0xff] }
  0xaa   :  { %5402 = vmatpush3.msra.mxu0 %v4301_v12  ;;  %v4371_v12 = vld [vmem:[%s9528_s2 + $0xc70] sm:$0xff] }
  0xab   :  { %5403 = vmatprep.subr.mxu0 %v4316_v14  ;;  %v4386_v14 = vld [vmem:[%s9528_s2 + $0xce8] sm:$0xff] }
  0xac   :  { %5404 = vmatpush3.msra.mxu0 %v4300_v16  ;;  %v4370_v16 = vld [vmem:[%s9528_s2 + $0xc68] sm:$0xff] }
  0xad   :  { %5405 = vmatprep.subr.mxu0 %v4315_v18  ;;  %v4385_v18 = vld [vmem:[%s9528_s2 + $0xce0] sm:$0xff] }
  0xae   :  { %5406 = vmatpush3.msra.mxu0 %v4299_v20  ;;  %v4369_v20 = vld [vmem:[%s9528_s2 + $0xc60] sm:$0xff] }
  0xaf   :  { %5407 = vmatprep.subr.mxu0 %v4314_v22  ;;  %v4384_v22 = vld [vmem:[%s9528_s2 + $0xcd8] sm:$0xff] }
  0xb0   :  { %5408 = vmatpush3.msra.mxu0 %v4298_v24  ;;  %v4368_v24 = vld [vmem:[%s9528_s2 + $0xc58] sm:$0xff] }
  0xb1   :  { %5409 = vmatprep.subr.mxu0 %v4313_v26  ;;  %v4383_v26 = vld [vmem:[%s9528_s2 + $0xcd0] sm:$0xff] }
  0xb2   :  { %5410 = vmatpush3.msra.mxu0 %v4297_v28  ;;  %v4367_v28 = vld [vmem:[%s9528_s2 + $0xc50] sm:$0xff] }
  0xb3   :  { %5411 = vmatprep.subr.mxu0 %v4312_v30  ;;  %v4382_v30 = vld [vmem:[%s9528_s2 + $0xcc8] sm:$0xff] }
  0xb4   :  { %5412 = vmatpush3.msra.mxu0 %v4296_v32  ;;  %v4366_v32 = vld [vmem:[%s9528_s2 + $0xc48] sm:$0xff] }
  0xb5   :  { %5413 = vmatprep.subr.mxu0 %v4311_v34  ;;  %v4381_v34 = vld [vmem:[%s9528_s2 + $0xcc0] sm:$0xff] }
  0xb6   :  { %5414 = vmatpush3.msra.mxu0 %v4295_v36  ;;  %v4365_v36 = vld [vmem:[%s9528_s2 + $0xc40] sm:$0xff] }
  0xb7   :  { %5415 = vmatprep.subr.mxu0 %v4310_v38  ;;  %v4380_v38 = vld [vmem:[%s9528_s2 + $0xcb8] sm:$0xff] }
  0xc3   :  { %v117_v44 = vpop.f32.mrf.mxu0 }
  0xc4   :  { %v118_v46 = vadd.f32 %v3976_v40, %v117_v44  ;;  %v4294_v40 = vld [vmem:[%s9528_s2 + $0xa28] sm:$0xff] }
  0xc5   :  { %v6169_v48 = vpop.f32.mrf.mxu0  ;;  %v4000_v44 = vld [vmem:[%s9528_s2 + $0x188] sm:$0xff]  ;;  %5416 = vmatpush3.msra.mxu0 %v4294_v40  ;;  %v4364_v40 = vld [vmem:[%s9528_s2 + $0xc38] sm:$0xff] }
  0xc6   :  { %v121_v51 = vmax.f32 %v118_v46, 0.0  ;;  %v3984_v46 = vld [vmem:[%s9528_s2 + $0x108] sm:$0xff]  ;;  %v4308_v48 = vld [vmem:[%s9528_s2 + $0xa98] sm:$0xff]  ;;  %5417 = vmatprep.subr.mxu0 %v4309_v43  ;;  %v4379_v43 = vld [vmem:[%s9528_s2 + $0xcb0] sm:$0xff] }
  0xc7   :  { %5418 = vmatpush3.msra.mxu0 %v4293_v45  ;;  %v4363_v45 = vld [vmem:[%s9528_s2 + $0xc30] sm:$0xff] }
  0xc8   :  { %6179 = vmatmul.mubr.msk.f32.vlgmr.msra.gmra.mxu1 %vm133_vm3, %v121_v51  ;;  %v3983_v51 = vld [vmem:[%s9528_s2 + $0x100] sm:$0xff]  ;;  %5419 = vmatprep.subr.mxu0 %v4308_v48  ;;  %v7121_v48 = vld.sshfl [vmem:[%s9530_s0 + $0x14] sm:$0x33 pattern:$0x76325410] }
  0xc9   :  { %5081 = vmatpush3.msra.mxu1 %v3998_v52  ;;  %432 = vmatprep.mubr.f32.mxu1 %v365_v49  ;;  %v3999_v49 = vld [vmem:[%s9528_s2 + $0x180] sm:$0xff]  ;;  %v4307_v52 = vld [vmem:[%s9528_s2 + $0xa90] sm:$0xff] }
  0xca   :  { %5082 = vmatprep.subr.mxu1 %v4013_v54  ;;  %v599_v54 = vcombine.high %v6930_v47, %v6930_v47  ;;  %5420 = vmatpush3.msra.mxu0 %v4292_v50  ;;  %v4067_v50 = vld [vmem:[%s9528_s2 + $0x380] sm:$0xff] }
  0xcb   :  { %5083 = vmatpush3.msra.mxu1 %v3997_v57  ;;  %5421 = vmatprep.subr.mxu0 %v4307_v52  ;;  %v4291_v57 = vld [vmem:[%s9528_s2 + $0xa10] sm:$0xff]  ;;  %v4051_v52 = vld [vmem:[%s9528_s2 + $0x300] sm:$0xff] }
  0xcc   :  { %5084 = vmatprep.subr.mxu1 %v4012_v60  ;;  %v4321_v60 = vld.sshfl [vmem:[%s9530_s0 + $0x28] sm:$0x33 pattern:$0x76325410]  ;;  %5422 = vmatpush3.msra.mxu0 %v4291_v57  ;;  %v4149_v57 = vld [vmem:[%s9528_s2 + $0x5f0] sm:$0xff] }
  0xcd   :  { %5085 = vmatpush3.msra.mxu1 %v3996_v61  ;;  %v4080_v61 = vld [vmem:[%s9528_s2 + $0x3e8] sm:$0xff]  ;;  %5423 = vmatprep.subr.mxu0 %v4306_v59  ;;  %v1418_v2 = vcombine.high %v4321_v60, %v4321_v60  ;;  %v4133_v59 = vld [vmem:[%s9528_s2 + $0x570] sm:$0xff] }
  0xce   :  { %5086 = vmatprep.subr.mxu1 %v4011_v63  ;;  %v4305_v63 = vld [vmem:[%s9528_s2 + $0xa80] sm:$0xff] }
  0xcf   :  { %5087 = vmatpush3.msra.mxu1 %v3995_v1  ;;  %v4289_v1 = vld [vmem:[%s9528_s2 + $0xa00] sm:$0xff]  ;;  %1485 = vmatprep.mubr.f32.mxu0 %v1418_v2  ;;  %v4374_v2 = vld [vmem:[%s9528_s2 + $0xc88] sm:$0xff] }
  0xd0   :  { %5088 = vmatprep.subr.mxu1 %v4010_v3  ;;  %v4063_v3 = vld [vmem:[%s9528_s2 + $0x360] sm:$0xff] }
  0xd1   :  { %5089 = vmatpush3.msra.mxu1 %v3994_v5  ;;  %v4062_v5 = vld [vmem:[%s9528_s2 + $0x358] sm:$0xff] }
  0xd2   :  { %5090 = vmatprep.subr.mxu1 %v4009_v7  ;;  %v4077_v7 = vld [vmem:[%s9528_s2 + $0x3d0] sm:$0xff] }
  0xd3   :  { %5091 = vmatpush3.msra.mxu1 %v3993_v9  ;;  %v4061_v9 = vld [vmem:[%s9528_s2 + $0x350] sm:$0xff] }
  0xd4   :  { %5092 = vmatprep.subr.mxu1 %v4008_v11  ;;  %v4076_v11 = vld [vmem:[%s9528_s2 + $0x3c8] sm:$0xff] }
  0xd5   :  { %5093 = vmatpush3.msra.mxu1 %v3992_v13  ;;  %v4060_v13 = vld [vmem:[%s9528_s2 + $0x348] sm:$0xff] }
  0xd6   :  { %5094 = vmatprep.subr.mxu1 %v4007_v15  ;;  %v4075_v15 = vld [vmem:[%s9528_s2 + $0x3c0] sm:$0xff] }
  0xd7   :  { %5095 = vmatpush3.msra.mxu1 %v3991_v17  ;;  %v4059_v17 = vld [vmem:[%s9528_s2 + $0x340] sm:$0xff] }
  0xd8   :  { %5096 = vmatprep.subr.mxu1 %v4006_v19  ;;  %v4074_v19 = vld [vmem:[%s9528_s2 + $0x3b8] sm:$0xff] }
  0xd9   :  { %5097 = vmatpush3.msra.mxu1 %v3990_v21  ;;  %v4058_v21 = vld [vmem:[%s9528_s2 + $0x338] sm:$0xff] }
  0xda   :  { %5098 = vmatprep.subr.mxu1 %v4005_v23  ;;  %v4073_v23 = vld [vmem:[%s9528_s2 + $0x3b0] sm:$0xff] }
  0xdb   :  { %5099 = vmatpush3.msra.mxu1 %v3989_v25  ;;  %v4057_v25 = vld [vmem:[%s9528_s2 + $0x330] sm:$0xff] }
  0xdc   :  { %5100 = vmatprep.subr.mxu1 %v4004_v27  ;;  %v4072_v27 = vld [vmem:[%s9528_s2 + $0x3a8] sm:$0xff] }
  0xdd   :  { %5101 = vmatpush3.msra.mxu1 %v3988_v29  ;;  %v4056_v29 = vld [vmem:[%s9528_s2 + $0x328] sm:$0xff] }
  0xde   :  { %5102 = vmatprep.subr.mxu1 %v4003_v31  ;;  %v4071_v31 = vld [vmem:[%s9528_s2 + $0x3a0] sm:$0xff] }
  0xdf   :  { %5103 = vmatpush3.msra.mxu1 %v3987_v33  ;;  %v4055_v33 = vld [vmem:[%s9528_s2 + $0x320] sm:$0xff] }
  0xe0   :  { %5104 = vmatprep.subr.mxu1 %v4002_v35  ;;  %v4070_v35 = vld [vmem:[%s9528_s2 + $0x398] sm:$0xff] }
  0xe1   :  { %5105 = vmatpush3.msra.mxu1 %v3986_v37  ;;  %v4054_v37 = vld [vmem:[%s9528_s2 + $0x318] sm:$0xff] }
  0xe2   :  { %5106 = vmatprep.subr.mxu1 %v4001_v39  ;;  %v4069_v39 = vld [vmem:[%s9528_s2 + $0x390] sm:$0xff] }
  0xe3   :  { %5107 = vmatpush3.msra.mxu1 %v3985_v41  ;;  %v4053_v41 = vld [vmem:[%s9528_s2 + $0x310] sm:$0xff] }
  0xe4   :  { %5108 = vmatprep.subr.mxu1 %v4000_v44  ;;  %v4068_v44 = vld [vmem:[%s9528_s2 + $0x388] sm:$0xff] }
  0xe5   :  { %5109 = vmatpush3.msra.mxu1 %v3984_v46  ;;  %v4052_v46 = vld [vmem:[%s9528_s2 + $0x308] sm:$0xff] }
  0xe6   :  { %5110 = vmatprep.subr.mxu1 %v3999_v49  ;;  %v4378_v49 = vld [vmem:[%s9528_s2 + $0xca8] sm:$0xff] }
  0xe7   :  { %5111 = vmatpush3.msra.mxu1 %v3983_v51  ;;  %v4362_v51 = vld [vmem:[%s9528_s2 + $0xc28] sm:$0xff] }
  0xe8   :  { %433 = vmatmul.mubr.f32.vlgmr.msra.gmra.mxu1 %v6740_v42  ;;  %5150 = vmatprep.subr.mxu1 %v4082_v53  ;;  %v4290_v42 = vld [vmem:[%s9528_s2 + $0xa08] sm:$0xff]  ;;  %v4377_v53 = vld [vmem:[%s9528_s2 + $0xca0] sm:$0xff] }
  0xe9   :  { %5151 = vmatpush3.msra.mxu1 %v4066_v55  ;;  %666 = vmatprep.mubr.f32.mxu1 %v599_v54  ;;  %v4150_v54 = vld [vmem:[%s9528_s2 + $0x5f8] sm:$0xff]  ;;  %v833_v55 = vcombine.high %v7121_v48, %v7121_v48 }
  0xea   :  { %5152 = vmatprep.subr.mxu1 %v4081_v56  ;;  %5424 = vmatpush3.msra.mxu0 %v4290_v42  ;;  %v4134_v56 = vld [vmem:[%s9528_s2 + $0x578] sm:$0xff] }
  0xeb   :  { %5153 = vmatpush3.msra.mxu1 %v4065_v58  ;;  %5425 = vmatprep.subr.mxu0 %v4305_v63  ;;  %v4361_v58 = vld [vmem:[%s9528_s2 + $0xc20] sm:$0xff]  ;;  %v4360_v42 = vld [vmem:[%s9528_s2 + $0xc18] sm:$0xff] }
  0xec   :  { %5154 = vmatprep.subr.mxu1 %v4080_v61  ;;  %5426 = vmatpush3.msra.mxu0 %v4289_v1  ;;  %v4148_v61 = vld [vmem:[%s9528_s2 + $0x5e8] sm:$0xff]  ;;  %v4147_v63 = vld [vmem:[%s9528_s2 + $0x5e0] sm:$0xff] }
  0xed   :  { %5155 = vmatpush3.msra.mxu1 %v4064_v62  ;;  %1486 = vmatmul.mubr.f32.vlgmr.msra.gmra.mxu0 %v4321_v60  ;;  %v4376_v60 = vld [vmem:[%s9528_s2 + $0xc98] sm:$0xff]  ;;  %v4375_v62 = vld [vmem:[%s9528_s2 + $0xc90] sm:$0xff]  ;;  %v4131_v1 = vld [vmem:[%s9528_s2 + $0x560] sm:$0xff] }
  0xee   :  { %5156 = vmatprep.subr.mxu1 %v4079_v0  ;;  %5465 = vmatprep.subr.mxu0 %v4388_v6  ;;  %v4359_v0 = vld [vmem:[%s9528_s2 + $0xc10] sm:$0xff]  ;;  %v4130_v6 = vld [vmem:[%s9528_s2 + $0x558] sm:$0xff] }
  0xef   :  { %5157 = vmatpush3.msra.mxu1 %v4063_v3  ;;  %5466 = vmatpush3.msra.mxu0 %v4372_v8  ;;  %v4389_v3 = vld.sshfl [vmem:[%s9530_s0 + $0x30] sm:$0x33 pattern:$0x76325410] }
  0xf0   :  { %5158 = vmatprep.subr.mxu1 %v4078_v4  ;;  %5467 = vmatprep.subr.mxu0 %v4387_v10  ;;  %v4146_v4 = vld [vmem:[%s9528_s2 + $0x5d8] sm:$0xff]  ;;  %v4145_v8 = vld [vmem:[%s9528_s2 + $0x5d0] sm:$0xff]  ;;  %v1652_v10 = vcombine.high %v4389_v3, %v4389_v3 }
  0xf1   :  { %5159 = vmatpush3.msra.mxu1 %v4062_v5  ;;  %5468 = vmatpush3.msra.mxu0 %v4371_v12  ;;  %v4358_v5 = vld [vmem:[%s9528_s2 + $0xc08] sm:$0xff] }
  0xf2   :  { %5160 = vmatprep.subr.mxu1 %v4077_v7  ;;  %5469 = vmatprep.subr.mxu0 %v4386_v14  ;;  %v4373_v7 = vld [vmem:[%s9528_s2 + $0xc80] sm:$0xff]  ;;  %v4144_v12 = vld [vmem:[%s9528_s2 + $0x5c8] sm:$0xff]  ;;  %v4456_v14 = vld [vmem:[%s9528_s2 + $0xef8] sm:$0xff] }
  0xf3   :  { %5161 = vmatpush3.msra.mxu1 %v4061_v9  ;;  %5470 = vmatpush3.msra.mxu0 %v4370_v16  ;;  %v4357_v9 = vld [vmem:[%s9528_s2 + $0xc00] sm:$0xff]  ;;  %v4440_v16 = vld [vmem:[%s9528_s2 + $0xe78] sm:$0xff] }
  0xf4   :  { %5162 = vmatprep.subr.mxu1 %v4076_v11  ;;  %5471 = vmatprep.subr.mxu0 %v4385_v18  ;;  %v4129_v11 = vld [vmem:[%s9528_s2 + $0x550] sm:$0xff] }
  0xf5   :  { %5163 = vmatpush3.msra.mxu1 %v4060_v13  ;;  %5472 = vmatpush3.msra.mxu0 %v4369_v20  ;;  %v4128_v13 = vld [vmem:[%s9528_s2 + $0x548] sm:$0xff]  ;;  %v4455_v18 = vld [vmem:[%s9528_s2 + $0xef0] sm:$0xff] }
  0xf6   :  { %5164 = vmatprep.subr.mxu1 %v4075_v15  ;;  %5473 = vmatprep.subr.mxu0 %v4384_v22  ;;  %v4143_v15 = vld [vmem:[%s9528_s2 + $0x5c0] sm:$0xff]  ;;  %v4439_v20 = vld [vmem:[%s9528_s2 + $0xe70] sm:$0xff]  ;;  %v4454_v22 = vld [vmem:[%s9528_s2 + $0xee8] sm:$0xff] }
  0xf7   :  { %5165 = vmatpush3.msra.mxu1 %v4059_v17  ;;  %5474 = vmatpush3.msra.mxu0 %v4368_v24  ;;  %v4127_v17 = vld [vmem:[%s9528_s2 + $0x540] sm:$0xff]  ;;  %v4438_v24 = vld [vmem:[%s9528_s2 + $0xe68] sm:$0xff] }
  0xf8   :  { %5166 = vmatprep.subr.mxu1 %v4074_v19  ;;  %5475 = vmatprep.subr.mxu0 %v4383_v26  ;;  %v4142_v19 = vld [vmem:[%s9528_s2 + $0x5b8] sm:$0xff]  ;;  %v4453_v26 = vld [vmem:[%s9528_s2 + $0xee0] sm:$0xff] }
  0xf9   :  { %5167 = vmatpush3.msra.mxu1 %v4058_v21  ;;  %5476 = vmatpush3.msra.mxu0 %v4367_v28  ;;  %v4126_v21 = vld [vmem:[%s9528_s2 + $0x538] sm:$0xff]  ;;  %v4437_v28 = vld [vmem:[%s9528_s2 + $0xe60] sm:$0xff] }
  0xfa   :  { %5168 = vmatprep.subr.mxu1 %v4073_v23  ;;  %5477 = vmatprep.subr.mxu0 %v4382_v30  ;;  %v4141_v23 = vld [vmem:[%s9528_s2 + $0x5b0] sm:$0xff]  ;;  %v4452_v30 = vld [vmem:[%s9528_s2 + $0xed8] sm:$0xff] }
  0xfb   :  { %5169 = vmatpush3.msra.mxu1 %v4057_v25  ;;  %5478 = vmatpush3.msra.mxu0 %v4366_v32  ;;  %v4125_v25 = vld [vmem:[%s9528_s2 + $0x530] sm:$0xff]  ;;  %v4436_v32 = vld [vmem:[%s9528_s2 + $0xe58] sm:$0xff] }
  0xfc   :  { %5170 = vmatprep.subr.mxu1 %v4072_v27  ;;  %5479 = vmatprep.subr.mxu0 %v4381_v34  ;;  %v4140_v27 = vld [vmem:[%s9528_s2 + $0x5a8] sm:$0xff]  ;;  %v4451_v34 = vld [vmem:[%s9528_s2 + $0xed0] sm:$0xff] }
  0xfd   :  { %5171 = vmatpush3.msra.mxu1 %v4056_v29  ;;  %5480 = vmatpush3.msra.mxu0 %v4365_v36  ;;  %v4124_v29 = vld [vmem:[%s9528_s2 + $0x528] sm:$0xff]  ;;  %v4435_v36 = vld [vmem:[%s9528_s2 + $0xe50] sm:$0xff] }
  0xfe   :  { %5172 = vmatprep.subr.mxu1 %v4071_v31  ;;  %5481 = vmatprep.subr.mxu0 %v4380_v38  ;;  %v4139_v31 = vld [vmem:[%s9528_s2 + $0x5a0] sm:$0xff]  ;;  %v4450_v38 = vld [vmem:[%s9528_s2 + $0xec8] sm:$0xff] }
  0xff   :  { %5173 = vmatpush3.msra.mxu1 %v4055_v33  ;;  %5482 = vmatpush3.msra.mxu0 %v4364_v40  ;;  %v4123_v33 = vld [vmem:[%s9528_s2 + $0x520] sm:$0xff]  ;;  %v4434_v40 = vld [vmem:[%s9528_s2 + $0xe48] sm:$0xff] }
 0x100   :  { %5174 = vmatprep.subr.mxu1 %v4070_v35  ;;  %5483 = vmatprep.subr.mxu0 %v4379_v43  ;;  %v4138_v35 = vld [vmem:[%s9528_s2 + $0x598] sm:$0xff]  ;;  %v4449_v43 = vld [vmem:[%s9528_s2 + $0xec0] sm:$0xff] }
 0x101   :  { %5175 = vmatpush3.msra.mxu1 %v4054_v37  ;;  %5484 = vmatpush3.msra.mxu0 %v4363_v45  ;;  %v4122_v37 = vld [vmem:[%s9528_s2 + $0x518] sm:$0xff]  ;;  %v4433_v45 = vld [vmem:[%s9528_s2 + $0xe40] sm:$0xff] }
 0x102   :  { %5176 = vmatprep.subr.mxu1 %v4069_v39  ;;  %5485 = vmatprep.subr.mxu0 %v4378_v49  ;;  %v4137_v39 = vld [vmem:[%s9528_s2 + $0x590] sm:$0xff]  ;;  %v7312_v49 = vld.sshfl [vmem:[%s9530_s0 + $0x1c] sm:$0x33 pattern:$0x76325410] }
 0x103   :  { %5177 = vmatpush3.msra.mxu1 %v4053_v41  ;;  %5486 = vmatpush3.msra.mxu0 %v4362_v51  ;;  %v4121_v41 = vld [vmem:[%s9528_s2 + $0x510] sm:$0xff]  ;;  %v4135_v51 = vld [vmem:[%s9528_s2 + $0x580] sm:$0xff] }
 0x104   :  { %5178 = vmatprep.subr.mxu1 %v4068_v44  ;;  %5487 = vmatprep.subr.mxu0 %v4377_v53  ;;  %v4136_v44 = vld [vmem:[%s9528_s2 + $0x588] sm:$0xff]  ;;  %v4119_v53 = vld [vmem:[%s9528_s2 + $0x500] sm:$0xff] }
 0x105   :  { %5179 = vmatpush3.msra.mxu1 %v4052_v46  ;;  %5488 = vmatpush3.msra.mxu0 %v4361_v58  ;;  %v4120_v46 = vld [vmem:[%s9528_s2 + $0x508] sm:$0xff]  ;;  %v4217_v58 = vld [vmem:[%s9528_s2 + $0x7f0] sm:$0xff] }
 0x106   :  { %5180 = vmatprep.subr.mxu1 %v4067_v50  ;;  %5489 = vmatprep.subr.mxu0 %v4376_v60  ;;  %v4448_v50 = vld [vmem:[%s9528_s2 + $0xeb8] sm:$0xff]  ;;  %v4201_v60 = vld [vmem:[%s9528_s2 + $0x770] sm:$0xff] }
 0x107   :  { %5181 = vmatpush3.msra.mxu1 %v4051_v52  ;;  %5490 = vmatpush3.msra.mxu0 %v4360_v42  ;;  %v4432_v52 = vld [vmem:[%s9528_s2 + $0xe38] sm:$0xff]  ;;  %v4216_v42 = vld [vmem:[%s9528_s2 + $0x7e8] sm:$0xff] }
 0x108   :  { %667 = vmatmul.mubr.f32.vlgmr.msra.gmra.mxu1 %v6930_v47  ;;  %5220 = vmatprep.subr.mxu1 %v4150_v54  ;;  %v4132_v47 = vld [vmem:[%s9528_s2 + $0x568] sm:$0xff]  ;;  %v4447_v54 = vld [vmem:[%s9528_s2 + $0xeb0] sm:$0xff] }
 0x109   :  { %5221 = vmatpush3.msra.mxu1 %v4134_v56  ;;  %900 = vmatprep.mubr.f32.mxu1 %v833_v55  ;;  %v4218_v55 = vld [vmem:[%s9528_s2 + $0x7f8] sm:$0xff]  ;;  %v1067_v56 = vcombine.high %v7312_v49, %v7312_v49 }
 0x10a   :  { %5222 = vmatprep.subr.mxu1 %v4149_v57  ;;  %5491 = vmatprep.subr.mxu0 %v4375_v62  ;;  %v4202_v57 = vld [vmem:[%s9528_s2 + $0x778] sm:$0xff]  ;;  %v4445_v62 = vld [vmem:[%s9528_s2 + $0xea0] sm:$0xff] }
 0x10b   :  { %5223 = vmatpush3.msra.mxu1 %v4133_v59  ;;  %5492 = vmatpush3.msra.mxu0 %v4359_v0  ;;  %v4431_v59 = vld [vmem:[%s9528_s2 + $0xe30] sm:$0xff]  ;;  %v4429_v0 = vld [vmem:[%s9528_s2 + $0xe20] sm:$0xff] }
 0x10c   :  { %5224 = vmatprep.subr.mxu1 %v4148_v61  ;;  %5493 = vmatprep.subr.mxu0 %v4374_v2  ;;  %v4446_v61 = vld [vmem:[%s9528_s2 + $0xea8] sm:$0xff]  ;;  %v4444_v2 = vld [vmem:[%s9528_s2 + $0xe98] sm:$0xff] }
 0x10d   :  { %5225 = vmatpush3.msra.mxu1 %v4132_v47  ;;  %5494 = vmatpush3.msra.mxu0 %v4358_v5  ;;  %v4430_v47 = vld [vmem:[%s9528_s2 + $0xe28] sm:$0xff]  ;;  %v4198_v5 = vld [vmem:[%s9528_s2 + $0x758] sm:$0xff] }
 0x10e   :  { %5226 = vmatprep.subr.mxu1 %v4147_v63  ;;  %5495 = vmatprep.subr.mxu0 %v4373_v7  ;;  %v4215_v63 = vld [vmem:[%s9528_s2 + $0x7e0] sm:$0xff]  ;;  %v4213_v7 = vld [vmem:[%s9528_s2 + $0x7d0] sm:$0xff] }
 0x10f   :  { %5227 = vmatpush3.msra.mxu1 %v4131_v1  ;;  %5496 = vmatpush3.msra.mxu0 %v4357_v9  ;;  %v4199_v1 = vld [vmem:[%s9528_s2 + $0x760] sm:$0xff]  ;;  %v4197_v9 = vld [vmem:[%s9528_s2 + $0x750] sm:$0xff] }
 0x110   :  { %5228 = vmatprep.subr.mxu1 %v4146_v4  ;;  %1719 = vmatprep.mubr.f32.mxu0 %v1652_v10  ;;  %v4428_v4 = vld [vmem:[%s9528_s2 + $0xe18] sm:$0xff]  ;;  %v4442_v10 = vld [vmem:[%s9528_s2 + $0xe88] sm:$0xff] }
 0x111   :  { %5229 = vmatpush3.msra.mxu1 %v4130_v6  ;;  %1720 = vmatmul.mubr.f32.vlgmr.msra.gmra.mxu0 %v4389_v3  ;;  %v4214_v3 = vld [vmem:[%s9528_s2 + $0x7d8] sm:$0xff]  ;;  %v4443_v6 = vld [vmem:[%s9528_s2 + $0xe90] sm:$0xff] }
 0x112   :  { %5230 = vmatprep.subr.mxu1 %v4145_v8  ;;  %5535 = vmatprep.subr.mxu0 %v4456_v14  ;;  %v4427_v8 = vld [vmem:[%s9528_s2 + $0xe10] sm:$0xff]  ;;  %v4196_v14 = vld [vmem:[%s9528_s2 + $0x748] sm:$0xff] }
 0x113   :  { %5231 = vmatpush3.msra.mxu1 %v4129_v11  ;;  %5536 = vmatpush3.msra.mxu0 %v4440_v16  ;;  %v4457_v11 = vld.sshfl [vmem:[%s9530_s0 + $0x38] sm:$0x33 pattern:$0x76325410]  ;;  %v4211_v16 = vld [vmem:[%s9528_s2 + $0x7c0] sm:$0xff] }
 0x114   :  { %5232 = vmatprep.subr.mxu1 %v4144_v12  ;;  %5537 = vmatprep.subr.mxu0 %v4455_v18  ;;  %v4212_v12 = vld [vmem:[%s9528_s2 + $0x7c8] sm:$0xff]  ;;  %v1886_v18 = vcombine.high %v4457_v11, %v4457_v11 }
 0x115   :  { %5233 = vmatpush3.msra.mxu1 %v4128_v13  ;;  %5538 = vmatpush3.msra.mxu0 %v4439_v20  ;;  %v4426_v13 = vld [vmem:[%s9528_s2 + $0xe08] sm:$0xff]  ;;  %v4210_v20 = vld [vmem:[%s9528_s2 + $0x7b8] sm:$0xff] }
 0x116   :  { %5234 = vmatprep.subr.mxu1 %v4143_v15  ;;  %5539 = vmatprep.subr.mxu0 %v4454_v22  ;;  %v4441_v15 = vld [vmem:[%s9528_s2 + $0xe80] sm:$0xff]  ;;  %v4524_v22 = vld [vmem:[%s9528_s2 + $0x10f8] sm:$0xff] }
 0x117   :  { %5235 = vmatpush3.msra.mxu1 %v4127_v17  ;;  %5540 = vmatpush3.msra.mxu0 %v4438_v24  ;;  %v4425_v17 = vld [vmem:[%s9528_s2 + $0xe00] sm:$0xff]  ;;  %v4508_v24 = vld [vmem:[%s9528_s2 + $0x1078] sm:$0xff] }
 0x118   :  { %5236 = vmatprep.subr.mxu1 %v4142_v19  ;;  %5541 = vmatprep.subr.mxu0 %v4453_v26  ;;  %v4195_v19 = vld [vmem:[%s9528_s2 + $0x740] sm:$0xff]  ;;  %v4523_v26 = vld [vmem:[%s9528_s2 + $0x10f0] sm:$0xff] }
 0x119   :  { %5237 = vmatpush3.msra.mxu1 %v4126_v21  ;;  %5542 = vmatpush3.msra.mxu0 %v4437_v28  ;;  %v4194_v21 = vld [vmem:[%s9528_s2 + $0x738] sm:$0xff]  ;;  %v4507_v28 = vld [vmem:[%s9528_s2 + $0x1070] sm:$0xff] }
 0x11a   :  { %5238 = vmatprep.subr.mxu1 %v4141_v23  ;;  %5543 = vmatprep.subr.mxu0 %v4452_v30  ;;  %v4209_v23 = vld [vmem:[%s9528_s2 + $0x7b0] sm:$0xff]  ;;  %v4522_v30 = vld [vmem:[%s9528_s2 + $0x10e8] sm:$0xff] }
 0x11b   :  { %5239 = vmatpush3.msra.mxu1 %v4125_v25  ;;  %5544 = vmatpush3.msra.mxu0 %v4436_v32  ;;  %v4193_v25 = vld [vmem:[%s9528_s2 + $0x730] sm:$0xff]  ;;  %v4506_v32 = vld [vmem:[%s9528_s2 + $0x1068] sm:$0xff] }
 0x11c   :  { %5240 = vmatprep.subr.mxu1 %v4140_v27  ;;  %5545 = vmatprep.subr.mxu0 %v4451_v34  ;;  %v4208_v27 = vld [vmem:[%s9528_s2 + $0x7a8] sm:$0xff]  ;;  %v4521_v34 = vld [vmem:[%s9528_s2 + $0x10e0] sm:$0xff] }
 0x11d   :  { %5241 = vmatpush3.msra.mxu1 %v4124_v29  ;;  %5546 = vmatpush3.msra.mxu0 %v4435_v36  ;;  %v4192_v29 = vld [vmem:[%s9528_s2 + $0x728] sm:$0xff]  ;;  %v4505_v36 = vld [vmem:[%s9528_s2 + $0x1060] sm:$0xff] }
 0x11e   :  { %5242 = vmatprep.subr.mxu1 %v4139_v31  ;;  %5547 = vmatprep.subr.mxu0 %v4450_v38  ;;  %v4207_v31 = vld [vmem:[%s9528_s2 + $0x7a0] sm:$0xff]  ;;  %v4520_v38 = vld [vmem:[%s9528_s2 + $0x10d8] sm:$0xff] }
 0x11f   :  { %5243 = vmatpush3.msra.mxu1 %v4123_v33  ;;  %5548 = vmatpush3.msra.mxu0 %v4434_v40  ;;  %v4191_v33 = vld [vmem:[%s9528_s2 + $0x720] sm:$0xff]  ;;  %v4504_v40 = vld [vmem:[%s9528_s2 + $0x1058] sm:$0xff] }
 0x120   :  { %5244 = vmatprep.subr.mxu1 %v4138_v35  ;;  %5549 = vmatprep.subr.mxu0 %v4449_v43  ;;  %v4206_v35 = vld [vmem:[%s9528_s2 + $0x798] sm:$0xff]  ;;  %v4519_v43 = vld [vmem:[%s9528_s2 + $0x10d0] sm:$0xff] }
 0x121   :  { %5245 = vmatpush3.msra.mxu1 %v4122_v37  ;;  %5550 = vmatpush3.msra.mxu0 %v4433_v45  ;;  %v4190_v37 = vld [vmem:[%s9528_s2 + $0x718] sm:$0xff]  ;;  %v4503_v45 = vld [vmem:[%s9528_s2 + $0x1050] sm:$0xff] }
 0x122   :  { %5246 = vmatprep.subr.mxu1 %v4137_v39  ;;  %5551 = vmatprep.subr.mxu0 %v4448_v50  ;;  %v4205_v39 = vld [vmem:[%s9528_s2 + $0x790] sm:$0xff]  ;;  %v7503_v50 = vld.sshfl [vmem:[%s9530_s0 + $0x24] sm:$0x33 pattern:$0x76325410] }
 0x123   :  { %5247 = vmatpush3.msra.mxu1 %v4121_v41  ;;  %5552 = vmatpush3.msra.mxu0 %v4432_v52  ;;  %v4189_v41 = vld [vmem:[%s9528_s2 + $0x710] sm:$0xff]  ;;  %v4203_v52 = vld [vmem:[%s9528_s2 + $0x780] sm:$0xff] }
 0x124   :  { %5248 = vmatprep.subr.mxu1 %v4136_v44  ;;  %5553 = vmatprep.subr.mxu0 %v4447_v54  ;;  %v4204_v44 = vld [vmem:[%s9528_s2 + $0x788] sm:$0xff]  ;;  %v4187_v54 = vld [vmem:[%s9528_s2 + $0x700] sm:$0xff] }
 0x125   :  { %5249 = vmatpush3.msra.mxu1 %v4120_v46  ;;  %5554 = vmatpush3.msra.mxu0 %v4431_v59  ;;  %v4188_v46 = vld [vmem:[%s9528_s2 + $0x708] sm:$0xff]  ;;  %v4285_v59 = vld [vmem:[%s9528_s2 + $0x9f0] sm:$0xff] }
 0x126   :  { %5250 = vmatprep.subr.mxu1 %v4135_v51  ;;  %5555 = vmatprep.subr.mxu0 %v4446_v61  ;;  %v4518_v51 = vld [vmem:[%s9528_s2 + $0x10c8] sm:$0xff]  ;;  %v4269_v61 = vld [vmem:[%s9528_s2 + $0x970] sm:$0xff] }
 0x127   :  { %5251 = vmatpush3.msra.mxu1 %v4119_v53  ;;  %5556 = vmatpush3.msra.mxu0 %v4430_v47  ;;  %v4502_v53 = vld [vmem:[%s9528_s2 + $0x1048] sm:$0xff] }
 0x128   :  { %901 = vmatmul.mubr.f32.vlgmr.msra.gmra.mxu1 %v7121_v48  ;;  %5290 = vmatprep.subr.mxu1 %v4218_v55  ;;  %v4200_v48 = vld [vmem:[%s9528_s2 + $0x768] sm:$0xff]  ;;  %v4517_v55 = vld [vmem:[%s9528_s2 + $0x10c0] sm:$0xff] }
 0x129   :  { %5291 = vmatpush3.msra.mxu1 %v4202_v57  ;;  %1134 = vmatprep.mubr.f32.mxu1 %v1067_v56  ;;  %v4286_v56 = vld [vmem:[%s9528_s2 + $0x9f8] sm:$0xff]  ;;  %v1301_v57 = vcombine.high %v7503_v50, %v7503_v50  ;;  %v4284_v47 = vld [vmem:[%s9528_s2 + $0x9e8] sm:$0xff] }
 0x12a   :  { %5292 = vmatprep.subr.mxu1 %v4217_v58  ;;  %5557 = vmatprep.subr.mxu0 %v4445_v62  ;;  %v4270_v58 = vld [vmem:[%s9528_s2 + $0x978] sm:$0xff]  ;;  %v4515_v62 = vld [vmem:[%s9528_s2 + $0x10b0] sm:$0xff] }
 0x12b   :  { %5293 = vmatpush3.msra.mxu1 %v4201_v60  ;;  %5558 = vmatpush3.msra.mxu0 %v4429_v0  ;;  %v4501_v60 = vld [vmem:[%s9528_s2 + $0x1040] sm:$0xff]  ;;  %v4499_v0 = vld [vmem:[%s9528_s2 + $0x1030] sm:$0xff] }
 0x12c   :  { %5294 = vmatprep.subr.mxu1 %v4216_v42  ;;  %5559 = vmatprep.subr.mxu0 %v4444_v2  ;;  %v4516_v42 = vld [vmem:[%s9528_s2 + $0x10b8] sm:$0xff]  ;;  %v4514_v2 = vld [vmem:[%s9528_s2 + $0x10a8] sm:$0xff] }
 0x12d   :  { %5295 = vmatpush3.msra.mxu1 %v4200_v48  ;;  %5560 = vmatpush3.msra.mxu0 %v4428_v4  ;;  %v4500_v48 = vld [vmem:[%s9528_s2 + $0x1038] sm:$0xff]  ;;  %v4498_v4 = vld [vmem:[%s9528_s2 + $0x1028] sm:$0xff] }
 0x12e   :  { %5296 = vmatprep.subr.mxu1 %v4215_v63  ;;  %5561 = vmatprep.subr.mxu0 %v4443_v6  ;;  %v4283_v63 = vld [vmem:[%s9528_s2 + $0x9e0] sm:$0xff] }
 0x12f   :  { %5297 = vmatpush3.msra.mxu1 %v4199_v1  ;;  %5562 = vmatpush3.msra.mxu0 %v4427_v8  ;;  %v4267_v1 = vld [vmem:[%s9528_s2 + $0x960] sm:$0xff] }
 0x130   :  { %5298 = vmatprep.subr.mxu1 %v4214_v3  ;;  %5563 = vmatprep.subr.mxu0 %v4442_v10  ;;  %v4282_v3 = vld [vmem:[%s9528_s2 + $0x9d8] sm:$0xff]  ;;  %v4513_v6 = vld [vmem:[%s9528_s2 + $0x10a0] sm:$0xff] }
 0x131   :  { %5299 = vmatpush3.msra.mxu1 %v4198_v5  ;;  %5564 = vmatpush3.msra.mxu0 %v4426_v13  ;;  %v4266_v5 = vld [vmem:[%s9528_s2 + $0x958] sm:$0xff]  ;;  %v4497_v8 = vld [vmem:[%s9528_s2 + $0x1020] sm:$0xff]  ;;  %v4264_v13 = vld [vmem:[%s9528_s2 + $0x948] sm:$0xff] }
 0x132   :  { %5300 = vmatprep.subr.mxu1 %v4213_v7  ;;  %5565 = vmatprep.subr.mxu0 %v4441_v15  ;;  %v4281_v7 = vld [vmem:[%s9528_s2 + $0x9d0] sm:$0xff]  ;;  %v4512_v10 = vld [vmem:[%s9528_s2 + $0x1098] sm:$0xff]  ;;  %v4279_v15 = vld [vmem:[%s9528_s2 + $0x9c0] sm:$0xff] }
 0x133   :  { %5301 = vmatpush3.msra.mxu1 %v4197_v9  ;;  %5566 = vmatpush3.msra.mxu0 %v4425_v17  ;;  %v4265_v9 = vld [vmem:[%s9528_s2 + $0x950] sm:$0xff]  ;;  %v4263_v17 = vld [vmem:[%s9528_s2 + $0x940] sm:$0xff] }
 0x134   :  { %5302 = vmatprep.subr.mxu1 %v4212_v12  ;;  %1953 = vmatprep.mubr.f32.mxu0 %v1886_v18  ;;  %v4496_v12 = vld [vmem:[%s9528_s2 + $0x1018] sm:$0xff]  ;;  %v4510_v18 = vld [vmem:[%s9528_s2 + $0x1088] sm:$0xff] }
 0x135   :  { %5303 = vmatpush3.msra.mxu1 %v4196_v14  ;;  %1954 = vmatmul.mubr.f32.vlgmr.msra.gmra.mxu0 %v4457_v11  ;;  %v4280_v11 = vld [vmem:[%s9528_s2 + $0x9c8] sm:$0xff]  ;;  %v4511_v14 = vld [vmem:[%s9528_s2 + $0x1090] sm:$0xff] }
 0x136   :  { %5304 = vmatprep.subr.mxu1 %v4211_v16  ;;  %5605 = vmatprep.subr.mxu0 %v4524_v22  ;;  %v4495_v16 = vld [vmem:[%s9528_s2 + $0x1010] sm:$0xff]  ;;  %v4262_v22 = vld [vmem:[%s9528_s2 + $0x938] sm:$0xff] }
 0x137   :  { %5305 = vmatpush3.msra.mxu1 %v4195_v19  ;;  %5606 = vmatpush3.msra.mxu0 %v4508_v24  ;;  %v4525_v19 = vld.sshfl [vmem:[%s9530_s0 + $0x40] sm:$0x33 pattern:$0x76325410]  ;;  %v4277_v24 = vld [vmem:[%s9528_s2 + $0x9b0] sm:$0xff] }
 0x138   :  { %5306 = vmatprep.subr.mxu1 %v4210_v20  ;;  %5607 = vmatprep.subr.mxu0 %v4523_v26  ;;  %v4278_v20 = vld [vmem:[%s9528_s2 + $0x9b8] sm:$0xff]  ;;  %v2120_v26 = vcombine.high %v4525_v19, %v4525_v19 }
 0x139   :  { %5307 = vmatpush3.msra.mxu1 %v4194_v21  ;;  %5608 = vmatpush3.msra.mxu0 %v4507_v28  ;;  %v4494_v21 = vld [vmem:[%s9528_s2 + $0x1008] sm:$0xff] }
 0x13a   :  { %5308 = vmatprep.subr.mxu1 %v4209_v23  ;;  %5609 = vmatprep.subr.mxu0 %v4522_v30  ;;  %v4509_v23 = vld [vmem:[%s9528_s2 + $0x1080] sm:$0xff]  ;;  %v4276_v28 = vld [vmem:[%s9528_s2 + $0x9a8] sm:$0xff]  ;;  %v4592_v30 = vld [vmem:[%s9528_s2 + $0x12f8] sm:$0xff] }
 0x13b   :  { %5309 = vmatpush3.msra.mxu1 %v4193_v25  ;;  %5610 = vmatpush3.msra.mxu0 %v4506_v32  ;;  %v4493_v25 = vld [vmem:[%s9528_s2 + $0x1000] sm:$0xff]  ;;  %v4576_v32 = vld [vmem:[%s9528_s2 + $0x1278] sm:$0xff] }
 0x13c   :  { %5310 = vmatprep.subr.mxu1 %v4208_v27  ;;  %5611 = vmatprep.subr.mxu0 %v4521_v34  ;;  %v4261_v27 = vld [vmem:[%s9528_s2 + $0x930] sm:$0xff] }
 0x13d   :  { %5311 = vmatpush3.msra.mxu1 %v4192_v29  ;;  %5612 = vmatpush3.msra.mxu0 %v4505_v36  ;;  %v4260_v29 = vld [vmem:[%s9528_s2 + $0x928] sm:$0xff]  ;;  %v4591_v34 = vld [vmem:[%s9528_s2 + $0x12f0] sm:$0xff] }
 0x13e   :  { %5312 = vmatprep.subr.mxu1 %v4207_v31  ;;  %5613 = vmatprep.subr.mxu0 %v4520_v38  ;;  %v4275_v31 = vld [vmem:[%s9528_s2 + $0x9a0] sm:$0xff]  ;;  %v4575_v36 = vld [vmem:[%s9528_s2 + $0x1270] sm:$0xff]  ;;  %v4590_v38 = vld [vmem:[%s9528_s2 + $0x12e8] sm:$0xff] }
 0x13f   :  { %5313 = vmatpush3.msra.mxu1 %v4191_v33  ;;  %5614 = vmatpush3.msra.mxu0 %v4504_v40  ;;  %v4259_v33 = vld [vmem:[%s9528_s2 + $0x920] sm:$0xff]  ;;  %v4574_v40 = vld [vmem:[%s9528_s2 + $0x1268] sm:$0xff] }
 0x140   :  { %5314 = vmatprep.subr.mxu1 %v4206_v35  ;;  %5615 = vmatprep.subr.mxu0 %v4519_v43  ;;  %v4274_v35 = vld [vmem:[%s9528_s2 + $0x998] sm:$0xff]  ;;  %v4589_v43 = vld [vmem:[%s9528_s2 + $0x12e0] sm:$0xff] }
 0x141   :  { %5315 = vmatpush3.msra.mxu1 %v4190_v37  ;;  %5616 = vmatpush3.msra.mxu0 %v4503_v45  ;;  %v4258_v37 = vld [vmem:[%s9528_s2 + $0x918] sm:$0xff]  ;;  %v4573_v45 = vld [vmem:[%s9528_s2 + $0x1260] sm:$0xff] }
 0x142   :  { %5316 = vmatprep.subr.mxu1 %v4205_v39  ;;  %5617 = vmatprep.subr.mxu0 %v4518_v51  ;;  %v4273_v39 = vld [vmem:[%s9528_s2 + $0x990] sm:$0xff]  ;;  %v7694_v51 = vld.sshfl [vmem:[%s9530_s0 + $0x2c] sm:$0x33 pattern:$0x76325410] }
 0x143   :  { %5317 = vmatpush3.msra.mxu1 %v4189_v41  ;;  %5618 = vmatpush3.msra.mxu0 %v4502_v53  ;;  %v4257_v41 = vld [vmem:[%s9528_s2 + $0x910] sm:$0xff]  ;;  %v4271_v53 = vld [vmem:[%s9528_s2 + $0x980] sm:$0xff] }
 0x144   :  { %5318 = vmatprep.subr.mxu1 %v4204_v44  ;;  %5619 = vmatprep.subr.mxu0 %v4517_v55  ;;  %v4272_v44 = vld [vmem:[%s9528_s2 + $0x988] sm:$0xff]  ;;  %v4255_v55 = vld [vmem:[%s9528_s2 + $0x900] sm:$0xff] }
 0x145   :  { %5319 = vmatpush3.msra.mxu1 %v4188_v46  ;;  %5620 = vmatpush3.msra.mxu0 %v4501_v60  ;;  %v4256_v46 = vld [vmem:[%s9528_s2 + $0x908] sm:$0xff]  ;;  %v4353_v60 = vld [vmem:[%s9528_s2 + $0xbf0] sm:$0xff] }
 0x146   :  { %5320 = vmatprep.subr.mxu1 %v4203_v52  ;;  %5621 = vmatprep.subr.mxu0 %v4516_v42  ;;  %v4588_v52 = vld [vmem:[%s9528_s2 + $0x12d8] sm:$0xff]  ;;  %v4337_v42 = vld [vmem:[%s9528_s2 + $0xb70] sm:$0xff] }
 0x147   :  { %5321 = vmatpush3.msra.mxu1 %v4187_v54  ;;  %5622 = vmatpush3.msra.mxu0 %v4500_v48  ;;  %v4572_v54 = vld [vmem:[%s9528_s2 + $0x1258] sm:$0xff]  ;;  %v4352_v48 = vld [vmem:[%s9528_s2 + $0xbe8] sm:$0xff] }
 0x148   :  { %1135 = vmatmul.mubr.f32.vlgmr.msra.gmra.mxu1 %v7312_v49  ;;  %5360 = vmatprep.subr.mxu1 %v4286_v56  ;;  %v4268_v49 = vld [vmem:[%s9528_s2 + $0x968] sm:$0xff]  ;;  %v4587_v56 = vld [vmem:[%s9528_s2 + $0x12d0] sm:$0xff] }
 0x149   :  { %5361 = vmatpush3.msra.mxu1 %v4270_v58  ;;  %1368 = vmatprep.mubr.f32.mxu1 %v1301_v57  ;;  %v4354_v57 = vld [vmem:[%s9528_s2 + $0xbf8] sm:$0xff]  ;;  %v1535_v58 = vcombine.high %v7694_v51, %v7694_v51 }
 0x14a   :  { %5362 = vmatprep.subr.mxu1 %v4285_v59  ;;  %5623 = vmatprep.subr.mxu0 %v4515_v62  ;;  %v4338_v59 = vld [vmem:[%s9528_s2 + $0xb78] sm:$0xff]  ;;  %v4585_v62 = vld [vmem:[%s9528_s2 + $0x12c0] sm:$0xff] }
 0x14b   :  { %5363 = vmatpush3.msra.mxu1 %v4269_v61  ;;  %5624 = vmatpush3.msra.mxu0 %v4499_v0  ;;  %v4571_v61 = vld [vmem:[%s9528_s2 + $0x1250] sm:$0xff]  ;;  %v4569_v0 = vld [vmem:[%s9528_s2 + $0x1240] sm:$0xff] }
 0x14c   :  { %5364 = vmatprep.subr.mxu1 %v4284_v47  ;;  %5625 = vmatprep.subr.mxu0 %v4514_v2  ;;  %v4586_v47 = vld [vmem:[%s9528_s2 + $0x12c8] sm:$0xff]  ;;  %v4584_v2 = vld [vmem:[%s9528_s2 + $0x12b8] sm:$0xff] }
 0x14d   :  { %5365 = vmatpush3.msra.mxu1 %v4268_v49  ;;  %5626 = vmatpush3.msra.mxu0 %v4498_v4  ;;  %v4570_v49 = vld [vmem:[%s9528_s2 + $0x1248] sm:$0xff]  ;;  %v4568_v4 = vld [vmem:[%s9528_s2 + $0x1238] sm:$0xff] }
 0x14e   :  { %5366 = vmatprep.subr.mxu1 %v4283_v63  ;;  %5627 = vmatprep.subr.mxu0 %v4513_v6  ;;  %v4351_v63 = vld [vmem:[%s9528_s2 + $0xbe0] sm:$0xff]  ;;  %v4583_v6 = vld [vmem:[%s9528_s2 + $0x12b0] sm:$0xff] }
 0x14f   :  { %5367 = vmatpush3.msra.mxu1 %v4267_v1  ;;  %5628 = vmatpush3.msra.mxu0 %v4497_v8  ;;  %v4335_v1 = vld [vmem:[%s9528_s2 + $0xb60] sm:$0xff]  ;;  %v4567_v8 = vld [vmem:[%s9528_s2 + $0x1230] sm:$0xff] }
 0x150   :  { %5368 = vmatprep.subr.mxu1 %v4282_v3  ;;  %5629 = vmatprep.subr.mxu0 %v4512_v10  ;;  %v4350_v3 = vld [vmem:[%s9528_s2 + $0xbd8] sm:$0xff]  ;;  %v4582_v10 = vld [vmem:[%s9528_s2 + $0x12a8] sm:$0xff] }
 0x151   :  { %5369 = vmatpush3.msra.mxu1 %v4266_v5  ;;  %5630 = vmatpush3.msra.mxu0 %v4496_v12  ;;  %v4334_v5 = vld [vmem:[%s9528_s2 + $0xb58] sm:$0xff]  ;;  %v4566_v12 = vld [vmem:[%s9528_s2 + $0x1228] sm:$0xff] }
 0x152   :  { %5370 = vmatprep.subr.mxu1 %v4281_v7  ;;  %5631 = vmatprep.subr.mxu0 %v4511_v14  ;;  %v4349_v7 = vld [vmem:[%s9528_s2 + $0xbd0] sm:$0xff]  ;;  %v4581_v14 = vld [vmem:[%s9528_s2 + $0x12a0] sm:$0xff] }
 0x153   :  { %5371 = vmatpush3.msra.mxu1 %v4265_v9  ;;  %5632 = vmatpush3.msra.mxu0 %v4495_v16  ;;  %v4333_v9 = vld [vmem:[%s9528_s2 + $0xb50] sm:$0xff]  ;;  %v4565_v16 = vld [vmem:[%s9528_s2 + $0x1220] sm:$0xff] }
 0x154   :  { %5372 = vmatprep.subr.mxu1 %v4280_v11  ;;  %5633 = vmatprep.subr.mxu0 %v4510_v18  ;;  %v4348_v11 = vld [vmem:[%s9528_s2 + $0xbc8] sm:$0xff]  ;;  %v4580_v18 = vld [vmem:[%s9528_s2 + $0x1298] sm:$0xff] }
 0x155   :  { %5373 = vmatpush3.msra.mxu1 %v4264_v13  ;;  %5634 = vmatpush3.msra.mxu0 %v4494_v21  ;;  %v4332_v13 = vld [vmem:[%s9528_s2 + $0xb48] sm:$0xff]  ;;  %v4330_v21 = vld [vmem:[%s9528_s2 + $0xb38] sm:$0xff] }
 0x156   :  { %5374 = vmatprep.subr.mxu1 %v4279_v15  ;;  %5635 = vmatprep.subr.mxu0 %v4509_v23  ;;  %v4347_v15 = vld [vmem:[%s9528_s2 + $0xbc0] sm:$0xff]  ;;  %v4345_v23 = vld [vmem:[%s9528_s2 + $0xbb0] sm:$0xff] }
 0x157   :  { %5375 = vmatpush3.msra.mxu1 %v4263_v17  ;;  %5636 = vmatpush3.msra.mxu0 %v4493_v25  ;;  %v4331_v17 = vld [vmem:[%s9528_s2 + $0xb40] sm:$0xff]  ;;  %v4329_v25 = vld [vmem:[%s9528_s2 + $0xb30] sm:$0xff] }
 0x158   :  { %5376 = vmatprep.subr.mxu1 %v4278_v20  ;;  %2187 = vmatprep.mubr.f32.mxu0 %v2120_v26  ;;  %v4564_v20 = vld [vmem:[%s9528_s2 + $0x1218] sm:$0xff]  ;;  %v4578_v26 = vld [vmem:[%s9528_s2 + $0x1288] sm:$0xff] }
 0x159   :  { %5377 = vmatpush3.msra.mxu1 %v4262_v22  ;;  %2188 = vmatmul.mubr.f32.vlgmr.msra.gmra.mxu0 %v4525_v19  ;;  %v4346_v19 = vld [vmem:[%s9528_s2 + $0xbb8] sm:$0xff]  ;;  %v4579_v22 = vld [vmem:[%s9528_s2 + $0x1290] sm:$0xff] }
 0x15a   :  { %5378 = vmatprep.subr.mxu1 %v4277_v24  ;;  %5675 = vmatprep.subr.mxu0 %v4592_v30  ;;  %v4563_v24 = vld [vmem:[%s9528_s2 + $0x1210] sm:$0xff]  ;;  %v4328_v30 = vld [vmem:[%s9528_s2 + $0xb28] sm:$0xff] }
 0x15b   :  { %5379 = vmatpush3.msra.mxu1 %v4261_v27  ;;  %5676 = vmatpush3.msra.mxu0 %v4576_v32  ;;  %v4593_v27 = vld.sshfl [vmem:[%s9530_s0 + $0x48] sm:$0x33 pattern:$0x76325410]  ;;  %v4343_v32 = vld [vmem:[%s9528_s2 + $0xba0] sm:$0xff] }
 0x15c   :  { %5380 = vmatprep.subr.mxu1 %v4276_v28  ;;  %5677 = vmatprep.subr.mxu0 %v4591_v34  ;;  %v4344_v28 = vld [vmem:[%s9528_s2 + $0xba8] sm:$0xff]  ;;  %v2354_v34 = vcombine.high %v4593_v27, %v4593_v27 }
 0x15d   :  { %5381 = vmatpush3.msra.mxu1 %v4260_v29  ;;  %5678 = vmatpush3.msra.mxu0 %v4575_v36  ;;  %v4562_v29 = vld [vmem:[%s9528_s2 + $0x1208] sm:$0xff]  ;;  %v4342_v36 = vld [vmem:[%s9528_s2 + $0xb98] sm:$0xff] }
 0x15e   :  { %5382 = vmatprep.subr.mxu1 %v4275_v31  ;;  %5679 = vmatprep.subr.mxu0 %v4590_v38  ;;  %v4577_v31 = vld [vmem:[%s9528_s2 + $0x1280] sm:$0xff]  ;;  %v4660_v38 = vld [vmem:[%s9528_s2 + $0x14f8] sm:$0xff] }
 0x15f   :  { %5383 = vmatpush3.msra.mxu1 %v4259_v33  ;;  %5680 = vmatpush3.msra.mxu0 %v4574_v40  ;;  %v4561_v33 = vld [vmem:[%s9528_s2 + $0x1200] sm:$0xff]  ;;  %v4644_v40 = vld [vmem:[%s9528_s2 + $0x1478] sm:$0xff] }
 0x160   :  { %5384 = vmatprep.subr.mxu1 %v4274_v35  ;;  %5681 = vmatprep.subr.mxu0 %v4589_v43  ;;  %v4327_v35 = vld [vmem:[%s9528_s2 + $0xb20] sm:$0xff]  ;;  %v4659_v43 = vld [vmem:[%s9528_s2 + $0x14f0] sm:$0xff] }
 0x161   :  { %5385 = vmatpush3.msra.mxu1 %v4258_v37  ;;  %5682 = vmatpush3.msra.mxu0 %v4573_v45  ;;  %v4326_v37 = vld [vmem:[%s9528_s2 + $0xb18] sm:$0xff]  ;;  %v4643_v45 = vld [vmem:[%s9528_s2 + $0x1470] sm:$0xff] }
 0x162   :  { %5386 = vmatprep.subr.mxu1 %v4273_v39  ;;  %5683 = vmatprep.subr.mxu0 %v4588_v52  ;;  %v4341_v39 = vld [vmem:[%s9528_s2 + $0xb90] sm:$0xff] }
 0x163   :  { %5387 = vmatpush3.msra.mxu1 %v4257_v41  ;;  %5684 = vmatpush3.msra.mxu0 %v4572_v54  ;;  %v4325_v41 = vld [vmem:[%s9528_s2 + $0xb10] sm:$0xff]  ;;  %v4339_v54 = vld [vmem:[%s9528_s2 + $0xb80] sm:$0xff] }
 0x164   :  { %5388 = vmatprep.subr.mxu1 %v4272_v44  ;;  %5685 = vmatprep.subr.mxu0 %v4587_v56  ;;  %v4340_v44 = vld [vmem:[%s9528_s2 + $0xb88] sm:$0xff]  ;;  %v7885_v52 = vld.sshfl [vmem:[%s9530_s0 + $0x34] sm:$0x33 pattern:$0x76325410]  ;;  %v4323_v56 = vld [vmem:[%s9528_s2 + $0xb00] sm:$0xff] }
 0x165   :  { %5389 = vmatpush3.msra.mxu1 %v4256_v46  ;;  %5686 = vmatpush3.msra.mxu0 %v4571_v61  ;;  %v4324_v46 = vld [vmem:[%s9528_s2 + $0xb08] sm:$0xff]  ;;  %v4421_v61 = vld [vmem:[%s9528_s2 + $0xdf0] sm:$0xff] }
 0x166   :  { %5390 = vmatprep.subr.mxu1 %v4271_v53  ;;  %5687 = vmatprep.subr.mxu0 %v4586_v47  ;;  %v4658_v53 = vld [vmem:[%s9528_s2 + $0x14e8] sm:$0xff] }
 0x167   :  { %5391 = vmatpush3.msra.mxu1 %v4255_v55  ;;  %5688 = vmatpush3.msra.mxu0 %v4570_v49  ;;  %v4642_v55 = vld [vmem:[%s9528_s2 + $0x1468] sm:$0xff]  ;;  %v4656_v49 = vld [vmem:[%s9528_s2 + $0x14d8] sm:$0xff] }
 0x168   :  { %1369 = vmatmul.mubr.f32.vlgmr.msra.gmra.mxu1 %v7503_v50  ;;  %5430 = vmatprep.subr.mxu1 %v4354_v57  ;;  %v4336_v50 = vld [vmem:[%s9528_s2 + $0xb68] sm:$0xff]  ;;  %v4657_v57 = vld [vmem:[%s9528_s2 + $0x14e0] sm:$0xff] }
 0x169   :  { %5431 = vmatpush3.msra.mxu1 %v4338_v59  ;;  %1602 = vmatprep.mubr.f32.mxu1 %v1535_v58  ;;  %v4422_v58 = vld [vmem:[%s9528_s2 + $0xdf8] sm:$0xff]  ;;  %v1769_v59 = vcombine.high %v7885_v52, %v7885_v52 }
 0x16a   :  { %5432 = vmatprep.subr.mxu1 %v4353_v60  ;;  %5689 = vmatprep.subr.mxu0 %v4585_v62  ;;  %v4406_v60 = vld [vmem:[%s9528_s2 + $0xd78] sm:$0xff] }
 0x16b   :  { %5433 = vmatpush3.msra.mxu1 %v4337_v42  ;;  %5690 = vmatpush3.msra.mxu0 %v4569_v0  ;;  %v4641_v42 = vld [vmem:[%s9528_s2 + $0x1460] sm:$0xff]  ;;  %v4655_v0 = vld [vmem:[%s9528_s2 + $0x14d0] sm:$0xff] }
 0x16c   :  { %5434 = vmatprep.subr.mxu1 %v4352_v48  ;;  %5691 = vmatprep.subr.mxu0 %v4584_v2  ;;  %v4405_v48 = vld [vmem:[%s9528_s2 + $0xd70] sm:$0xff] }
 0x16d   :  { %5435 = vmatpush3.msra.mxu1 %v4336_v50  ;;  %5692 = vmatpush3.msra.mxu0 %v4568_v4  ;;  %v4420_v50 = vld [vmem:[%s9528_s2 + $0xde8] sm:$0xff]  ;;  %v4639_v2 = vld [vmem:[%s9528_s2 + $0x1450] sm:$0xff] }
 0x16e   :  { %5436 = vmatprep.subr.mxu1 %v4351_v63  ;;  %5693 = vmatprep.subr.mxu0 %v4583_v6  ;;  %v4404_v63 = vld [vmem:[%s9528_s2 + $0xd68] sm:$0xff] }
 0x16f   :  { %5437 = vmatpush3.msra.mxu1 %v4335_v1  ;;  %5694 = vmatpush3.msra.mxu0 %v4567_v8  ;;  %v4419_v1 = vld [vmem:[%s9528_s2 + $0xde0] sm:$0xff]  ;;  %v4654_v4 = vld [vmem:[%s9528_s2 + $0x14c8] sm:$0xff] }
 0x170   :  { %5438 = vmatprep.subr.mxu1 %v4350_v3  ;;  %5695 = vmatprep.subr.mxu0 %v4582_v10  ;;  %v4403_v3 = vld [vmem:[%s9528_s2 + $0xd60] sm:$0xff]  ;;  %v4638_v6 = vld [vmem:[%s9528_s2 + $0x1448] sm:$0xff] }
 0x171   :  { %5439 = vmatpush3.msra.mxu1 %v4334_v5  ;;  %5696 = vmatpush3.msra.mxu0 %v4566_v12  ;;  %v4418_v5 = vld [vmem:[%s9528_s2 + $0xdd8] sm:$0xff]  ;;  %v4653_v8 = vld [vmem:[%s9528_s2 + $0x14c0] sm:$0xff] }
 0x172   :  { %5440 = vmatprep.subr.mxu1 %v4349_v7  ;;  %5697 = vmatprep.subr.mxu0 %v4581_v14  ;;  %v4402_v7 = vld [vmem:[%s9528_s2 + $0xd58] sm:$0xff]  ;;  %v4637_v10 = vld [vmem:[%s9528_s2 + $0x1440] sm:$0xff] }
 0x173   :  { %5441 = vmatpush3.msra.mxu1 %v4333_v9  ;;  %5698 = vmatpush3.msra.mxu0 %v4565_v16  ;;  %v4417_v9 = vld [vmem:[%s9528_s2 + $0xdd0] sm:$0xff]  ;;  %v4652_v12 = vld [vmem:[%s9528_s2 + $0x14b8] sm:$0xff] }
 0x174   :  { %5442 = vmatprep.subr.mxu1 %v4348_v11  ;;  %5699 = vmatprep.subr.mxu0 %v4580_v18  ;;  %v4401_v11 = vld [vmem:[%s9528_s2 + $0xd50] sm:$0xff]  ;;  %v4636_v14 = vld [vmem:[%s9528_s2 + $0x1438] sm:$0xff] }
 0x175   :  { %5443 = vmatpush3.msra.mxu1 %v4332_v13  ;;  %5700 = vmatpush3.msra.mxu0 %v4564_v20  ;;  %v4416_v13 = vld [vmem:[%s9528_s2 + $0xdc8] sm:$0xff]  ;;  %v4651_v16 = vld [vmem:[%s9528_s2 + $0x14b0] sm:$0xff] }
 0x176   :  { %5444 = vmatprep.subr.mxu1 %v4347_v15  ;;  %5701 = vmatprep.subr.mxu0 %v4579_v22  ;;  %v4400_v15 = vld [vmem:[%s9528_s2 + $0xd48] sm:$0xff]  ;;  %v4635_v18 = vld [vmem:[%s9528_s2 + $0x1430] sm:$0xff] }
 0x177   :  { %5445 = vmatpush3.msra.mxu1 %v4331_v17  ;;  %5702 = vmatpush3.msra.mxu0 %v4563_v24  ;;  %v4415_v17 = vld [vmem:[%s9528_s2 + $0xdc0] sm:$0xff]  ;;  %v4650_v20 = vld [vmem:[%s9528_s2 + $0x14a8] sm:$0xff] }
 0x178   :  { %5446 = vmatprep.subr.mxu1 %v4346_v19  ;;  %5703 = vmatprep.subr.mxu0 %v4578_v26  ;;  %v4399_v19 = vld [vmem:[%s9528_s2 + $0xd40] sm:$0xff]  ;;  %v4634_v22 = vld [vmem:[%s9528_s2 + $0x1428] sm:$0xff] }
 0x179   :  { %5447 = vmatpush3.msra.mxu1 %v4330_v21  ;;  %5704 = vmatpush3.msra.mxu0 %v4562_v29  ;;  %v4414_v21 = vld [vmem:[%s9528_s2 + $0xdb8] sm:$0xff]  ;;  %v4649_v24 = vld [vmem:[%s9528_s2 + $0x14a0] sm:$0xff]  ;;  %v4412_v29 = vld [vmem:[%s9528_s2 + $0xda8] sm:$0xff] }
 0x17a   :  { %5448 = vmatprep.subr.mxu1 %v4345_v23  ;;  %5705 = vmatprep.subr.mxu0 %v4577_v31  ;;  %v4398_v23 = vld [vmem:[%s9528_s2 + $0xd38] sm:$0xff]  ;;  %v4633_v26 = vld [vmem:[%s9528_s2 + $0x1420] sm:$0xff]  ;;  %v4396_v31 = vld [vmem:[%s9528_s2 + $0xd28] sm:$0xff] }
 0x17b   :  { %5449 = vmatpush3.msra.mxu1 %v4329_v25  ;;  %5706 = vmatpush3.msra.mxu0 %v4561_v33  ;;  %v4413_v25 = vld [vmem:[%s9528_s2 + $0xdb0] sm:$0xff]  ;;  %v4411_v33 = vld [vmem:[%s9528_s2 + $0xda0] sm:$0xff] }
 0x17c   :  { %5450 = vmatprep.subr.mxu1 %v4344_v28  ;;  %2421 = vmatprep.mubr.f32.mxu0 %v2354_v34  ;;  %v4648_v28 = vld [vmem:[%s9528_s2 + $0x1498] sm:$0xff]  ;;  %v4631_v34 = vld [vmem:[%s9528_s2 + $0x1410] sm:$0xff] }
 0x17d   :  { %5451 = vmatpush3.msra.mxu1 %v4328_v30  ;;  %2422 = vmatmul.mubr.f32.vlgmr.msra.gmra.mxu0 %v4593_v27  ;;  %v4397_v27 = vld [vmem:[%s9528_s2 + $0xd30] sm:$0xff]  ;;  %v4632_v30 = vld [vmem:[%s9528_s2 + $0x1418] sm:$0xff] }
 0x17e   :  { %5452 = vmatprep.subr.mxu1 %v4343_v32  ;;  %5745 = vmatprep.subr.mxu0 %v4660_v38  ;;  %v4647_v32 = vld [vmem:[%s9528_s2 + $0x1490] sm:$0xff]  ;;  %v4410_v38 = vld [vmem:[%s9528_s2 + $0xd98] sm:$0xff] }
 0x17f   :  { %5453 = vmatpush3.msra.mxu1 %v4327_v35  ;;  %5746 = vmatpush3.msra.mxu0 %v4644_v40  ;;  %v4395_v35 = vld [vmem:[%s9528_s2 + $0xd20] sm:$0xff]  ;;  %v4394_v40 = vld [vmem:[%s9528_s2 + $0xd18] sm:$0xff] }
 0x180   :  { %5454 = vmatprep.subr.mxu1 %v4342_v36  ;;  %5747 = vmatprep.subr.mxu0 %v4659_v43  ;;  %v4646_v36 = vld [vmem:[%s9528_s2 + $0x1488] sm:$0xff]  ;;  %v4409_v43 = vld [vmem:[%s9528_s2 + $0xd90] sm:$0xff] }
 0x181   :  { %5455 = vmatpush3.msra.mxu1 %v4326_v37  ;;  %5748 = vmatpush3.msra.mxu0 %v4643_v45  ;;  %v4661_v37 = vld.sshfl [vmem:[%s9530_s0 + $0x50] sm:$0x33 pattern:$0x76325410] }
 0x182   :  { %5456 = vmatprep.subr.mxu1 %v4341_v39  ;;  %5749 = vmatprep.subr.mxu0 %v4658_v53  ;;  %v4630_v39 = vld [vmem:[%s9528_s2 + $0x1408] sm:$0xff]  ;;  %v2588_v45 = vcombine.high %v4661_v37, %v4661_v37 }
 0x183   :  { %5457 = vmatpush3.msra.mxu1 %v4325_v41  ;;  %5750 = vmatpush3.msra.mxu0 %v4642_v55  ;;  %v4645_v41 = vld [vmem:[%s9528_s2 + $0x1480] sm:$0xff]  ;;  %v4408_v53 = vld [vmem:[%s9528_s2 + $0xd88] sm:$0xff]  ;;  %v8078_v55 = vld.sshfl [vmem:[%s9530_s0 + $0x3c] sm:$0x33 pattern:$0x76325410] }
 0x184   :  { %5458 = vmatprep.subr.mxu1 %v4340_v44  ;;  %5751 = vmatprep.subr.mxu0 %v4657_v57  ;;  %v4629_v44 = vld [vmem:[%s9528_s2 + $0x1400] sm:$0xff] }
 0x185   :  { %5459 = vmatpush3.msra.mxu1 %v4324_v46  ;;  %5752 = vmatpush3.msra.mxu0 %v4641_v42  ;;  %v4393_v46 = vld [vmem:[%s9528_s2 + $0xd10] sm:$0xff]  ;;  %v4407_v57 = vld [vmem:[%s9528_s2 + $0xd80] sm:$0xff]  ;;  %v2003_v42 = vcombine.high %v8078_v55, %v8078_v55 }
 0x186   :  { %5460 = vmatprep.subr.mxu1 %v4339_v54  ;;  %5753 = vmatprep.subr.mxu0 %v4656_v49  ;;  %v4392_v54 = vld [vmem:[%s9528_s2 + $0xd08] sm:$0xff]  ;;  %v4489_v49 = vld [vmem:[%s9528_s2 + $0xff0] sm:$0xff] }
 0x187   :  { %5461 = vmatpush3.msra.mxu1 %v4323_v56  ;;  %v4728_v56 = vld [vmem:[%s9528_s2 + $0x16f8] sm:$0xff]  ;;  %2655 = vmatprep.mubr.f32.mxu0 %v2588_v45  ;;  %v4461_v45 = vld [vmem:[%s9528_s2 + $0xf10] sm:$0xff] }
 0x188   :  { %1603 = vmatmul.mubr.f32.vlgmr.msra.gmra.mxu1 %v7694_v51  ;;  %5500 = vmatprep.subr.mxu1 %v4422_v58  ;;  %v7917_v47 = vpop.f32.mrf.mxu1  ;;  %v4640_v51 = vld [vmem:[%s9528_s2 + $0x1458] sm:$0xff] }
 0x189   :  { %5501 = vmatpush3.msra.mxu1 %v4406_v60  ;;  %1836 = vmatprep.mubr.f32.mxu1 %v1769_v59  ;;  %v4712_v58 = vld [vmem:[%s9528_s2 + $0x1678] sm:$0xff]  ;;  %v4391_v59 = vld [vmem:[%s9528_s2 + $0xd00] sm:$0xff]  ;;  %v4727_v60 = vld [vmem:[%s9528_s2 + $0x16f0] sm:$0xff] }
 0x18a   :  { %5502 = vmatprep.subr.mxu1 %v4421_v61  ;;  %v6180_v62 = vpop.f32.mrf.mxu1  ;;  %5754 = vmatpush3.msra.mxu0 %v4640_v51  ;;  %v4490_v61 = vld [vmem:[%s9528_s2 + $0xff8] sm:$0xff]  ;;  %v4473_v51 = vld [vmem:[%s9528_s2 + $0xf70] sm:$0xff] }
 0x18b   :  { %5503 = vmatpush3.msra.mxu1 %v4405_v48  ;;  %5755 = vmatprep.subr.mxu0 %v4655_v0  ;;  %v4474_v48 = vld [vmem:[%s9528_s2 + $0xf78] sm:$0xff]  ;;  %v4726_v62 = vld [vmem:[%s9528_s2 + $0x16e8] sm:$0xff] }
 0x18c   :  { %5504 = vmatprep.subr.mxu1 %v4420_v50  ;;  %5756 = vmatpush3.msra.mxu0 %v4639_v2  ;;  %v4711_v50 = vld [vmem:[%s9528_s2 + $0x1670] sm:$0xff]  ;;  %v4710_v0 = vld [vmem:[%s9528_s2 + $0x1668] sm:$0xff]  ;;  %v4487_v2 = vld [vmem:[%s9528_s2 + $0xfe0] sm:$0xff] }
 0x18d   :  { %5505 = vmatpush3.msra.mxu1 %v4404_v63  ;;  %5757 = vmatprep.subr.mxu0 %v4654_v4  ;;  %v4488_v63 = vld [vmem:[%s9528_s2 + $0xfe8] sm:$0xff]  ;;  %v4471_v4 = vld [vmem:[%s9528_s2 + $0xf60] sm:$0xff] }
 0x18e   :  { %5506 = vmatprep.subr.mxu1 %v4419_v1  ;;  %5758 = vmatpush3.msra.mxu0 %v4638_v6  ;;  %v4725_v1 = vld [vmem:[%s9528_s2 + $0x16e0] sm:$0xff]  ;;  %v4486_v6 = vld [vmem:[%s9528_s2 + $0xfd8] sm:$0xff] }
 0x18f   :  { %5507 = vmatpush3.msra.mxu1 %v4403_v3  ;;  %5759 = vmatprep.subr.mxu0 %v4653_v8  ;;  %v4709_v3 = vld [vmem:[%s9528_s2 + $0x1660] sm:$0xff]  ;;  %v4470_v8 = vld [vmem:[%s9528_s2 + $0xf58] sm:$0xff] }
 0x190   :  { %5508 = vmatprep.subr.mxu1 %v4418_v5  ;;  %5760 = vmatpush3.msra.mxu0 %v4637_v10  ;;  %v4724_v5 = vld [vmem:[%s9528_s2 + $0x16d8] sm:$0xff]  ;;  %v4485_v10 = vld [vmem:[%s9528_s2 + $0xfd0] sm:$0xff] }
 0x191   :  { %5509 = vmatpush3.msra.mxu1 %v4402_v7  ;;  %5761 = vmatprep.subr.mxu0 %v4652_v12  ;;  %v4708_v7 = vld [vmem:[%s9528_s2 + $0x1658] sm:$0xff]  ;;  %v4469_v12 = vld [vmem:[%s9528_s2 + $0xf50] sm:$0xff] }
 0x192   :  { %5510 = vmatprep.subr.mxu1 %v4417_v9  ;;  %5762 = vmatpush3.msra.mxu0 %v4636_v14  ;;  %v4723_v9 = vld [vmem:[%s9528_s2 + $0x16d0] sm:$0xff]  ;;  %v4484_v14 = vld [vmem:[%s9528_s2 + $0xfc8] sm:$0xff] }
 0x193   :  { %5511 = vmatpush3.msra.mxu1 %v4401_v11  ;;  %5763 = vmatprep.subr.mxu0 %v4651_v16  ;;  %v4707_v11 = vld [vmem:[%s9528_s2 + $0x1650] sm:$0xff]  ;;  %v4468_v16 = vld [vmem:[%s9528_s2 + $0xf48] sm:$0xff] }
 0x194   :  { %5512 = vmatprep.subr.mxu1 %v4416_v13  ;;  %5764 = vmatpush3.msra.mxu0 %v4635_v18  ;;  %v4722_v13 = vld [vmem:[%s9528_s2 + $0x16c8] sm:$0xff]  ;;  %v4483_v18 = vld [vmem:[%s9528_s2 + $0xfc0] sm:$0xff] }
 0x195   :  { %5513 = vmatpush3.msra.mxu1 %v4400_v15  ;;  %5765 = vmatprep.subr.mxu0 %v4650_v20  ;;  %v4706_v15 = vld [vmem:[%s9528_s2 + $0x1648] sm:$0xff]  ;;  %v4467_v20 = vld [vmem:[%s9528_s2 + $0xf40] sm:$0xff] }
 0x196   :  { %5514 = vmatprep.subr.mxu1 %v4415_v17  ;;  %5766 = vmatpush3.msra.mxu0 %v4634_v22  ;;  %v4721_v17 = vld [vmem:[%s9528_s2 + $0x16c0] sm:$0xff]  ;;  %v4482_v22 = vld [vmem:[%s9528_s2 + $0xfb8] sm:$0xff] }
 0x197   :  { %5515 = vmatpush3.msra.mxu1 %v4399_v19  ;;  %5767 = vmatprep.subr.mxu0 %v4649_v24  ;;  %v4705_v19 = vld [vmem:[%s9528_s2 + $0x1640] sm:$0xff]  ;;  %v4466_v24 = vld [vmem:[%s9528_s2 + $0xf38] sm:$0xff] }
 0x198   :  { %5516 = vmatprep.subr.mxu1 %v4414_v21  ;;  %5768 = vmatpush3.msra.mxu0 %v4633_v26  ;;  %v4720_v21 = vld [vmem:[%s9528_s2 + $0x16b8] sm:$0xff]  ;;  %v4481_v26 = vld [vmem:[%s9528_s2 + $0xfb0] sm:$0xff] }
 0x199   :  { %5517 = vmatpush3.msra.mxu1 %v4398_v23  ;;  %5769 = vmatprep.subr.mxu0 %v4648_v28  ;;  %v4704_v23 = vld [vmem:[%s9528_s2 + $0x1638] sm:$0xff]  ;;  %v4465_v28 = vld [vmem:[%s9528_s2 + $0xf30] sm:$0xff] }
 0x19a   :  { %5518 = vmatprep.subr.mxu1 %v4413_v25  ;;  %5770 = vmatpush3.msra.mxu0 %v4632_v30  ;;  %v4719_v25 = vld [vmem:[%s9528_s2 + $0x16b0] sm:$0xff]  ;;  %v4480_v30 = vld [vmem:[%s9528_s2 + $0xfa8] sm:$0xff] }
 0x19b   :  { %5519 = vmatpush3.msra.mxu1 %v4397_v27  ;;  %5771 = vmatprep.subr.mxu0 %v4647_v32  ;;  %v4703_v27 = vld [vmem:[%s9528_s2 + $0x1630] sm:$0xff]  ;;  %v4464_v32 = vld [vmem:[%s9528_s2 + $0xf28] sm:$0xff] }
 0x19c   :  { %5520 = vmatprep.subr.mxu1 %v4412_v29  ;;  %5772 = vmatpush3.msra.mxu0 %v4631_v34  ;;  %v4718_v29 = vld [vmem:[%s9528_s2 + $0x16a8] sm:$0xff]  ;;  %v4479_v34 = vld [vmem:[%s9528_s2 + $0xfa0] sm:$0xff] }
 0x19d   :  { %5521 = vmatpush3.msra.mxu1 %v4396_v31  ;;  %5773 = vmatprep.subr.mxu0 %v4646_v36  ;;  %v4702_v31 = vld [vmem:[%s9528_s2 + $0x1628] sm:$0xff]  ;;  %v4463_v36 = vld [vmem:[%s9528_s2 + $0xf20] sm:$0xff] }
 0x19e   :  { %5522 = vmatprep.subr.mxu1 %v4411_v33  ;;  %5774 = vmatpush3.msra.mxu0 %v4630_v39  ;;  %v4717_v33 = vld [vmem:[%s9528_s2 + $0x16a0] sm:$0xff]  ;;  %v4700_v39 = vld [vmem:[%s9528_s2 + $0x1618] sm:$0xff] }
 0x19f   :  { %5523 = vmatpush3.msra.mxu1 %v4395_v35  ;;  %5775 = vmatprep.subr.mxu0 %v4645_v41  ;;  %v4701_v35 = vld [vmem:[%s9528_s2 + $0x1620] sm:$0xff]  ;;  %v4715_v41 = vld [vmem:[%s9528_s2 + $0x1690] sm:$0xff] }
 0x1a0   :  { %5524 = vmatprep.subr.mxu1 %v4410_v38  ;;  %5776 = vmatpush3.msra.mxu0 %v4629_v44  ;;  %v4478_v38 = vld [vmem:[%s9528_s2 + $0xf98] sm:$0xff]  ;;  %v4699_v44 = vld [vmem:[%s9528_s2 + $0x1610] sm:$0xff] }
 0x1a1   :  { %5525 = vmatpush3.msra.mxu1 %v4394_v40  ;;  %2656 = vmatmul.mubr.f32.vlgmr.msra.gmra.mxu0 %v4661_v37  ;;  %v4716_v37 = vld [vmem:[%s9528_s2 + $0x1698] sm:$0xff] }
 0x1a2   :  { %5526 = vmatprep.subr.mxu1 %v4409_v43  ;;  %5815 = vmatprep.subr.mxu0 %v4728_v56  ;;  %v4462_v40 = vld [vmem:[%s9528_s2 + $0xf18] sm:$0xff]  ;;  %v4477_v43 = vld [vmem:[%s9528_s2 + $0xf90] sm:$0xff]  ;;  %v4698_v56 = vld [vmem:[%s9528_s2 + $0x1608] sm:$0xff] }
 0x1a3   :  { %5527 = vmatpush3.msra.mxu1 %v4393_v46  ;;  %5816 = vmatpush3.msra.mxu0 %v4712_v58  ;;  %v4714_v46 = vld [vmem:[%s9528_s2 + $0x1688] sm:$0xff]  ;;  %v8275_v58 = vld.sshfl [vmem:[%s9530_s0 + $0x44] sm:$0x33 pattern:$0x76325410] }
 0x1a4   :  { %5528 = vmatprep.subr.mxu1 %v4408_v53  ;;  %5817 = vmatprep.subr.mxu0 %v4727_v60  ;;  %v4729_v53 = vld.sshfl [vmem:[%s9530_s0 + $0x58] sm:$0x33 pattern:$0x76325410]  ;;  %v4475_v60 = vld [vmem:[%s9528_s2 + $0xf80] sm:$0xff] }
 0x1a5   :  { %5529 = vmatpush3.msra.mxu1 %v4392_v54  ;;  %5818 = vmatpush3.msra.mxu0 %v4711_v50  ;;  %v4476_v54 = vld [vmem:[%s9528_s2 + $0xf88] sm:$0xff]  ;;  %v2237_v50 = vcombine.high %v8275_v58, %v8275_v58 }
 0x1a6   :  { %5530 = vmatprep.subr.mxu1 %v4407_v57  ;;  %5819 = vmatprep.subr.mxu0 %v4726_v62  ;;  %v4460_v57 = vld [vmem:[%s9528_s2 + $0xf08] sm:$0xff]  ;;  %v4557_v62 = vld [vmem:[%s9528_s2 + $0x11f0] sm:$0xff] }
 0x1a7   :  { %5531 = vmatpush3.msra.mxu1 %v4391_v59  ;;  %5820 = vmatpush3.msra.mxu0 %v4710_v0  ;;  %v4713_v59 = vld [vmem:[%s9528_s2 + $0x1680] sm:$0xff]  ;;  %v4796_v0 = vld [vmem:[%s9528_s2 + $0x18f8] sm:$0xff] }
 0x1a8   :  { %1837 = vmatmul.mubr.f32.vlgmr.msra.gmra.mxu1 %v7885_v52  ;;  %5570 = vmatprep.subr.mxu1 %v4490_v61  ;;  %v4472_v52 = vld [vmem:[%s9528_s2 + $0xf68] sm:$0xff]  ;;  %v4697_v61 = vld [vmem:[%s9528_s2 + $0x1600] sm:$0xff] }
 0x1a9   :  { %5571 = vmatpush3.msra.mxu1 %v4474_v48  ;;  %2070 = vmatprep.mubr.f32.mxu1 %v2003_v42  ;;  %v2822_v42 = vcombine.high %v4729_v53, %v4729_v53  ;;  %v4459_v48 = vld [vmem:[%s9528_s2 + $0xf00] sm:$0xff] }
 0x1aa   :  { %5572 = vmatprep.subr.mxu1 %v4489_v49  ;;  %5821 = vmatprep.subr.mxu0 %v4725_v1  ;;  %v4558_v49 = vld [vmem:[%s9528_s2 + $0x11f8] sm:$0xff] }
 0x1ab   :  { %5573 = vmatpush3.msra.mxu1 %v4473_v51  ;;  %5822 = vmatpush3.msra.mxu0 %v4709_v3  ;;  %v4542_v51 = vld [vmem:[%s9528_s2 + $0x1178] sm:$0xff]  ;;  %v4555_v3 = vld [vmem:[%s9528_s2 + $0x11e0] sm:$0xff] }
 0x1ac   :  { %5574 = vmatprep.subr.mxu1 %v4488_v63  ;;  %5823 = vmatprep.subr.mxu0 %v4724_v5  ;;  %v4541_v63 = vld [vmem:[%s9528_s2 + $0x1170] sm:$0xff]  ;;  %v4780_v1 = vld [vmem:[%s9528_s2 + $0x1878] sm:$0xff]  ;;  %v4539_v5 = vld [vmem:[%s9528_s2 + $0x1160] sm:$0xff] }
 0x1ad   :  { %5575 = vmatpush3.msra.mxu1 %v4472_v52  ;;  %5824 = vmatpush3.msra.mxu0 %v4708_v7  ;;  %v4556_v52 = vld [vmem:[%s9528_s2 + $0x11e8] sm:$0xff]  ;;  %v4554_v7 = vld [vmem:[%s9528_s2 + $0x11d8] sm:$0xff] }
 0x1ae   :  { %5576 = vmatprep.subr.mxu1 %v4487_v2  ;;  %5825 = vmatprep.subr.mxu0 %v4723_v9  ;;  %v4795_v2 = vld [vmem:[%s9528_s2 + $0x18f0] sm:$0xff]  ;;  %v4538_v9 = vld [vmem:[%s9528_s2 + $0x1158] sm:$0xff] }
 0x1af   :  { %5577 = vmatpush3.msra.mxu1 %v4471_v4  ;;  %5826 = vmatpush3.msra.mxu0 %v4707_v11  ;;  %v4779_v4 = vld [vmem:[%s9528_s2 + $0x1870] sm:$0xff] }
 0x1b0   :  { %5578 = vmatprep.subr.mxu1 %v4486_v6  ;;  %5827 = vmatprep.subr.mxu0 %v4722_v13  ;;  %v4794_v6 = vld [vmem:[%s9528_s2 + $0x18e8] sm:$0xff]  ;;  %v4553_v11 = vld [vmem:[%s9528_s2 + $0x11d0] sm:$0xff] }
 0x1b1   :  { %5579 = vmatpush3.msra.mxu1 %v4470_v8  ;;  %5828 = vmatpush3.msra.mxu0 %v4706_v15  ;;  %v4778_v8 = vld [vmem:[%s9528_s2 + $0x1868] sm:$0xff]  ;;  %v4537_v13 = vld [vmem:[%s9528_s2 + $0x1150] sm:$0xff] }
 0x1b2   :  { %5580 = vmatprep.subr.mxu1 %v4485_v10  ;;  %5829 = vmatprep.subr.mxu0 %v4721_v17  ;;  %v4793_v10 = vld [vmem:[%s9528_s2 + $0x18e0] sm:$0xff]  ;;  %v4552_v15 = vld [vmem:[%s9528_s2 + $0x11c8] sm:$0xff] }
 0x1b3   :  { %5581 = vmatpush3.msra.mxu1 %v4469_v12  ;;  %5830 = vmatpush3.msra.mxu0 %v4705_v19  ;;  %v4777_v12 = vld [vmem:[%s9528_s2 + $0x1860] sm:$0xff]  ;;  %v4536_v17 = vld [vmem:[%s9528_s2 + $0x1148] sm:$0xff] }
 0x1b4   :  { %5582 = vmatprep.subr.mxu1 %v4484_v14  ;;  %5831 = vmatprep.subr.mxu0 %v4720_v21  ;;  %v4792_v14 = vld [vmem:[%s9528_s2 + $0x18d8] sm:$0xff]  ;;  %v4551_v19 = vld [vmem:[%s9528_s2 + $0x11c0] sm:$0xff] }
 0x1b5   :  { %5583 = vmatpush3.msra.mxu1 %v4468_v16  ;;  %5832 = vmatpush3.msra.mxu0 %v4704_v23  ;;  %v4776_v16 = vld [vmem:[%s9528_s2 + $0x1858] sm:$0xff]  ;;  %v4535_v21 = vld [vmem:[%s9528_s2 + $0x1140] sm:$0xff] }
 0x1b6   :  { %5584 = vmatprep.subr.mxu1 %v4483_v18  ;;  %5833 = vmatprep.subr.mxu0 %v4719_v25  ;;  %v4791_v18 = vld [vmem:[%s9528_s2 + $0x18d0] sm:$0xff]  ;;  %v4550_v23 = vld [vmem:[%s9528_s2 + $0x11b8] sm:$0xff] }
 0x1b7   :  { %5585 = vmatpush3.msra.mxu1 %v4467_v20  ;;  %5834 = vmatpush3.msra.mxu0 %v4703_v27  ;;  %v4775_v20 = vld [vmem:[%s9528_s2 + $0x1850] sm:$0xff]  ;;  %v4534_v25 = vld [vmem:[%s9528_s2 + $0x1138] sm:$0xff] }
 0x1b8   :  { %5586 = vmatprep.subr.mxu1 %v4482_v22  ;;  %5835 = vmatprep.subr.mxu0 %v4718_v29  ;;  %v4790_v22 = vld [vmem:[%s9528_s2 + $0x18c8] sm:$0xff]  ;;  %v4549_v27 = vld [vmem:[%s9528_s2 + $0x11b0] sm:$0xff] }
 0x1b9   :  { %5587 = vmatpush3.msra.mxu1 %v4466_v24  ;;  %5836 = vmatpush3.msra.mxu0 %v4702_v31  ;;  %v4774_v24 = vld [vmem:[%s9528_s2 + $0x1848] sm:$0xff]  ;;  %v4533_v29 = vld [vmem:[%s9528_s2 + $0x1130] sm:$0xff] }
 0x1ba   :  { %5588 = vmatprep.subr.mxu1 %v4481_v26  ;;  %5837 = vmatprep.subr.mxu0 %v4717_v33  ;;  %v4789_v26 = vld [vmem:[%s9528_s2 + $0x18c0] sm:$0xff]  ;;  %v4548_v31 = vld [vmem:[%s9528_s2 + $0x11a8] sm:$0xff] }
 0x1bb   :  { %5589 = vmatpush3.msra.mxu1 %v4465_v28  ;;  %5838 = vmatpush3.msra.mxu0 %v4701_v35  ;;  %v4773_v28 = vld [vmem:[%s9528_s2 + $0x1840] sm:$0xff]  ;;  %v4532_v33 = vld [vmem:[%s9528_s2 + $0x1128] sm:$0xff] }
 0x1bc   :  { %5590 = vmatprep.subr.mxu1 %v4480_v30  ;;  %5839 = vmatprep.subr.mxu0 %v4716_v37  ;;  %v4788_v30 = vld [vmem:[%s9528_s2 + $0x18b8] sm:$0xff]  ;;  %v4547_v35 = vld [vmem:[%s9528_s2 + $0x11a0] sm:$0xff] }
 0x1bd   :  { %5591 = vmatpush3.msra.mxu1 %v4464_v32  ;;  %5840 = vmatpush3.msra.mxu0 %v4700_v39  ;;  %v4772_v32 = vld [vmem:[%s9528_s2 + $0x1838] sm:$0xff]  ;;  %v4531_v37 = vld [vmem:[%s9528_s2 + $0x1120] sm:$0xff] }
 0x1be   :  { %5592 = vmatprep.subr.mxu1 %v4479_v34  ;;  %5841 = vmatprep.subr.mxu0 %v4715_v41  ;;  %v4787_v34 = vld [vmem:[%s9528_s2 + $0x18b0] sm:$0xff]  ;;  %v4546_v39 = vld [vmem:[%s9528_s2 + $0x1198] sm:$0xff] }
 0x1bf   :  { %5593 = vmatpush3.msra.mxu1 %v4463_v36  ;;  %5842 = vmatpush3.msra.mxu0 %v4699_v44  ;;  %v4771_v36 = vld [vmem:[%s9528_s2 + $0x1830] sm:$0xff]  ;;  %v4530_v41 = vld [vmem:[%s9528_s2 + $0x1118] sm:$0xff] }
 0x1c0   :  { %5594 = vmatprep.subr.mxu1 %v4478_v38  ;;  %5843 = vmatprep.subr.mxu0 %v4714_v46  ;;  %v4786_v38 = vld [vmem:[%s9528_s2 + $0x18a8] sm:$0xff]  ;;  %v4545_v44 = vld [vmem:[%s9528_s2 + $0x1190] sm:$0xff] }
 0x1c1   :  { %5595 = vmatpush3.msra.mxu1 %v4462_v40  ;;  %5844 = vmatpush3.msra.mxu0 %v4698_v56  ;;  %v4770_v40 = vld [vmem:[%s9528_s2 + $0x1828] sm:$0xff]  ;;  %v4529_v46 = vld [vmem:[%s9528_s2 + $0x1110] sm:$0xff]  ;;  %v4768_v56 = vld [vmem:[%s9528_s2 + $0x1818] sm:$0xff] }
 0x1c2   :  { %5596 = vmatprep.subr.mxu1 %v4477_v43  ;;  %5845 = vmatprep.subr.mxu0 %v4713_v59  ;;  %v4785_v43 = vld [vmem:[%s9528_s2 + $0x18a0] sm:$0xff]  ;;  %v8463_v59 = vld.sshfl [vmem:[%s9530_s0 + $0x4c] sm:$0x33 pattern:$0x76325410] }
 0x1c3   :  { %5597 = vmatpush3.msra.mxu1 %v4461_v45  ;;  %5846 = vmatpush3.msra.mxu0 %v4697_v61  ;;  %v4769_v45 = vld [vmem:[%s9528_s2 + $0x1820] sm:$0xff] }
 0x1c4   :  { %5598 = vmatprep.subr.mxu1 %v4476_v54  ;;  %2889 = vmatprep.mubr.f32.mxu0 %v2822_v42  ;;  %v4544_v54 = vld [vmem:[%s9528_s2 + $0x1188] sm:$0xff]  ;;  %v4543_v61 = vld [vmem:[%s9528_s2 + $0x1180] sm:$0xff]  ;;  %v4767_v42 = vld [vmem:[%s9528_s2 + $0x1810] sm:$0xff] }
 0x1c5   :  { %5599 = vmatpush3.msra.mxu1 %v4460_v57  ;;  %2890 = vmatmul.mubr.f32.vlgmr.msra.gmra.mxu0 %v4729_v53  ;;  %v4784_v53 = vld [vmem:[%s9528_s2 + $0x1898] sm:$0xff]  ;;  %v4528_v57 = vld [vmem:[%s9528_s2 + $0x1108] sm:$0xff] }
 0x1c6   :  { %5600 = vmatprep.subr.mxu1 %v4475_v60  ;;  %5885 = vmatprep.subr.mxu0 %v4796_v0  ;;  %v4783_v60 = vld [vmem:[%s9528_s2 + $0x1890] sm:$0xff] }
 0x1c7   :  { %5601 = vmatpush3.msra.mxu1 %v4459_v48  ;;  %5886 = vmatpush3.msra.mxu0 %v4780_v1  ;;  %v4527_v48 = vld [vmem:[%s9528_s2 + $0x1100] sm:$0xff]  ;;  %v4625_v0 = vld [vmem:[%s9528_s2 + $0x13f0] sm:$0xff] }
 0x1c8   :  { %2071 = vmatmul.mubr.f32.vlgmr.msra.gmra.mxu1 %v8078_v55  ;;  %5640 = vmatprep.subr.mxu1 %v4558_v49  ;;  %v4540_v55 = vld [vmem:[%s9528_s2 + $0x1168] sm:$0xff]  ;;  %v4609_v1 = vld [vmem:[%s9528_s2 + $0x1370] sm:$0xff] }
 0x1c9   :  { %5641 = vmatpush3.msra.mxu1 %v4542_v51  ;;  %2304 = vmatprep.mubr.f32.mxu1 %v2237_v50  ;;  %v4782_v49 = vld [vmem:[%s9528_s2 + $0x1888] sm:$0xff]  ;;  %v4626_v50 = vld [vmem:[%s9528_s2 + $0x13f8] sm:$0xff]  ;;  %v2471_v51 = vcombine.high %v8463_v59, %v8463_v59 }
 0x1ca   :  { %5642 = vmatprep.subr.mxu1 %v4557_v62  ;;  %5887 = vmatprep.subr.mxu0 %v4795_v2  ;;  %v4610_v62 = vld [vmem:[%s9528_s2 + $0x1378] sm:$0xff]  ;;  %v4624_v2 = vld [vmem:[%s9528_s2 + $0x13e8] sm:$0xff] }
 0x1cb   :  { %5643 = vmatpush3.msra.mxu1 %v4541_v63  ;;  %5888 = vmatpush3.msra.mxu0 %v4779_v4  ;;  %v4797_v63 = vld.sshfl [vmem:[%s9530_s0 + $0x60] sm:$0x33 pattern:$0x76325410]  ;;  %v4608_v4 = vld [vmem:[%s9528_s2 + $0x1368] sm:$0xff] }
 0x1cc   :  { %5644 = vmatprep.subr.mxu1 %v4556_v52  ;;  %5889 = vmatprep.subr.mxu0 %v4794_v6  ;;  %v4766_v52 = vld [vmem:[%s9528_s2 + $0x1808] sm:$0xff]  ;;  %v4607_v6 = vld [vmem:[%s9528_s2 + $0x1360] sm:$0xff] }
 0x1cd   :  { %5645 = vmatpush3.msra.mxu1 %v4540_v55  ;;  %5890 = vmatpush3.msra.mxu0 %v4778_v8  ;;  %v4781_v55 = vld [vmem:[%s9528_s2 + $0x1880] sm:$0xff]  ;;  %v4622_v8 = vld [vmem:[%s9528_s2 + $0x13d8] sm:$0xff] }
 0x1ce   :  { %5646 = vmatprep.subr.mxu1 %v4555_v3  ;;  %5891 = vmatprep.subr.mxu0 %v4793_v10  ;;  %v4765_v3 = vld [vmem:[%s9528_s2 + $0x1800] sm:$0xff]  ;;  %v4606_v10 = vld [vmem:[%s9528_s2 + $0x1358] sm:$0xff] }
 0x1cf   :  { %5647 = vmatpush3.msra.mxu1 %v4539_v5  ;;  %5892 = vmatpush3.msra.mxu0 %v4777_v12  ;;  %v4623_v5 = vld [vmem:[%s9528_s2 + $0x13e0] sm:$0xff]  ;;  %v4621_v12 = vld [vmem:[%s9528_s2 + $0x13d0] sm:$0xff] }
 0x1d0   :  { %5648 = vmatprep.subr.mxu1 %v4554_v7  ;;  %5893 = vmatprep.subr.mxu0 %v4792_v14  ;;  %v4864_v7 = vld [vmem:[%s9528_s2 + $0x1af8] sm:$0xff]  ;;  %v4605_v14 = vld [vmem:[%s9528_s2 + $0x1350] sm:$0xff] }
 0x1d1   :  { %5649 = vmatpush3.msra.mxu1 %v4538_v9  ;;  %5894 = vmatpush3.msra.mxu0 %v4776_v16  ;;  %v4848_v9 = vld [vmem:[%s9528_s2 + $0x1a78] sm:$0xff]  ;;  %v4620_v16 = vld [vmem:[%s9528_s2 + $0x13c8] sm:$0xff] }
 0x1d2   :  { %5650 = vmatprep.subr.mxu1 %v4553_v11  ;;  %5895 = vmatprep.subr.mxu0 %v4791_v18  ;;  %v4863_v11 = vld [vmem:[%s9528_s2 + $0x1af0] sm:$0xff]  ;;  %v4604_v18 = vld [vmem:[%s9528_s2 + $0x1348] sm:$0xff] }
 0x1d3   :  { %5651 = vmatpush3.msra.mxu1 %v4537_v13  ;;  %5896 = vmatpush3.msra.mxu0 %v4775_v20  ;;  %v4847_v13 = vld [vmem:[%s9528_s2 + $0x1a70] sm:$0xff]  ;;  %v4619_v20 = vld [vmem:[%s9528_s2 + $0x13c0] sm:$0xff] }
 0x1d4   :  { %5652 = vmatprep.subr.mxu1 %v4552_v15  ;;  %5897 = vmatprep.subr.mxu0 %v4790_v22  ;;  %v4862_v15 = vld [vmem:[%s9528_s2 + $0x1ae8] sm:$0xff]  ;;  %v4603_v22 = vld [vmem:[%s9528_s2 + $0x1340] sm:$0xff] }
 0x1d5   :  { %5653 = vmatpush3.msra.mxu1 %v4536_v17  ;;  %5898 = vmatpush3.msra.mxu0 %v4774_v24  ;;  %v4846_v17 = vld [vmem:[%s9528_s2 + $0x1a68] sm:$0xff]  ;;  %v4618_v24 = vld [vmem:[%s9528_s2 + $0x13b8] sm:$0xff] }
 0x1d6   :  { %5654 = vmatprep.subr.mxu1 %v4551_v19  ;;  %5899 = vmatprep.subr.mxu0 %v4789_v26  ;;  %v4861_v19 = vld [vmem:[%s9528_s2 + $0x1ae0] sm:$0xff]  ;;  %v4602_v26 = vld [vmem:[%s9528_s2 + $0x1338] sm:$0xff] }
 0x1d7   :  { %5655 = vmatpush3.msra.mxu1 %v4535_v21  ;;  %5900 = vmatpush3.msra.mxu0 %v4773_v28  ;;  %v4845_v21 = vld [vmem:[%s9528_s2 + $0x1a60] sm:$0xff]  ;;  %v4617_v28 = vld [vmem:[%s9528_s2 + $0x13b0] sm:$0xff] }
 0x1d8   :  { %5656 = vmatprep.subr.mxu1 %v4550_v23  ;;  %5901 = vmatprep.subr.mxu0 %v4788_v30  ;;  %v4860_v23 = vld [vmem:[%s9528_s2 + $0x1ad8] sm:$0xff]  ;;  %v4601_v30 = vld [vmem:[%s9528_s2 + $0x1330] sm:$0xff] }
 0x1d9   :  { %5657 = vmatpush3.msra.mxu1 %v4534_v25  ;;  %5902 = vmatpush3.msra.mxu0 %v4772_v32  ;;  %v4844_v25 = vld [vmem:[%s9528_s2 + $0x1a58] sm:$0xff]  ;;  %v4616_v32 = vld [vmem:[%s9528_s2 + $0x13a8] sm:$0xff] }
 0x1da   :  { %5658 = vmatprep.subr.mxu1 %v4549_v27  ;;  %5903 = vmatprep.subr.mxu0 %v4787_v34  ;;  %v4859_v27 = vld [vmem:[%s9528_s2 + $0x1ad0] sm:$0xff]  ;;  %v4600_v34 = vld [vmem:[%s9528_s2 + $0x1328] sm:$0xff] }
 0x1db   :  { %5659 = vmatpush3.msra.mxu1 %v4533_v29  ;;  %5904 = vmatpush3.msra.mxu0 %v4771_v36  ;;  %v4843_v29 = vld [vmem:[%s9528_s2 + $0x1a50] sm:$0xff]  ;;  %v4615_v36 = vld [vmem:[%s9528_s2 + $0x13a0] sm:$0xff] }
 0x1dc   :  { %5660 = vmatprep.subr.mxu1 %v4548_v31  ;;  %5905 = vmatprep.subr.mxu0 %v4786_v38  ;;  %v4858_v31 = vld [vmem:[%s9528_s2 + $0x1ac8] sm:$0xff]  ;;  %v4599_v38 = vld [vmem:[%s9528_s2 + $0x1320] sm:$0xff] }
 0x1dd   :  { %5661 = vmatpush3.msra.mxu1 %v4532_v33  ;;  %5906 = vmatpush3.msra.mxu0 %v4770_v40  ;;  %v4842_v33 = vld [vmem:[%s9528_s2 + $0x1a48] sm:$0xff]  ;;  %v4614_v40 = vld [vmem:[%s9528_s2 + $0x1398] sm:$0xff] }
 0x1de   :  { %5662 = vmatprep.subr.mxu1 %v4547_v35  ;;  %5907 = vmatprep.subr.mxu0 %v4785_v43  ;;  %v4857_v35 = vld [vmem:[%s9528_s2 + $0x1ac0] sm:$0xff]  ;;  %v4598_v43 = vld [vmem:[%s9528_s2 + $0x1318] sm:$0xff] }
 0x1df   :  { %5663 = vmatpush3.msra.mxu1 %v4531_v37  ;;  %5908 = vmatpush3.msra.mxu0 %v4769_v45  ;;  %v4841_v37 = vld [vmem:[%s9528_s2 + $0x1a40] sm:$0xff]  ;;  %v4613_v45 = vld [vmem:[%s9528_s2 + $0x1390] sm:$0xff] }
 0x1e0   :  { %5664 = vmatprep.subr.mxu1 %v4546_v39  ;;  %5909 = vmatprep.subr.mxu0 %v4784_v53  ;;  %v4856_v39 = vld [vmem:[%s9528_s2 + $0x1ab8] sm:$0xff]  ;;  %v4597_v53 = vld [vmem:[%s9528_s2 + $0x1310] sm:$0xff] }
 0x1e1   :  { %5665 = vmatpush3.msra.mxu1 %v4530_v41  ;;  %5910 = vmatpush3.msra.mxu0 %v4768_v56  ;;  %v4840_v41 = vld [vmem:[%s9528_s2 + $0x1a38] sm:$0xff]  ;;  %v4612_v56 = vld [vmem:[%s9528_s2 + $0x1388] sm:$0xff] }
 0x1e2   :  { %5666 = vmatprep.subr.mxu1 %v4545_v44  ;;  %5911 = vmatprep.subr.mxu0 %v4783_v60  ;;  %v4855_v44 = vld [vmem:[%s9528_s2 + $0x1ab0] sm:$0xff]  ;;  %v4596_v60 = vld [vmem:[%s9528_s2 + $0x1308] sm:$0xff] }
 0x1e3   :  { %5667 = vmatpush3.msra.mxu1 %v4529_v46  ;;  %5912 = vmatpush3.msra.mxu0 %v4767_v42  ;;  %v4839_v46 = vld [vmem:[%s9528_s2 + $0x1a30] sm:$0xff]  ;;  %v4853_v42 = vld [vmem:[%s9528_s2 + $0x1aa0] sm:$0xff] }
 0x1e4   :  { %5668 = vmatprep.subr.mxu1 %v4544_v54  ;;  %5913 = vmatprep.subr.mxu0 %v4782_v49  ;;  %v4854_v54 = vld [vmem:[%s9528_s2 + $0x1aa8] sm:$0xff]  ;;  %v4837_v49 = vld [vmem:[%s9528_s2 + $0x1a20] sm:$0xff] }
 0x1e5   :  { %5669 = vmatpush3.msra.mxu1 %v4528_v57  ;;  %5914 = vmatpush3.msra.mxu0 %v4766_v52  ;;  %v4838_v57 = vld [vmem:[%s9528_s2 + $0x1a28] sm:$0xff]  ;;  %v4693_v52 = vld [vmem:[%s9528_s2 + $0x15f0] sm:$0xff] }
 0x1e6   :  { %5670 = vmatprep.subr.mxu1 %v4543_v61  ;;  %5915 = vmatprep.subr.mxu0 %v4781_v55  ;;  %v8654_v61 = vld.sshfl [vmem:[%s9530_s0 + $0x54] sm:$0x33 pattern:$0x76325410] }
 0x1e7   :  { %5671 = vmatpush3.msra.mxu1 %v4527_v48  ;;  %5916 = vmatpush3.msra.mxu0 %v4765_v3  ;;  %v4611_v48 = vld [vmem:[%s9528_s2 + $0x1380] sm:$0xff]  ;;  %v4677_v55 = vld [vmem:[%s9528_s2 + $0x1570] sm:$0xff]  ;;  %v4692_v3 = vld [vmem:[%s9528_s2 + $0x15e8] sm:$0xff] }
 0x1e8   :  { %2305 = vmatmul.mubr.f32.vlgmr.msra.gmra.mxu1 %v8275_v58  ;;  %5710 = vmatprep.subr.mxu1 %v4626_v50  ;;  %v3056_v58 = vcombine.high %v4797_v63, %v4797_v63  ;;  %v4595_v50 = vld [vmem:[%s9528_s2 + $0x1300] sm:$0xff] }
 0x1e9   :  { %5711 = vmatpush3.msra.mxu1 %v4610_v62  ;;  %2538 = vmatprep.mubr.f32.mxu1 %v2471_v51  ;;  %v4852_v51 = vld [vmem:[%s9528_s2 + $0x1a98] sm:$0xff] }
 0x1ea   :  { %5712 = vmatprep.subr.mxu1 %v4625_v0  ;;  %3123 = vmatprep.mubr.f32.mxu0 %v3056_v58  ;;  %v4694_v62 = vld [vmem:[%s9528_s2 + $0x15f8] sm:$0xff]  ;;  %v4835_v58 = vld [vmem:[%s9528_s2 + $0x1a10] sm:$0xff] }
 0x1eb   :  { %5713 = vmatpush3.msra.mxu1 %v4609_v1  ;;  %3124 = vmatmul.mubr.f32.vlgmr.msra.gmra.mxu0 %v4797_v63  ;;  %v2705_v63 = vcombine.high %v8654_v61, %v8654_v61  ;;  %v4678_v0 = vld [vmem:[%s9528_s2 + $0x1578] sm:$0xff] }
 0x1ec   :  { %5714 = vmatprep.subr.mxu1 %v4624_v2  ;;  %5955 = vmatprep.subr.mxu0 %v4864_v7  ;;  %v4836_v1 = vld [vmem:[%s9528_s2 + $0x1a18] sm:$0xff]  ;;  %v4851_v2 = vld [vmem:[%s9528_s2 + $0x1a90] sm:$0xff]  ;;  %v4834_v7 = vld [vmem:[%s9528_s2 + $0x1a08] sm:$0xff] }
 0x1ed   :  { %5715 = vmatpush3.msra.mxu1 %v4608_v4  ;;  %5956 = vmatpush3.msra.mxu0 %v4848_v9  ;;  %v4850_v4 = vld [vmem:[%s9528_s2 + $0x1a88] sm:$0xff]  ;;  %v4849_v9 = vld [vmem:[%s9528_s2 + $0x1a80] sm:$0xff] }
 0x1ee   :  { %5716 = vmatprep.subr.mxu1 %v4623_v5  ;;  %5957 = vmatprep.subr.mxu0 %v4863_v11  ;;  %v4865_v5 = vld.sshfl [vmem:[%s9530_s0 + $0x68] sm:$0x33 pattern:$0x76325410]  ;;  %v4833_v11 = vld [vmem:[%s9528_s2 + $0x1a00] sm:$0xff] }
 0x1ef   :  { %5717 = vmatpush3.msra.mxu1 %v4607_v6  ;;  %5958 = vmatpush3.msra.mxu0 %v4847_v13  ;;  %v4691_v6 = vld [vmem:[%s9528_s2 + $0x15e0] sm:$0xff]  ;;  %v4674_v13 = vld [vmem:[%s9528_s2 + $0x1558] sm:$0xff] }
 0x1f0   :  { %5718 = vmatprep.subr.mxu1 %v4622_v8  ;;  %5959 = vmatprep.subr.mxu0 %v4862_v15  ;;  %v4675_v8 = vld [vmem:[%s9528_s2 + $0x1560] sm:$0xff]  ;;  %v4673_v15 = vld [vmem:[%s9528_s2 + $0x1550] sm:$0xff] }
 0x1f1   :  { %5719 = vmatpush3.msra.mxu1 %v4606_v10  ;;  %5960 = vmatpush3.msra.mxu0 %v4846_v17  ;;  %v4690_v10 = vld [vmem:[%s9528_s2 + $0x15d8] sm:$0xff]  ;;  %v4688_v17 = vld [vmem:[%s9528_s2 + $0x15c8] sm:$0xff] }
 0x1f2   :  { %5720 = vmatprep.subr.mxu1 %v4621_v12  ;;  %5961 = vmatprep.subr.mxu0 %v4861_v19  ;;  %v3290_v12 = vcombine.high %v4865_v5, %v4865_v5  ;;  %v4672_v19 = vld [vmem:[%s9528_s2 + $0x1548] sm:$0xff] }
 0x1f3   :  { %5721 = vmatpush3.msra.mxu1 %v4605_v14  ;;  %5962 = vmatpush3.msra.mxu0 %v4845_v21  ;;  %v4689_v14 = vld [vmem:[%s9528_s2 + $0x15d0] sm:$0xff]  ;;  %v4687_v21 = vld [vmem:[%s9528_s2 + $0x15c0] sm:$0xff] }
 0x1f4   :  { %5722 = vmatprep.subr.mxu1 %v4620_v16  ;;  %5963 = vmatprep.subr.mxu0 %v4860_v23  ;;  %v4932_v16 = vld [vmem:[%s9528_s2 + $0x1cf8] sm:$0xff]  ;;  %v4671_v23 = vld [vmem:[%s9528_s2 + $0x1540] sm:$0xff] }
 0x1f5   :  { %5723 = vmatpush3.msra.mxu1 %v4604_v18  ;;  %5964 = vmatpush3.msra.mxu0 %v4844_v25  ;;  %v4916_v18 = vld [vmem:[%s9528_s2 + $0x1c78] sm:$0xff] }
 0x1f6   :  { %5724 = vmatprep.subr.mxu1 %v4619_v20  ;;  %5965 = vmatprep.subr.mxu0 %v4859_v27  ;;  %v4931_v20 = vld [vmem:[%s9528_s2 + $0x1cf0] sm:$0xff]  ;;  %v4686_v25 = vld [vmem:[%s9528_s2 + $0x15b8] sm:$0xff] }
 0x1f7   :  { %5725 = vmatpush3.msra.mxu1 %v4603_v22  ;;  %5966 = vmatpush3.msra.mxu0 %v4843_v29  ;;  %v4915_v22 = vld [vmem:[%s9528_s2 + $0x1c70] sm:$0xff]  ;;  %v4670_v27 = vld [vmem:[%s9528_s2 + $0x1538] sm:$0xff] }
 0x1f8   :  { %5726 = vmatprep.subr.mxu1 %v4618_v24  ;;  %5967 = vmatprep.subr.mxu0 %v4858_v31  ;;  %v4930_v24 = vld [vmem:[%s9528_s2 + $0x1ce8] sm:$0xff]  ;;  %v4685_v29 = vld [vmem:[%s9528_s2 + $0x15b0] sm:$0xff] }
 0x1f9   :  { %5727 = vmatpush3.msra.mxu1 %v4602_v26  ;;  %5968 = vmatpush3.msra.mxu0 %v4842_v33  ;;  %v4914_v26 = vld [vmem:[%s9528_s2 + $0x1c68] sm:$0xff]  ;;  %v4669_v31 = vld [vmem:[%s9528_s2 + $0x1530] sm:$0xff] }
 0x1fa   :  { %5728 = vmatprep.subr.mxu1 %v4617_v28  ;;  %5969 = vmatprep.subr.mxu0 %v4857_v35  ;;  %v4929_v28 = vld [vmem:[%s9528_s2 + $0x1ce0] sm:$0xff]  ;;  %v4684_v33 = vld [vmem:[%s9528_s2 + $0x15a8] sm:$0xff] }
 0x1fb   :  { %5729 = vmatpush3.msra.mxu1 %v4601_v30  ;;  %5970 = vmatpush3.msra.mxu0 %v4841_v37  ;;  %v4913_v30 = vld [vmem:[%s9528_s2 + $0x1c60] sm:$0xff]  ;;  %v4668_v35 = vld [vmem:[%s9528_s2 + $0x1528] sm:$0xff] }
 0x1fc   :  { %5730 = vmatprep.subr.mxu1 %v4616_v32  ;;  %5971 = vmatprep.subr.mxu0 %v4856_v39  ;;  %v4928_v32 = vld [vmem:[%s9528_s2 + $0x1cd8] sm:$0xff]  ;;  %v4683_v37 = vld [vmem:[%s9528_s2 + $0x15a0] sm:$0xff] }
 0x1fd   :  { %5731 = vmatpush3.msra.mxu1 %v4600_v34  ;;  %5972 = vmatpush3.msra.mxu0 %v4840_v41  ;;  %v4912_v34 = vld [vmem:[%s9528_s2 + $0x1c58] sm:$0xff]  ;;  %v4667_v39 = vld [vmem:[%s9528_s2 + $0x1520] sm:$0xff] }
 0x1fe   :  { %5732 = vmatprep.subr.mxu1 %v4615_v36  ;;  %5973 = vmatprep.subr.mxu0 %v4855_v44  ;;  %v4927_v36 = vld [vmem:[%s9528_s2 + $0x1cd0] sm:$0xff]  ;;  %v4682_v41 = vld [vmem:[%s9528_s2 + $0x1598] sm:$0xff] }
 0x1ff   :  { %5733 = vmatpush3.msra.mxu1 %v4599_v38  ;;  %5974 = vmatpush3.msra.mxu0 %v4839_v46  ;;  %v4911_v38 = vld [vmem:[%s9528_s2 + $0x1c50] sm:$0xff]  ;;  %v4666_v44 = vld [vmem:[%s9528_s2 + $0x1518] sm:$0xff] }
 0x200   :  { %5734 = vmatprep.subr.mxu1 %v4614_v40  ;;  %5975 = vmatprep.subr.mxu0 %v4854_v54  ;;  %v4926_v40 = vld [vmem:[%s9528_s2 + $0x1cc8] sm:$0xff]  ;;  %v4681_v46 = vld [vmem:[%s9528_s2 + $0x1590] sm:$0xff] }
 0x201   :  { %5735 = vmatpush3.msra.mxu1 %v4598_v43  ;;  %5976 = vmatpush3.msra.mxu0 %v4838_v57  ;;  %v4910_v43 = vld [vmem:[%s9528_s2 + $0x1c48] sm:$0xff]  ;;  %v4665_v54 = vld [vmem:[%s9528_s2 + $0x1510] sm:$0xff] }
 0x202   :  { %5736 = vmatprep.subr.mxu1 %v4613_v45  ;;  %5977 = vmatprep.subr.mxu0 %v4853_v42  ;;  %v4925_v45 = vld [vmem:[%s9528_s2 + $0x1cc0] sm:$0xff]  ;;  %v4680_v57 = vld [vmem:[%s9528_s2 + $0x1588] sm:$0xff] }
 0x203   :  { %5737 = vmatpush3.msra.mxu1 %v4597_v53  ;;  %5978 = vmatpush3.msra.mxu0 %v4837_v49  ;;  %v4909_v53 = vld [vmem:[%s9528_s2 + $0x1c40] sm:$0xff]  ;;  %v4664_v42 = vld [vmem:[%s9528_s2 + $0x1508] sm:$0xff]  ;;  %v4923_v49 = vld [vmem:[%s9528_s2 + $0x1cb0] sm:$0xff] }
 0x204   :  { %5738 = vmatprep.subr.mxu1 %v4612_v56  ;;  %5979 = vmatprep.subr.mxu0 %v4852_v51  ;;  %v4924_v56 = vld [vmem:[%s9528_s2 + $0x1cb8] sm:$0xff]  ;;  %v4907_v51 = vld [vmem:[%s9528_s2 + $0x1c30] sm:$0xff] }
 0x205   :  { %5739 = vmatpush3.msra.mxu1 %v4596_v60  ;;  %5980 = vmatpush3.msra.mxu0 %v4836_v1  ;;  %v4908_v60 = vld [vmem:[%s9528_s2 + $0x1c38] sm:$0xff] }
 0x206   :  { %5740 = vmatprep.subr.mxu1 %v4611_v48  ;;  %5981 = vmatprep.subr.mxu0 %v4851_v2  ;;  %v8845_v48 = vld.sshfl [vmem:[%s9530_s0 + $0x5c] sm:$0x33 pattern:$0x76325410]  ;;  %v4906_v2 = vld [vmem:[%s9528_s2 + $0x1c28] sm:$0xff] }
 0x207   :  { %5741 = vmatpush3.msra.mxu1 %v4595_v50  ;;  %5982 = vmatpush3.msra.mxu0 %v4835_v58  ;;  %v4679_v50 = vld [vmem:[%s9528_s2 + $0x1580] sm:$0xff]  ;;  %v4746_v1 = vld [vmem:[%s9528_s2 + $0x1778] sm:$0xff] }
 0x208   :  { %2539 = vmatmul.mubr.f32.vlgmr.msra.gmra.mxu1 %v8463_v59  ;;  %5780 = vmatprep.subr.mxu1 %v4694_v62  ;;  %v4676_v59 = vld [vmem:[%s9528_s2 + $0x1568] sm:$0xff]  ;;  %v4663_v62 = vld [vmem:[%s9528_s2 + $0x1500] sm:$0xff] }
 0x209   :  { %5781 = vmatpush3.msra.mxu1 %v4678_v0  ;;  %2772 = vmatprep.mubr.f32.mxu1 %v2705_v63  ;;  %v4922_v63 = vld [vmem:[%s9528_s2 + $0x1ca8] sm:$0xff]  ;;  %v4762_v0 = vld [vmem:[%s9528_s2 + $0x17f8] sm:$0xff]  ;;  %v4921_v58 = vld [vmem:[%s9528_s2 + $0x1ca0] sm:$0xff] }
 0x20a   :  { %5782 = vmatprep.subr.mxu1 %v4693_v52  ;;  %5983 = vmatprep.subr.mxu0 %v4850_v4  ;;  %v2939_v52 = vcombine.high %v8845_v48, %v8845_v48  ;;  %v4905_v4 = vld [vmem:[%s9528_s2 + $0x1c20] sm:$0xff] }
 0x20b   :  { %5783 = vmatpush3.msra.mxu1 %v4677_v55  ;;  %5984 = vmatpush3.msra.mxu0 %v4834_v7  ;;  %v4761_v55 = vld [vmem:[%s9528_s2 + $0x17f0] sm:$0xff]  ;;  %v4904_v7 = vld [vmem:[%s9528_s2 + $0x1c18] sm:$0xff] }
 0x20c   :  { %5784 = vmatprep.subr.mxu1 %v4692_v3  ;;  %5985 = vmatprep.subr.mxu0 %v4849_v9  ;;  %v4745_v3 = vld [vmem:[%s9528_s2 + $0x1770] sm:$0xff] }
 0x20d   :  { %5785 = vmatpush3.msra.mxu1 %v4676_v59  ;;  %5986 = vmatpush3.msra.mxu0 %v4833_v11  ;;  %v4760_v59 = vld [vmem:[%s9528_s2 + $0x17e8] sm:$0xff]  ;;  %v4919_v9 = vld [vmem:[%s9528_s2 + $0x1c90] sm:$0xff] }
 0x20e   :  { %5786 = vmatprep.subr.mxu1 %v4691_v6  ;;  %3357 = vmatprep.mubr.f32.mxu0 %v3290_v12  ;;  %v4759_v6 = vld [vmem:[%s9528_s2 + $0x17e0] sm:$0xff]  ;;  %v4903_v11 = vld [vmem:[%s9528_s2 + $0x1c10] sm:$0xff]  ;;  %v4742_v12 = vld [vmem:[%s9528_s2 + $0x1758] sm:$0xff] }
 0x20f   :  { %5787 = vmatpush3.msra.mxu1 %v4675_v8  ;;  %3358 = vmatmul.mubr.f32.vlgmr.msra.gmra.mxu0 %v4865_v5  ;;  %v4920_v5 = vld [vmem:[%s9528_s2 + $0x1c98] sm:$0xff]  ;;  %v4743_v8 = vld [vmem:[%s9528_s2 + $0x1760] sm:$0xff] }
 0x210   :  { %5788 = vmatprep.subr.mxu1 %v4690_v10  ;;  %6025 = vmatprep.subr.mxu0 %v4932_v16  ;;  %v4758_v10 = vld [vmem:[%s9528_s2 + $0x17d8] sm:$0xff]  ;;  %v4902_v16 = vld [vmem:[%s9528_s2 + $0x1c08] sm:$0xff] }
 0x211   :  { %5789 = vmatpush3.msra.mxu1 %v4674_v13  ;;  %6026 = vmatpush3.msra.mxu0 %v4916_v18  ;;  %v4918_v13 = vld [vmem:[%s9528_s2 + $0x1c88] sm:$0xff]  ;;  %v4917_v18 = vld [vmem:[%s9528_s2 + $0x1c80] sm:$0xff] }
 0x212   :  { %5790 = vmatprep.subr.mxu1 %v4689_v14  ;;  %6027 = vmatprep.subr.mxu0 %v4931_v20  ;;  %v4933_v14 = vld.sshfl [vmem:[%s9530_s0 + $0x70] sm:$0x33 pattern:$0x76325410]  ;;  %v4901_v20 = vld [vmem:[%s9528_s2 + $0x1c00] sm:$0xff] }
 0x213   :  { %5791 = vmatpush3.msra.mxu1 %v4673_v15  ;;  %6028 = vmatpush3.msra.mxu0 %v4915_v22  ;;  %v4757_v15 = vld [vmem:[%s9528_s2 + $0x17d0] sm:$0xff]  ;;  %v4740_v22 = vld [vmem:[%s9528_s2 + $0x1748] sm:$0xff] }
 0x214   :  { %5792 = vmatprep.subr.mxu1 %v4688_v17  ;;  %6029 = vmatprep.subr.mxu0 %v4930_v24  ;;  %v4741_v17 = vld [vmem:[%s9528_s2 + $0x1750] sm:$0xff]  ;;  %v4739_v24 = vld [vmem:[%s9528_s2 + $0x1740] sm:$0xff] }
 0x215   :  { %5793 = vmatpush3.msra.mxu1 %v4672_v19  ;;  %6030 = vmatpush3.msra.mxu0 %v4914_v26  ;;  %v4756_v19 = vld [vmem:[%s9528_s2 + $0x17c8] sm:$0xff]  ;;  %v4754_v26 = vld [vmem:[%s9528_s2 + $0x17b8] sm:$0xff] }
 0x216   :  { %5794 = vmatprep.subr.mxu1 %v4687_v21  ;;  %6031 = vmatprep.subr.mxu0 %v4929_v28  ;;  %v3524_v21 = vcombine.high %v4933_v14, %v4933_v14  ;;  %v4738_v28 = vld [vmem:[%s9528_s2 + $0x1738] sm:$0xff] }
 0x217   :  { %5795 = vmatpush3.msra.mxu1 %v4671_v23  ;;  %6032 = vmatpush3.msra.mxu0 %v4913_v30  ;;  %v4755_v23 = vld [vmem:[%s9528_s2 + $0x17c0] sm:$0xff]  ;;  %v4753_v30 = vld [vmem:[%s9528_s2 + $0x17b0] sm:$0xff] }
 0x218   :  { %5796 = vmatprep.subr.mxu1 %v4686_v25  ;;  %6033 = vmatprep.subr.mxu0 %v4928_v32  ;;  %v5000_v25 = vld [vmem:[%s9528_s2 + $0x1ef8] sm:$0xff]  ;;  %v4737_v32 = vld [vmem:[%s9528_s2 + $0x1730] sm:$0xff] }
 0x219   :  { %5797 = vmatpush3.msra.mxu1 %v4670_v27  ;;  %6034 = vmatpush3.msra.mxu0 %v4912_v34  ;;  %v4984_v27 = vld [vmem:[%s9528_s2 + $0x1e78] sm:$0xff]  ;;  %v4752_v34 = vld [vmem:[%s9528_s2 + $0x17a8] sm:$0xff] }
 0x21a   :  { %5798 = vmatprep.subr.mxu1 %v4685_v29  ;;  %6035 = vmatprep.subr.mxu0 %v4927_v36  ;;  %v4999_v29 = vld [vmem:[%s9528_s2 + $0x1ef0] sm:$0xff]  ;;  %v4736_v36 = vld [vmem:[%s9528_s2 + $0x1728] sm:$0xff] }
 0x21b   :  { %5799 = vmatpush3.msra.mxu1 %v4669_v31  ;;  %6036 = vmatpush3.msra.mxu0 %v4911_v38  ;;  %v4983_v31 = vld [vmem:[%s9528_s2 + $0x1e70] sm:$0xff]  ;;  %v4751_v38 = vld [vmem:[%s9528_s2 + $0x17a0] sm:$0xff] }
 0x21c   :  { %5800 = vmatprep.subr.mxu1 %v4684_v33  ;;  %6037 = vmatprep.subr.mxu0 %v4926_v40  ;;  %v4998_v33 = vld [vmem:[%s9528_s2 + $0x1ee8] sm:$0xff]  ;;  %v4735_v40 = vld [vmem:[%s9528_s2 + $0x1720] sm:$0xff] }
 0x21d   :  { %5801 = vmatpush3.msra.mxu1 %v4668_v35  ;;  %6038 = vmatpush3.msra.mxu0 %v4910_v43  ;;  %v4982_v35 = vld [vmem:[%s9528_s2 + $0x1e68] sm:$0xff]  ;;  %v4750_v43 = vld [vmem:[%s9528_s2 + $0x1798] sm:$0xff] }
 0x21e   :  { %5802 = vmatprep.subr.mxu1 %v4683_v37  ;;  %6039 = vmatprep.subr.mxu0 %v4925_v45  ;;  %v4997_v37 = vld [vmem:[%s9528_s2 + $0x1ee0] sm:$0xff]  ;;  %v4734_v45 = vld [vmem:[%s9528_s2 + $0x1718] sm:$0xff] }
 0x21f   :  { %5803 = vmatpush3.msra.mxu1 %v4667_v39  ;;  %6040 = vmatpush3.msra.mxu0 %v4909_v53  ;;  %v4981_v39 = vld [vmem:[%s9528_s2 + $0x1e60] sm:$0xff]  ;;  %v4749_v53 = vld [vmem:[%s9528_s2 + $0x1790] sm:$0xff] }
 0x220   :  { %5804 = vmatprep.subr.mxu1 %v4682_v41  ;;  %6041 = vmatprep.subr.mxu0 %v4924_v56  ;;  %v4996_v41 = vld [vmem:[%s9528_s2 + $0x1ed8] sm:$0xff]  ;;  %v4733_v56 = vld [vmem:[%s9528_s2 + $0x1710] sm:$0xff] }
 0x221   :  { %5805 = vmatpush3.msra.mxu1 %v4666_v44  ;;  %6042 = vmatpush3.msra.mxu0 %v4908_v60  ;;  %v4980_v44 = vld [vmem:[%s9528_s2 + $0x1e58] sm:$0xff]  ;;  %v4748_v60 = vld [vmem:[%s9528_s2 + $0x1788] sm:$0xff] }
 0x222   :  { %5806 = vmatprep.subr.mxu1 %v4681_v46  ;;  %6043 = vmatprep.subr.mxu0 %v4923_v49  ;;  %v4995_v46 = vld [vmem:[%s9528_s2 + $0x1ed0] sm:$0xff]  ;;  %v4732_v49 = vld [vmem:[%s9528_s2 + $0x1708] sm:$0xff] }
 0x223   :  { %5807 = vmatpush3.msra.mxu1 %v4665_v54  ;;  %6044 = vmatpush3.msra.mxu0 %v4907_v51  ;;  %v4979_v54 = vld [vmem:[%s9528_s2 + $0x1e50] sm:$0xff]  ;;  %v4993_v51 = vld [vmem:[%s9528_s2 + $0x1ec0] sm:$0xff] }
 0x224   :  { %5808 = vmatprep.subr.mxu1 %v4680_v57  ;;  %6045 = vmatprep.subr.mxu0 %v4922_v63  ;;  %v4994_v57 = vld [vmem:[%s9528_s2 + $0x1ec8] sm:$0xff]  ;;  %v4977_v63 = vld [vmem:[%s9528_s2 + $0x1e40] sm:$0xff] }
 0x225   :  { %5809 = vmatpush3.msra.mxu1 %v4664_v42  ;;  %6046 = vmatpush3.msra.mxu0 %v4906_v2  ;;  %v4978_v42 = vld [vmem:[%s9528_s2 + $0x1e48] sm:$0xff]  ;;  %v4814_v2 = vld [vmem:[%s9528_s2 + $0x1978] sm:$0xff] }
 0x226   :  { %5810 = vmatprep.subr.mxu1 %v4679_v50  ;;  %6047 = vmatprep.subr.mxu0 %v4921_v58  ;;  %v9036_v50 = vld.sshfl [vmem:[%s9530_s0 + $0x64] sm:$0x33 pattern:$0x76325410]  ;;  %v4976_v58 = vld [vmem:[%s9528_s2 + $0x1e38] sm:$0xff] }
 0x227   :  { %5811 = vmatpush3.msra.mxu1 %v4663_v62  ;;  %6048 = vmatpush3.msra.mxu0 %v4905_v4  ;;  %v4747_v62 = vld [vmem:[%s9528_s2 + $0x1780] sm:$0xff]  ;;  %v4991_v4 = vld [vmem:[%s9528_s2 + $0x1eb0] sm:$0xff] }
 0x228   :  { %2773 = vmatmul.mubr.f32.vlgmr.msra.gmra.mxu1 %v8654_v61  ;;  %5850 = vmatprep.subr.mxu1 %v4762_v0  ;;  %v4744_v61 = vld [vmem:[%s9528_s2 + $0x1768] sm:$0xff]  ;;  %v4731_v0 = vld [vmem:[%s9528_s2 + $0x1700] sm:$0xff] }
 0x229   :  { %5851 = vmatpush3.msra.mxu1 %v4746_v1  ;;  %3006 = vmatprep.mubr.f32.mxu1 %v2939_v52  ;;  %v4992_v52 = vld [vmem:[%s9528_s2 + $0x1eb8] sm:$0xff] }
 0x22a   :  { %5852 = vmatprep.subr.mxu1 %v4761_v55  ;;  %6049 = vmatprep.subr.mxu0 %v4920_v5  ;;  %v4830_v1 = vld [vmem:[%s9528_s2 + $0x19f8] sm:$0xff]  ;;  %v3173_v55 = vcombine.high %v9036_v50, %v9036_v50  ;;  %v4975_v5 = vld [vmem:[%s9528_s2 + $0x1e30] sm:$0xff] }
 0x22b   :  { %5853 = vmatpush3.msra.mxu1 %v4745_v3  ;;  %6050 = vmatpush3.msra.mxu0 %v4904_v7  ;;  %v4829_v3 = vld [vmem:[%s9528_s2 + $0x19f0] sm:$0xff]  ;;  %v4827_v7 = vld [vmem:[%s9528_s2 + $0x19e0] sm:$0xff] }
 0x22c   :  { %5854 = vmatprep.subr.mxu1 %v4760_v59  ;;  %6051 = vmatprep.subr.mxu0 %v4919_v9  ;;  %v4813_v59 = vld [vmem:[%s9528_s2 + $0x1970] sm:$0xff]  ;;  %v4811_v9 = vld [vmem:[%s9528_s2 + $0x1960] sm:$0xff] }
 0x22d   :  { %5855 = vmatpush3.msra.mxu1 %v4744_v61  ;;  %6052 = vmatpush3.msra.mxu0 %v4903_v11  ;;  %v4828_v61 = vld [vmem:[%s9528_s2 + $0x19e8] sm:$0xff]  ;;  %v4826_v11 = vld [vmem:[%s9528_s2 + $0x19d8] sm:$0xff] }
 0x22e   :  { %5856 = vmatprep.subr.mxu1 %v4759_v6  ;;  %6053 = vmatprep.subr.mxu0 %v4918_v13  ;;  %v4990_v6 = vld [vmem:[%s9528_s2 + $0x1ea8] sm:$0xff]  ;;  %v4810_v13 = vld [vmem:[%s9528_s2 + $0x1958] sm:$0xff] }
 0x22f   :  { %5857 = vmatpush3.msra.mxu1 %v4743_v8  ;;  %6054 = vmatpush3.msra.mxu0 %v4902_v16  ;;  %v4974_v8 = vld [vmem:[%s9528_s2 + $0x1e28] sm:$0xff]  ;;  %v4972_v16 = vld [vmem:[%s9528_s2 + $0x1e18] sm:$0xff] }
 0x230   :  { %5858 = vmatprep.subr.mxu1 %v4758_v10  ;;  %6055 = vmatprep.subr.mxu0 %v4917_v18  ;;  %v4989_v10 = vld [vmem:[%s9528_s2 + $0x1ea0] sm:$0xff]  ;;  %v4987_v18 = vld [vmem:[%s9528_s2 + $0x1e90] sm:$0xff] }
 0x231   :  { %5859 = vmatpush3.msra.mxu1 %v4742_v12  ;;  %6056 = vmatpush3.msra.mxu0 %v4901_v20  ;;  %v4973_v12 = vld [vmem:[%s9528_s2 + $0x1e20] sm:$0xff]  ;;  %v4971_v20 = vld [vmem:[%s9528_s2 + $0x1e10] sm:$0xff] }
 0x232   :  { %5860 = vmatprep.subr.mxu1 %v4757_v15  ;;  %3591 = vmatprep.mubr.f32.mxu0 %v3524_v21  ;;  %v4825_v15 = vld [vmem:[%s9528_s2 + $0x19d0] sm:$0xff]  ;;  %v4808_v21 = vld [vmem:[%s9528_s2 + $0x1948] sm:$0xff] }
 0x233   :  { %5861 = vmatpush3.msra.mxu1 %v4741_v17  ;;  %3592 = vmatmul.mubr.f32.vlgmr.msra.gmra.mxu0 %v4933_v14  ;;  %v4988_v14 = vld [vmem:[%s9528_s2 + $0x1e98] sm:$0xff]  ;;  %v4809_v17 = vld [vmem:[%s9528_s2 + $0x1950] sm:$0xff] }
 0x234   :  { %5862 = vmatprep.subr.mxu1 %v4756_v19  ;;  %6095 = vmatprep.subr.mxu0 %v5000_v25  ;;  %v4824_v19 = vld [vmem:[%s9528_s2 + $0x19c8] sm:$0xff] }
 0x235   :  { %5863 = vmatpush3.msra.mxu1 %v4740_v22  ;;  %6096 = vmatpush3.msra.mxu0 %v4984_v27  ;;  %v4986_v22 = vld [vmem:[%s9528_s2 + $0x1e88] sm:$0xff]  ;;  %v4985_v27 = vld [vmem:[%s9528_s2 + $0x1e80] sm:$0xff] }
 0x236   :  { %5864 = vmatprep.subr.mxu1 %v4755_v23  ;;  %6097 = vmatprep.subr.mxu0 %v4999_v29  ;;  %v5001_v23 = vld.sshfl [vmem:[%s9530_s0 + $0x78] sm:$0x33 pattern:$0x76325410]  ;;  %v4970_v25 = vld [vmem:[%s9528_s2 + $0x1e08] sm:$0xff]  ;;  %v4969_v29 = vld [vmem:[%s9528_s2 + $0x1e00] sm:$0xff] }
 0x237   :  { %5865 = vmatpush3.msra.mxu1 %v4739_v24  ;;  %6098 = vmatpush3.msra.mxu0 %v4983_v31  ;;  %v4823_v24 = vld [vmem:[%s9528_s2 + $0x19c0] sm:$0xff]  ;;  %v4806_v31 = vld [vmem:[%s9528_s2 + $0x1938] sm:$0xff] }
 0x238   :  { %5866 = vmatprep.subr.mxu1 %v4754_v26  ;;  %6099 = vmatprep.subr.mxu0 %v4998_v33  ;;  %v4807_v26 = vld [vmem:[%s9528_s2 + $0x1940] sm:$0xff]  ;;  %v4805_v33 = vld [vmem:[%s9528_s2 + $0x1930] sm:$0xff] }
 0x239   :  { %5867 = vmatpush3.msra.mxu1 %v4738_v28  ;;  %6100 = vmatpush3.msra.mxu0 %v4982_v35  ;;  %v4822_v28 = vld [vmem:[%s9528_s2 + $0x19b8] sm:$0xff]  ;;  %v4804_v35 = vld [vmem:[%s9528_s2 + $0x1928] sm:$0xff] }
 0x23a   :  { %5868 = vmatprep.subr.mxu1 %v4753_v30  ;;  %6101 = vmatprep.subr.mxu0 %v4997_v37  ;;  %v3758_v30 = vcombine.high %v5001_v23, %v5001_v23  ;;  %v4803_v37 = vld [vmem:[%s9528_s2 + $0x1920] sm:$0xff] }
 0x23b   :  { %5869 = vmatpush3.msra.mxu1 %v4737_v32  ;;  %6102 = vmatpush3.msra.mxu0 %v4981_v39  ;;  %v4821_v32 = vld [vmem:[%s9528_s2 + $0x19b0] sm:$0xff]  ;;  %v4802_v39 = vld [vmem:[%s9528_s2 + $0x1918] sm:$0xff] }
 0x23c   :  { %5870 = vmatprep.subr.mxu1 %v4752_v34  ;;  %6103 = vmatprep.subr.mxu0 %v4996_v41  ;;  %v4820_v34 = vld [vmem:[%s9528_s2 + $0x19a8] sm:$0xff]  ;;  %v4801_v41 = vld [vmem:[%s9528_s2 + $0x1910] sm:$0xff] }
 0x23d   :  { %5871 = vmatpush3.msra.mxu1 %v4736_v36  ;;  %6104 = vmatpush3.msra.mxu0 %v4980_v44  ;;  %v4819_v36 = vld [vmem:[%s9528_s2 + $0x19a0] sm:$0xff]  ;;  %v4800_v44 = vld [vmem:[%s9528_s2 + $0x1908] sm:$0xff] }
 0x23e   :  { %5872 = vmatprep.subr.mxu1 %v4751_v38  ;;  %6105 = vmatprep.subr.mxu0 %v4995_v46  ;;  %v4818_v38 = vld [vmem:[%s9528_s2 + $0x1998] sm:$0xff]  ;;  %v4815_v46 = vld [vmem:[%s9528_s2 + $0x1980] sm:$0xff] }
 0x23f   :  { %5873 = vmatpush3.msra.mxu1 %v4735_v40  ;;  %6106 = vmatpush3.msra.mxu0 %v4979_v54  ;;  %v4817_v40 = vld [vmem:[%s9528_s2 + $0x1990] sm:$0xff]  ;;  %v4898_v54 = vld [vmem:[%s9528_s2 + $0x1bf8] sm:$0xff] }
 0x240   :  { %5874 = vmatprep.subr.mxu1 %v4750_v43  ;;  %6107 = vmatprep.subr.mxu0 %v4994_v57  ;;  %v4816_v43 = vld [vmem:[%s9528_s2 + $0x1988] sm:$0xff]  ;;  %v4882_v57 = vld [vmem:[%s9528_s2 + $0x1b78] sm:$0xff] }
 0x241   :  { %5875 = vmatpush3.msra.mxu1 %v4734_v45  ;;  %6108 = vmatpush3.msra.mxu0 %v4978_v42  ;;  %v9197_v45 = vld.sshfl [vmem:[%s9530_s0 + $0x6c] sm:$0x33 pattern:$0x76325410]  ;;  %v4881_v42 = vld [vmem:[%s9528_s2 + $0x1b70] sm:$0xff] }
 0x242   :  { %5876 = vmatprep.subr.mxu1 %v4749_v53  ;;  %6109 = vmatprep.subr.mxu0 %v4993_v51  ;;  %v4799_v53 = vld [vmem:[%s9528_s2 + $0x1900] sm:$0xff]  ;;  %v4880_v51 = vld [vmem:[%s9528_s2 + $0x1b68] sm:$0xff] }
 0x243   :  { %5877 = vmatpush3.msra.mxu1 %v4733_v56  ;;  %6110 = vmatpush3.msra.mxu0 %v4977_v63  ;;  %v3407_v56 = vcombine.high %v9197_v45, %v9197_v45  ;;  %v4894_v63 = vld [vmem:[%s9528_s2 + $0x1bd8] sm:$0xff] }
 0x244   :  { %5878 = vmatprep.subr.mxu1 %v4748_v60  ;;  %6111 = vmatprep.subr.mxu0 %v4992_v52  ;;  %v4897_v60 = vld [vmem:[%s9528_s2 + $0x1bf0] sm:$0xff] }
 0x245   :  { %5879 = vmatpush3.msra.mxu1 %v4732_v49  ;;  %6112 = vmatpush3.msra.mxu0 %v4976_v58  ;;  %v4896_v49 = vld [vmem:[%s9528_s2 + $0x1be8] sm:$0xff]  ;;  %v4893_v52 = vld [vmem:[%s9528_s2 + $0x1bd0] sm:$0xff]  ;;  %v4875_v58 = vld [vmem:[%s9528_s2 + $0x1b40] sm:$0xff] }
 0x246   :  { %5880 = vmatprep.subr.mxu1 %v4747_v62  ;;  %6113 = vmatprep.subr.mxu0 %v4991_v4  ;;  %v4879_v62 = vld [vmem:[%s9528_s2 + $0x1b60] sm:$0xff]  ;;  %v4874_v4 = vld [vmem:[%s9528_s2 + $0x1b38] sm:$0xff] }
 0x247   :  { %5881 = vmatpush3.msra.mxu1 %v4731_v0  ;;  %6114 = vmatpush3.msra.mxu0 %v4975_v5  ;;  %v4878_v0 = vld [vmem:[%s9528_s2 + $0x1b58] sm:$0xff]  ;;  %v4873_v5 = vld [vmem:[%s9528_s2 + $0x1b30] sm:$0xff] }
 0x248   :  { %3007 = vmatmul.mubr.f32.vlgmr.msra.gmra.mxu1 %v8845_v48  ;;  %5920 = vmatprep.subr.mxu1 %v4830_v1  ;;  %v4812_v48 = vld [vmem:[%s9528_s2 + $0x1968] sm:$0xff]  ;;  %v4877_v1 = vld [vmem:[%s9528_s2 + $0x1b50] sm:$0xff] }
 0x249   :  { %5921 = vmatpush3.msra.mxu1 %v4814_v2  ;;  %3240 = vmatprep.mubr.f32.mxu1 %v3173_v55  ;;  %v4892_v55 = vld [vmem:[%s9528_s2 + $0x1bc8] sm:$0xff] }
 0x24a   :  { %5922 = vmatprep.subr.mxu1 %v4829_v3  ;;  %6115 = vmatprep.subr.mxu0 %v4990_v6  ;;  %v4876_v2 = vld [vmem:[%s9528_s2 + $0x1b48] sm:$0xff]  ;;  %v4891_v3 = vld [vmem:[%s9528_s2 + $0x1bc0] sm:$0xff] }
 0x24b   :  { %5923 = vmatpush3.msra.mxu1 %v4813_v59  ;;  %6116 = vmatpush3.msra.mxu0 %v4974_v8  ;;  %v4890_v59 = vld [vmem:[%s9528_s2 + $0x1bb8] sm:$0xff]  ;;  %v4872_v6 = vld [vmem:[%s9528_s2 + $0x1b28] sm:$0xff]  ;;  %v4871_v8 = vld [vmem:[%s9528_s2 + $0x1b20] sm:$0xff] }
 0x24c   :  { %5924 = vmatprep.subr.mxu1 %v4828_v61  ;;  %6117 = vmatprep.subr.mxu0 %v4989_v10  ;;  %v4889_v61 = vld [vmem:[%s9528_s2 + $0x1bb0] sm:$0xff]  ;;  %v4870_v10 = vld [vmem:[%s9528_s2 + $0x1b18] sm:$0xff] }
 0x24d   :  { %5925 = vmatpush3.msra.mxu1 %v4812_v48  ;;  %6118 = vmatpush3.msra.mxu0 %v4973_v12  ;;  %v4888_v48 = vld [vmem:[%s9528_s2 + $0x1ba8] sm:$0xff]  ;;  %v4869_v12 = vld [vmem:[%s9528_s2 + $0x1b10] sm:$0xff] }
 0x24e   :  { %5926 = vmatprep.subr.mxu1 %v4827_v7  ;;  %6119 = vmatprep.subr.mxu0 %v4988_v14  ;;  %v4887_v7 = vld [vmem:[%s9528_s2 + $0x1ba0] sm:$0xff]  ;;  %v4868_v14 = vld [vmem:[%s9528_s2 + $0x1b08] sm:$0xff] }
 0x24f   :  { %5927 = vmatpush3.msra.mxu1 %v4811_v9  ;;  %6120 = vmatpush3.msra.mxu0 %v4972_v16  ;;  %v4886_v9 = vld [vmem:[%s9528_s2 + $0x1b98] sm:$0xff]  ;;  %v4883_v16 = vld [vmem:[%s9528_s2 + $0x1b80] sm:$0xff] }
 0x250   :  { %5928 = vmatprep.subr.mxu1 %v4826_v11  ;;  %6121 = vmatprep.subr.mxu0 %v4987_v18  ;;  %v4885_v11 = vld [vmem:[%s9528_s2 + $0x1b90] sm:$0xff]  ;;  %v4966_v18 = vld [vmem:[%s9528_s2 + $0x1df8] sm:$0xff] }
 0x251   :  { %5929 = vmatpush3.msra.mxu1 %v4810_v13  ;;  %6122 = vmatpush3.msra.mxu0 %v4971_v20  ;;  %v4884_v13 = vld [vmem:[%s9528_s2 + $0x1b88] sm:$0xff]  ;;  %v4950_v20 = vld [vmem:[%s9528_s2 + $0x1d78] sm:$0xff] }
 0x252   :  { %5930 = vmatprep.subr.mxu1 %v4825_v15  ;;  %6123 = vmatprep.subr.mxu0 %v4986_v22  ;;  %v9301_v15 = vld.sshfl [vmem:[%s9530_s0 + $0x74] sm:$0x33 pattern:$0x76325410] }
 0x253   :  { %5931 = vmatpush3.msra.mxu1 %v4809_v17  ;;  %6124 = vmatpush3.msra.mxu0 %v4970_v25  ;;  %v4867_v17 = vld [vmem:[%s9528_s2 + $0x1b00] sm:$0xff]  ;;  %v4949_v22 = vld [vmem:[%s9528_s2 + $0x1d70] sm:$0xff] }
 0x254   :  { %5932 = vmatprep.subr.mxu1 %v4824_v19  ;;  %6125 = vmatprep.subr.mxu0 %v4985_v27  ;;  %v3641_v19 = vcombine.high %v9301_v15, %v9301_v15  ;;  %v4963_v25 = vld [vmem:[%s9528_s2 + $0x1de0] sm:$0xff]  ;;  %v4962_v27 = vld [vmem:[%s9528_s2 + $0x1dd8] sm:$0xff] }
 0x255   :  { %5933 = vmatpush3.msra.mxu1 %v4808_v21  ;;  %6126 = vmatpush3.msra.mxu0 %v4969_v29  ;;  %v4965_v21 = vld [vmem:[%s9528_s2 + $0x1df0] sm:$0xff] }
 0x256   :  { %5934 = vmatprep.subr.mxu1 %v4823_v24  ;;  %3825 = vmatprep.mubr.f32.mxu0 %v3758_v30  ;;  %v4948_v24 = vld [vmem:[%s9528_s2 + $0x1d68] sm:$0xff]  ;;  %v4961_v29 = vld [vmem:[%s9528_s2 + $0x1dd0] sm:$0xff] }
 0x257   :  { %5935 = vmatpush3.msra.mxu1 %v4807_v26  ;;  %3826 = vmatmul.mubr.f32.vlgmr.msra.gmra.mxu0 %v5001_v23  ;;  %v4964_v23 = vld [vmem:[%s9528_s2 + $0x1de8] sm:$0xff]  ;;  %v4947_v26 = vld [vmem:[%s9528_s2 + $0x1d60] sm:$0xff]  ;;  %v4945_v30 = vld [vmem:[%s9528_s2 + $0x1d50] sm:$0xff] }
 0x258   :  { %5936 = vmatprep.subr.mxu1 %v4822_v28  ;;  %v4946_v28 = vld [vmem:[%s9528_s2 + $0x1d58] sm:$0xff] }
 0x259   :  { %5937 = vmatpush3.msra.mxu1 %v4806_v31  ;;  %v4960_v31 = vld [vmem:[%s9528_s2 + $0x1dc8] sm:$0xff] }
 0x25a   :  { %5938 = vmatprep.subr.mxu1 %v4821_v32  ;;  %v4944_v32 = vld [vmem:[%s9528_s2 + $0x1d48] sm:$0xff] }
 0x25b   :  { %5939 = vmatpush3.msra.mxu1 %v4805_v33  ;;  %v4959_v33 = vld [vmem:[%s9528_s2 + $0x1dc0] sm:$0xff] }
 0x25c   :  { %5940 = vmatprep.subr.mxu1 %v4820_v34  ;;  %v4943_v34 = vld [vmem:[%s9528_s2 + $0x1d40] sm:$0xff] }
 0x25d   :  { %5941 = vmatpush3.msra.mxu1 %v4804_v35  ;;  %v4958_v35 = vld [vmem:[%s9528_s2 + $0x1db8] sm:$0xff] }
 0x25e   :  { %5942 = vmatprep.subr.mxu1 %v4819_v36  ;;  %v4942_v36 = vld [vmem:[%s9528_s2 + $0x1d38] sm:$0xff] }
 0x25f   :  { %5943 = vmatpush3.msra.mxu1 %v4803_v37  ;;  %v4957_v37 = vld [vmem:[%s9528_s2 + $0x1db0] sm:$0xff] }
 0x260   :  { %5944 = vmatprep.subr.mxu1 %v4818_v38  ;;  %v4941_v38 = vld [vmem:[%s9528_s2 + $0x1d30] sm:$0xff] }
 0x261   :  { %5945 = vmatpush3.msra.mxu1 %v4802_v39  ;;  %v4956_v39 = vld [vmem:[%s9528_s2 + $0x1da8] sm:$0xff] }
 0x262   :  { %5946 = vmatprep.subr.mxu1 %v4817_v40  ;;  %v4940_v40 = vld [vmem:[%s9528_s2 + $0x1d28] sm:$0xff] }
 0x263   :  { %5947 = vmatpush3.msra.mxu1 %v4801_v41  ;;  %v4955_v41 = vld [vmem:[%s9528_s2 + $0x1da0] sm:$0xff] }
 0x264   :  { %5948 = vmatprep.subr.mxu1 %v4816_v43  ;;  %v4939_v43 = vld [vmem:[%s9528_s2 + $0x1d20] sm:$0xff] }
 0x265   :  { %5949 = vmatpush3.msra.mxu1 %v4800_v44  ;;  %v4954_v44 = vld [vmem:[%s9528_s2 + $0x1d98] sm:$0xff] }
 0x266   :  { %5950 = vmatprep.subr.mxu1 %v4815_v46  ;;  %v4953_v46 = vld [vmem:[%s9528_s2 + $0x1d90] sm:$0xff] }
 0x267   :  { %5951 = vmatpush3.msra.mxu1 %v4799_v53  ;;  %v4937_v53 = vld [vmem:[%s9528_s2 + $0x1d10] sm:$0xff] }
 0x268   :  { %3241 = vmatmul.mubr.f32.vlgmr.msra.gmra.mxu1 %v9036_v50  ;;  %5990 = vmatprep.subr.mxu1 %v4898_v54  ;;  %v4895_v50 = vld [vmem:[%s9528_s2 + $0x1be0] sm:$0xff]  ;;  %v4952_v54 = vld [vmem:[%s9528_s2 + $0x1d88] sm:$0xff] }
 0x269   :  { %5991 = vmatpush3.msra.mxu1 %v4882_v57  ;;  %3474 = vmatprep.mubr.f32.mxu1 %v3407_v56  ;;  %v4936_v56 = vld [vmem:[%s9528_s2 + $0x1d08] sm:$0xff]  ;;  %v9405_v57 = vld.sshfl [vmem:[%s9530_s0 + $0x7c] sm:$0x33 pattern:$0x76325410] }
 0x26a   :  { %5992 = vmatprep.subr.mxu1 %v4897_v60  ;;  %v4951_v60 = vld [vmem:[%s9528_s2 + $0x1d80] sm:$0xff] }
 0x26b   :  { %5993 = vmatpush3.msra.mxu1 %v4881_v42  ;;  %v4935_v42 = vld [vmem:[%s9528_s2 + $0x1d00] sm:$0xff] }
 0x26c   :  { %5994 = vmatprep.subr.mxu1 %v4896_v49  ;;  %v5034_v49 = vld [vmem:[%s9528_s2 + $0x1ff8] sm:$0xff] }
 0x26d   :  { %5995 = vmatpush3.msra.mxu1 %v4880_v51  ;;  %v3875_v51 = vcombine.high %v9405_v57, %v9405_v57 }
 0x26e   :  { %5996 = vmatprep.subr.mxu1 %v4895_v50  ;;  %v5018_v50 = vld [vmem:[%s9528_s2 + $0x1f78] sm:$0xff] }
 0x26f   :  { %5997 = vmatpush3.msra.mxu1 %v4879_v62  ;;  %v5033_v62 = vld [vmem:[%s9528_s2 + $0x1ff0] sm:$0xff] }
 0x270   :  { %5998 = vmatprep.subr.mxu1 %v4894_v63  ;;  %v5017_v63 = vld [vmem:[%s9528_s2 + $0x1f70] sm:$0xff] }
 0x271   :  { %5999 = vmatpush3.msra.mxu1 %v4878_v0  ;;  %v5032_v0 = vld [vmem:[%s9528_s2 + $0x1fe8] sm:$0xff] }
 0x272   :  { %6000 = vmatprep.subr.mxu1 %v4893_v52  ;;  %v5016_v52 = vld [vmem:[%s9528_s2 + $0x1f68] sm:$0xff] }
 0x273   :  { %6001 = vmatpush3.msra.mxu1 %v4877_v1  ;;  %v5031_v1 = vld [vmem:[%s9528_s2 + $0x1fe0] sm:$0xff] }
 0x274   :  { %6002 = vmatprep.subr.mxu1 %v4892_v55  ;;  %v5015_v55 = vld [vmem:[%s9528_s2 + $0x1f60] sm:$0xff] }
 0x275   :  { %6003 = vmatpush3.msra.mxu1 %v4876_v2  ;;  %v5030_v2 = vld [vmem:[%s9528_s2 + $0x1fd8] sm:$0xff] }
 0x276   :  { %6004 = vmatprep.subr.mxu1 %v4891_v3  ;;  %v5014_v3 = vld [vmem:[%s9528_s2 + $0x1f58] sm:$0xff] }
 0x277   :  { %6005 = vmatpush3.msra.mxu1 %v4875_v58  ;;  %v5029_v58 = vld [vmem:[%s9528_s2 + $0x1fd0] sm:$0xff] }
 0x278   :  { %6006 = vmatprep.subr.mxu1 %v4890_v59  ;;  %v5013_v59 = vld [vmem:[%s9528_s2 + $0x1f50] sm:$0xff] }
 0x279   :  { %6007 = vmatpush3.msra.mxu1 %v4874_v4  ;;  %v5028_v4 = vld [vmem:[%s9528_s2 + $0x1fc8] sm:$0xff] }
 0x27a   :  { %6008 = vmatprep.subr.mxu1 %v4889_v61  ;;  %v5012_v61 = vld [vmem:[%s9528_s2 + $0x1f48] sm:$0xff] }
 0x27b   :  { %6009 = vmatpush3.msra.mxu1 %v4873_v5  ;;  %v5027_v5 = vld [vmem:[%s9528_s2 + $0x1fc0] sm:$0xff] }
 0x27c   :  { %6010 = vmatprep.subr.mxu1 %v4888_v48  ;;  %v5011_v48 = vld [vmem:[%s9528_s2 + $0x1f40] sm:$0xff] }
 0x27d   :  { %6011 = vmatpush3.msra.mxu1 %v4872_v6  ;;  %v5026_v6 = vld [vmem:[%s9528_s2 + $0x1fb8] sm:$0xff] }
 0x27e   :  { %6012 = vmatprep.subr.mxu1 %v4887_v7  ;;  %v5010_v7 = vld [vmem:[%s9528_s2 + $0x1f38] sm:$0xff] }
 0x27f   :  { %6013 = vmatpush3.msra.mxu1 %v4871_v8  ;;  %v5025_v8 = vld [vmem:[%s9528_s2 + $0x1fb0] sm:$0xff] }
 0x280   :  { %6014 = vmatprep.subr.mxu1 %v4886_v9  ;;  %v5009_v9 = vld [vmem:[%s9528_s2 + $0x1f30] sm:$0xff] }
 0x281   :  { %6015 = vmatpush3.msra.mxu1 %v4870_v10  ;;  %v5024_v10 = vld [vmem:[%s9528_s2 + $0x1fa8] sm:$0xff] }
 0x282   :  { %6016 = vmatprep.subr.mxu1 %v4885_v11  ;;  %v5008_v11 = vld [vmem:[%s9528_s2 + $0x1f28] sm:$0xff] }
 0x283   :  { %6017 = vmatpush3.msra.mxu1 %v4869_v12  ;;  %v5023_v12 = vld [vmem:[%s9528_s2 + $0x1fa0] sm:$0xff] }
 0x284   :  { %6018 = vmatprep.subr.mxu1 %v4884_v13  ;;  %v5007_v13 = vld [vmem:[%s9528_s2 + $0x1f20] sm:$0xff] }
 0x285   :  { %6019 = vmatpush3.msra.mxu1 %v4868_v14  ;;  %v5022_v14 = vld [vmem:[%s9528_s2 + $0x1f98] sm:$0xff] }
 0x286   :  { %6020 = vmatprep.subr.mxu1 %v4883_v16  ;;  %v5021_v16 = vld [vmem:[%s9528_s2 + $0x1f90] sm:$0xff] }
 0x287   :  { %6021 = vmatpush3.msra.mxu1 %v4867_v17  ;;  %v5005_v17 = vld [vmem:[%s9528_s2 + $0x1f10] sm:$0xff] }
 0x288   :  { %3475 = vmatmul.mubr.f32.vlgmr.msra.gmra.mxu1 %v9197_v45  ;;  %6060 = vmatprep.subr.mxu1 %v4966_v18  ;;  %v4938_v45 = vld [vmem:[%s9528_s2 + $0x1d18] sm:$0xff]  ;;  %v5020_v18 = vld [vmem:[%s9528_s2 + $0x1f88] sm:$0xff] }
 0x289   :  { %6061 = vmatpush3.msra.mxu1 %v4950_v20  ;;  %3708 = vmatprep.mubr.f32.mxu1 %v3641_v19  ;;  %v5004_v19 = vld [vmem:[%s9528_s2 + $0x1f08] sm:$0xff]  ;;  %v5019_v20 = vld [vmem:[%s9528_s2 + $0x1f80] sm:$0xff] }
 0x28a   :  { %6062 = vmatprep.subr.mxu1 %v4965_v21  ;;  %v5003_v21 = vld [vmem:[%s9528_s2 + $0x1f00] sm:$0xff] }
 0x28b   :  { %6063 = vmatpush3.msra.mxu1 %v4949_v22  ;;  %v14_v22 = vstv %s9532_s8 }
 0x28c   :  { %6064 = vmatprep.subr.mxu1 %v4964_v23  ;;  %15 = vst [vmem:[#allocation2] sm:$0x1] %v14_v22  ;;  %v5077_v23 = vpop.f32.mrf.mxu0 }
 0x28d   :  { %6065 = vmatpush3.msra.mxu1 %v4948_v24  ;;  %v5112_v24 = vpop.f32.mrf.mxu1 }
 0x28e   :  { %6066 = vmatprep.subr.mxu1 %v4963_v25  ;;  %v3979_v25 = vld [vmem:[%s9533_s4] ss:$0 sm:$0xff] }
 0x28f   :  { %6067 = vmatpush3.msra.mxu1 %v4947_v26  ;;  %v5078_v26 = vpop.f32.mrf.mxu0 }
 0x290   :  { %6068 = vmatprep.subr.mxu1 %v4962_v27  ;;  %v5113_v27 = vpop.f32.mrf.mxu1 }
 0x291   :  { %6069 = vmatpush3.msra.mxu1 %v4946_v28  ;;  %v5147_v28 = vpop.f32.mrf.mxu0 }
 0x292   :  { %6070 = vmatprep.subr.mxu1 %v4961_v29  ;;  %v204_v29 = vadd.f32 %v3979_v25, %v7917_v47 }
 0x293   :  { %6071 = vmatpush3.msra.mxu1 %v4945_v30  ;;  %v5079_v30 = vadd.f32 %v5078_v26, %v5077_v23 }
 0x294   :  { %6072 = vmatprep.subr.mxu1 %v4960_v31  ;;  %v5182_v31 = vpop.f32.mrf.mxu1 }
 0x295   :  { %6073 = vmatpush3.msra.mxu1 %v4944_v32  ;;  %v5114_v32 = vadd.f32 %v5113_v27, %v5112_v24 }
 0x296   :  { %6074 = vmatprep.subr.mxu1 %v4959_v33  ;;  %v5148_v33 = vpop.f32.mrf.mxu0 }
 0x297   :  { %6075 = vmatpush3.msra.mxu1 %v4943_v34  ;;  %v321_v34 = vadd.f32 %v5079_v30, %v204_v29 }
 0x298   :  { %6076 = vmatprep.subr.mxu1 %v4958_v35  ;;  %v5183_v35 = vpop.f32.mrf.mxu1 }
 0x299   :  { %6077 = vmatpush3.msra.mxu1 %v4942_v36  ;;  %v5217_v36 = vpop.f32.mrf.mxu0 }
 0x29a   :  { %6078 = vmatprep.subr.mxu1 %v4957_v37  ;;  %v438_v37 = vadd.f32 %v5114_v32, %v321_v34 }
 0x29b   :  { %6079 = vmatpush3.msra.mxu1 %v4941_v38  ;;  %v5149_v38 = vadd.f32 %v5148_v33, %v5147_v28 }
 0x29c   :  { %6080 = vmatprep.subr.mxu1 %v4956_v39  ;;  %v5252_v39 = vpop.f32.mrf.mxu1 }
 0x29d   :  { %6081 = vmatpush3.msra.mxu1 %v4940_v40  ;;  %v5184_v40 = vadd.f32 %v5183_v35, %v5182_v31 }
 0x29e   :  { %6082 = vmatprep.subr.mxu1 %v4955_v41  ;;  %v5218_v41 = vpop.f32.mrf.mxu0 }
 0x29f   :  { %6083 = vmatpush3.msra.mxu1 %v4939_v43  ;;  %v555_v43 = vadd.f32 %v5149_v38, %v438_v37 }
 0x2a0   :  { %6084 = vmatprep.subr.mxu1 %v4954_v44  ;;  %v5253_v44 = vpop.f32.mrf.mxu1 }
 0x2a1   :  { %6085 = vmatpush3.msra.mxu1 %v4938_v45  ;;  %v5287_v45 = vpop.f32.mrf.mxu0 }
 0x2a2   :  { %6086 = vmatprep.subr.mxu1 %v4953_v46  ;;  %v672_v46 = vadd.f32 %v5184_v40, %v555_v43 }
 0x2a3   :  { %6087 = vmatpush3.msra.mxu1 %v4937_v53  ;;  %v5219_v53 = vadd.f32 %v5218_v41, %v5217_v36  ;;  %v5288_v47 = vpop.f32.mrf.mxu0 }
 0x2a4   :  { %6088 = vmatprep.subr.mxu1 %v4952_v54  ;;  %v5322_v54 = vpop.f32.mrf.mxu1 }
 0x2a5   :  { %6089 = vmatpush3.msra.mxu1 %v4936_v56  ;;  %v5254_v56 = vadd.f32 %v5253_v44, %v5252_v39 }
 0x2a6   :  { %6090 = vmatprep.subr.mxu1 %v4951_v60  ;;  %v5323_v60 = vpop.f32.mrf.mxu1 }
 0x2a7   :  { %6091 = vmatpush3.msra.mxu1 %v4935_v42  ;;  %v5357_v42 = vpop.f32.mrf.mxu0 }
 0x2a8   :  { %3709 = vmatmul.mubr.f32.vlgmr.msra.gmra.mxu1 %v9301_v15  ;;  %6130 = vmatprep.subr.mxu1 %v5034_v49  ;;  %v5006_v15 = vld [vmem:[%s9528_s2 + $0x1f18] sm:$0xff] }
 0x2a9   :  { %6131 = vmatpush3.msra.mxu1 %v5018_v50  ;;  %3942 = vmatprep.mubr.f32.mxu1 %v3875_v51  ;;  %v5289_v51 = vadd.f32 %v5288_v47, %v5287_v45  ;;  %v5392_v50 = vpop.f32.mrf.mxu1 }
 0x2aa   :  { %6132 = vmatprep.subr.mxu1 %v5033_v62  ;;  %v5324_v62 = vadd.f32 %v5323_v60, %v5322_v54 }
 0x2ab   :  { %6133 = vmatpush3.msra.mxu1 %v5017_v63  ;;  %v5358_v63 = vpop.f32.mrf.mxu0 }
 0x2ac   :  { %6134 = vmatprep.subr.mxu1 %v5032_v0 }
 0x2ad   :  { %6135 = vmatpush3.msra.mxu1 %v5016_v52  ;;  %v5393_v52 = vpop.f32.mrf.mxu1 }
 0x2ae   :  { %6136 = vmatprep.subr.mxu1 %v5031_v1  ;;  %v5427_v1 = vpop.f32.mrf.mxu0 }
 0x2af   :  { %6137 = vmatpush3.msra.mxu1 %v5015_v55 }
 0x2b0   :  { %6138 = vmatprep.subr.mxu1 %v5030_v2  ;;  %v5359_v2 = vadd.f32 %v5358_v63, %v5357_v42 }
 0x2b1   :  { %6139 = vmatpush3.msra.mxu1 %v5014_v3  ;;  %v5462_v3 = vpop.f32.mrf.mxu1 }
 0x2b2   :  { %6140 = vmatprep.subr.mxu1 %v5029_v58  ;;  %v5394_v58 = vadd.f32 %v5393_v52, %v5392_v50 }
 0x2b3   :  { %6141 = vmatpush3.msra.mxu1 %v5013_v59  ;;  %v5428_v59 = vpop.f32.mrf.mxu0 }
 0x2b4   :  { %6142 = vmatprep.subr.mxu1 %v5028_v4 }
 0x2b5   :  { %6143 = vmatpush3.msra.mxu1 %v5012_v61  ;;  %v5463_v61 = vpop.f32.mrf.mxu1 }
 0x2b6   :  { %6144 = vmatprep.subr.mxu1 %v5027_v5  ;;  %v5497_v5 = vpop.f32.mrf.mxu0 }
 0x2b7   :  { %6145 = vmatpush3.msra.mxu1 %v5011_v48 }
 0x2b8   :  { %6146 = vmatprep.subr.mxu1 %v5026_v6  ;;  %v5429_v6 = vadd.f32 %v5428_v59, %v5427_v1 }
 0x2b9   :  { %6147 = vmatpush3.msra.mxu1 %v5010_v7  ;;  %v5532_v7 = vpop.f32.mrf.mxu1 }
 0x2ba   :  { %6148 = vmatprep.subr.mxu1 %v5025_v8  ;;  %v5464_v8 = vadd.f32 %v5463_v61, %v5462_v3 }
 0x2bb   :  { %6149 = vmatpush3.msra.mxu1 %v5009_v9  ;;  %v5498_v9 = vpop.f32.mrf.mxu0 }
 0x2bc   :  { %6150 = vmatprep.subr.mxu1 %v5024_v10 }
 0x2bd   :  { %6151 = vmatpush3.msra.mxu1 %v5008_v11  ;;  %v5533_v11 = vpop.f32.mrf.mxu1 }
 0x2be   :  { %6152 = vmatprep.subr.mxu1 %v5023_v12  ;;  %v5567_v12 = vpop.f32.mrf.mxu0 }
 0x2bf   :  { %6153 = vmatpush3.msra.mxu1 %v5007_v13 }
 0x2c0   :  { %6154 = vmatprep.subr.mxu1 %v5022_v14  ;;  %v5499_v14 = vadd.f32 %v5498_v9, %v5497_v5 }
 0x2c1   :  { %6155 = vmatpush3.msra.mxu1 %v5006_v15  ;;  %v5602_v15 = vpop.f32.mrf.mxu1 }
 0x2c2   :  { %6156 = vmatprep.subr.mxu1 %v5021_v16  ;;  %v5534_v16 = vadd.f32 %v5533_v11, %v5532_v7 }
 0x2c3   :  { %6157 = vmatpush3.msra.mxu1 %v5005_v17  ;;  %v5568_v17 = vpop.f32.mrf.mxu0 }
 0x2c4   :  { %6158 = vmatprep.subr.mxu1 %v5020_v18  ;;  %v5569_v22 = vadd.f32 %v5568_v17, %v5567_v12 }
 0x2c5   :  { %6159 = vmatpush3.msra.mxu1 %v5004_v19  ;;  %v5603_v19 = vpop.f32.mrf.mxu1 }
 0x2c6   :  { %6160 = vmatprep.subr.mxu1 %v5019_v20  ;;  %v5637_v20 = vpop.f32.mrf.mxu0  ;;  %v5604_v24 = vadd.f32 %v5603_v19, %v5602_v15 }
 0x2c7   :  { %6161 = vmatpush3.msra.mxu1 %v5003_v21  ;;  %v5672_v23 = vpop.f32.mrf.mxu1 }
 0x2c8   :  { %3943 = vmatmul.mubr.f32.vlgmr.msra.gmra.mxu1 %v9405_v57  ;;  %v789_v57 = vadd.f32 %v5219_v53, %v672_v46  ;;  %v5638_v25 = vpop.f32.mrf.mxu0 }
 0x2c9   :  { %v5673_v27 = vpop.f32.mrf.mxu1  ;;  %v5639_v30 = vadd.f32 %v5638_v25, %v5637_v20  ;;  %v5036_v25 = vld [vmem:[%s9534_s7] ss:$0 sm:$0xff] }
 0x2ca   :  { %v906_v49 = vadd.f32 %v5254_v56, %v789_v57  ;;  %v5707_v28 = vpop.f32.mrf.mxu0  ;;  %v5674_v32 = vadd.f32 %v5673_v27, %v5672_v23 }
 0x2cb   :  { %v5742_v31 = vpop.f32.mrf.mxu1 }
 0x2cc   :  { %v1023_v0 = vadd.f32 %v5289_v51, %v906_v49  ;;  %v5708_v33 = vpop.f32.mrf.mxu0 }
 0x2cd   :  { %v5743_v35 = vpop.f32.mrf.mxu1  ;;  %v5709_v38 = vadd.f32 %v5708_v33, %v5707_v28 }
 0x2ce   :  { %v1140_v55 = vadd.f32 %v5324_v62, %v1023_v0  ;;  %v5777_v36 = vpop.f32.mrf.mxu0  ;;  %v5744_v40 = vadd.f32 %v5743_v35, %v5742_v31 }
 0x2d0   :  { %v1257_v4 = vadd.f32 %v5359_v2, %v1140_v55  ;;  %v5778_v41 = vpop.f32.mrf.mxu0 }
 0x2d1   :  { %v5779_v53 = vadd.f32 %v5778_v41, %v5777_v36 }
 0x2d2   :  { %v1374_v48 = vadd.f32 %v5394_v58, %v1257_v4  ;;  %v5847_v45 = vpop.f32.mrf.mxu0 }
 0x2d4   :  { %v1491_v10 = vadd.f32 %v5429_v6, %v1374_v48  ;;  %v5848_v47 = vpop.f32.mrf.mxu0 }
 0x2d5   :  { %v5849_v51 = vadd.f32 %v5848_v47, %v5847_v45 }
 0x2d6   :  { %v1608_v13 = vadd.f32 %v5464_v8, %v1491_v10  ;;  %v5917_v42 = vpop.f32.mrf.mxu0 }
 0x2d8   :  { %v1725_v18 = vadd.f32 %v5499_v14, %v1608_v13  ;;  %v5918_v63 = vpop.f32.mrf.mxu0 }
 0x2d9   :  { %v5919_v2 = vadd.f32 %v5918_v63, %v5917_v42 }
 0x2da   :  { %v1842_v21 = vadd.f32 %v5534_v16, %v1725_v18  ;;  %v5987_v1 = vpop.f32.mrf.mxu0 }
 0x2dc   :  { %v1959_v26 = vadd.f32 %v5569_v22, %v1842_v21  ;;  %v5988_v59 = vpop.f32.mrf.mxu0 }
 0x2dd   :  { %v5989_v6 = vadd.f32 %v5988_v59, %v5987_v1 }
 0x2de   :  { %v2076_v29 = vadd.f32 %v5604_v24, %v1959_v26 }
 0x2e0   :  { %v2193_v34 = vadd.f32 %v5639_v30, %v2076_v29  ;;  %v5037_v29 = vld [vmem:[#allocation2] ss:$0 sm:$0xff] }
 0x2e2   :  { %v2310_v37 = vadd.f32 %v5674_v32, %v2193_v34 }
 0x2e4   :  { %v2427_v43 = vadd.f32 %v5709_v38, %v2310_v37 }
 0x2e6   :  { %v2544_v46 = vadd.f32 %v5744_v40, %v2427_v43 }
 0x2e8   :  { %v5812_v39 = vpop.f32.mrf.mxu1  ;;  %v2661_v57 = vadd.f32 %v5779_v53, %v2544_v46 }
 0x2ea   :  { %v5813_v44 = vpop.f32.mrf.mxu1 }
 0x2eb   :  { %v5814_v56 = vadd.f32 %v5813_v44, %v5812_v39 }
 0x2ed   :  { %v2778_v49 = vadd.f32 %v5814_v56, %v2661_v57 }
 0x2ef   :  { %v2895_v0 = vadd.f32 %v5849_v51, %v2778_v49 }
 0x2f3   :  { %v6057_v5 = vpop.f32.mrf.mxu0 }
 0x2f5   :  { %v6058_v9 = vpop.f32.mrf.mxu0 }
 0x2f6   :  { %v6059_v14 = vadd.f32 %v6058_v9, %v6057_v5 }
 0x308   :  { %v5882_v54 = vpop.f32.mrf.mxu1 }
 0x30a   :  { %v5883_v60 = vpop.f32.mrf.mxu1 }
 0x30b   :  { %v5884_v62 = vadd.f32 %v5883_v60, %v5882_v54 }
 0x30d   :  { %v3012_v55 = vadd.f32 %v5884_v62, %v2895_v0 }
 0x30f   :  { %v3129_v4 = vadd.f32 %v5919_v2, %v3012_v55 }
 0x317   :  { %v6127_v12 = vpop.f32.mrf.mxu0 }
 0x319   :  { %v6128_v16 = vpop.f32.mrf.mxu0 }
 0x31a   :  { %v6129_v19 = vadd.f32 %v6128_v16, %v6127_v12 }
 0x328   :  { %v5952_v50 = vpop.f32.mrf.mxu1 }
 0x32a   :  { %v5953_v52 = vpop.f32.mrf.mxu1 }
 0x32b   :  { %v5954_v58 = vadd.f32 %v5953_v52, %v5952_v50 }
 0x32d   :  { %v3246_v48 = vadd.f32 %v5954_v58, %v3129_v4 }
 0x32f   :  { %v3363_v10 = vadd.f32 %v5989_v6, %v3246_v48 }
 0x348   :  { %v6022_v3 = vpop.f32.mrf.mxu1 }
 0x34a   :  { %v6023_v61 = vpop.f32.mrf.mxu1 }
 0x34b   :  { %v6024_v8 = vadd.f32 %v6023_v61, %v6022_v3 }
 0x34d   :  { %v3480_v13 = vadd.f32 %v6024_v8, %v3363_v10 }
 0x34f   :  { %v3597_v17 = vadd.f32 %v6059_v14, %v3480_v13 }
 0x368   :  { %v6092_v7 = vpop.f32.mrf.mxu1 }
 0x36a   :  { %v6093_v11 = vpop.f32.mrf.mxu1 }
 0x36b   :  { %v6094_v15 = vadd.f32 %v6093_v11, %v6092_v7 }
 0x36d   :  { %v3714_v18 = vadd.f32 %v6094_v15, %v3597_v17 }
 0x36f   :  { %v3831_v22 = vadd.f32 %v6129_v19, %v3714_v18 }
 0x388   :  { %v6162_v20 = vpop.f32.mrf.mxu1 }
 0x38a   :  { %v6163_v21 = vpop.f32.mrf.mxu1 }
 0x38b   :  { %v6164_v23 = vadd.f32 %v6163_v21, %v6162_v20 }
 0x38d   :  { %v3948_v24 = vadd.f32 %v6164_v23, %v3831_v22 }
 0x38f   :  { %v3949_v26 = vmax.f32 %v3948_v24, 0.0 }
 0x391   :  { %v3957_v27 = vmul.f32 %v5036_v25, %v3949_v26 }
 0x393   :  { %v3959_v28 = vsel %vm3958_vm4, %v3957_v27, 0.0 }
 0x394   :  { %3960 = vadd.xlane.f32.xlu0 %v3959_v28 }
 0x41d   :  { %v3961_v30 = vpop.xlane.xlu0 %3960 }
 0x41e   :  { %v3969_v31 = vadd.f32 %v5037_v29, %v3961_v30 }
 0x420   :  { %3971 = vst.msk [vmem:[%s9535_s9] sm:$0x3] %vm3970_vm5, %v3969_v31 }

</bundles_post_ra>
